<compile_context>
chip_gen: v6e
topology: v6e:2x2x1
jax: 0.10.0
libtpu: 0.0.40
codegen_flags: <defaults>
</compile_context>

<pallas_src>
import numpy as np
import jax
import jax.numpy as jnp
from jax.experimental import pallas as pl
from jax.experimental.pallas import tpu as pltpu

HIDDEN = 1024  # fc1 / fc2 width, fixed by the PyTorch module
LANE = 128


def _round_up(x, m):
    return (x + m - 1) // m * m


def _cdiv(a, b):
    return -(-a // b)


# ----------------------------------------------------------------------------
# Fused kernel: fc1 + ReLU + fc2 + ReLU + fused (cls ++ bbox ++ pad) head GEMM.
# ----------------------------------------------------------------------------
def _roi_head_kernel(x_ref, w1_ref, b1_ref, w2_ref, b2_ref, wh_ref, bh_ref,
                     out_ref):
    # x_ref  : (TM, D_pad)        bf16  flattened RoI features (tile of rows)
    # w1_ref : (D_pad, 1024)      bf16  ; b1_ref: (1, 1024)    f32
    # w2_ref : (1024, 1024)       bf16  ; b2_ref: (1, 1024)    f32
    # wh_ref : (1024, OUT_PAD)    bf16  ; bh_ref: (1, OUT_PAD) f32
    # out_ref: (TM, OUT_PAD)      f32   lane-dense fused output
    h = jnp.dot(x_ref[...], w1_ref[...],
                preferred_element_type=jnp.float32) + b1_ref[...]
    h = jnp.maximum(h, 0.0).astype(jnp.bfloat16)

    h = jnp.dot(h, w2_ref[...],
                preferred_element_type=jnp.float32) + b2_ref[...]
    h = jnp.maximum(h, 0.0).astype(jnp.bfloat16)

    out_ref[...] = jnp.dot(h, wh_ref[...],
                           preferred_element_type=jnp.float32) + bh_ref[...]


def roi_head_forward(roi_features, w1, b1, w2, b2, wh, bh, *, num_classes,
                     block_m=256):
    """roi_features: (N, C, R, R) -> (scores (N, nc), bbox_deltas (N, 4*nc))."""
    N = roi_features.shape[0]
    D = int(np.prod(roi_features.shape[1:]))
    D_pad = w1.shape[0]        # flattened feature dim, padded to 128 at init
    out_pad = wh.shape[1]      # 5*nc padded to a multiple of 128 at init
    nc = num_classes

    # torch.Flatten(start_dim=1) == row-major reshape. Cast to bf16 here so
    # the x tile DMA is half the bytes and the kernel needs no VPU cast.
    x = roi_features.reshape(N, D).astype(jnp.bfloat16)
    if D_pad != D:
        x = jnp.pad(x, ((0, 0), (0, D_pad - D)))

    # Row-tile selection: minimize pad rows, 16-row (bf16 sublane) alignment,
    # >=2 grid steps for big batches so v7x's two TensorCores both get work.
    num_tiles = max(1, _cdiv(N, block_m))
    if N >= 2 * LANE:
        num_tiles = max(num_tiles, 2)
    tm = _round_up(_cdiv(N, num_tiles), 16)
    n_pad = num_tiles * tm
    if n_pad != N:
        x = jnp.pad(x, ((0, n_pad - N), (0, 0)))

    grid = (num_tiles,)

    # Explicit VMEM budget: ~90% of the chip's capacity, capped at 100 MiB
    # (v5e/v6e physical 128 MiB, v7x 64 MiB/TC -> ~57 MiB).
    try:
        vmem_cap = pltpu.get_tpu_info().vmem_capacity_bytes
    except Exception:  # pragma: no cover - fallback if query is unavailable
        vmem_cap = 64 << 20
    vmem_limit = int(min(int(vmem_cap * 0.9), 100 << 20))

    flops = 2 * n_pad * (D_pad * HIDDEN + HIDDEN * HIDDEN + HIDDEN * out_pad)
    bytes_accessed = (n_pad * D_pad * 2                                   # x (bf16)
                      + (D_pad * HIDDEN + HIDDEN * HIDDEN
                         + HIDDEN * out_pad) * 2                          # weights
                      + (2 * HIDDEN + out_pad) * 4                        # biases
                      + n_pad * out_pad * 4)                              # output

    # x gets a deeper pipeline only when the grid is long enough to benefit.
    if num_tiles >= 4:
        x_spec = pl.BlockSpec((tm, D_pad), lambda i: (i, 0),
                              pipeline_mode=pl.Buffered(3))
    else:
        x_spec = pl.BlockSpec((tm, D_pad), lambda i: (i, 0))

    # Constant-over-grid weight/bias blocks: single-buffered.
    def _const_spec(shape):
        return pl.BlockSpec(shape, lambda i: (0, 0),
                            pipeline_mode=pl.Buffered(1))

    fused = pl.pallas_call(
        _roi_head_kernel,
        out_shape=jax.ShapeDtypeStruct((n_pad, out_pad), jnp.float32),
        grid_spec=pltpu.PrefetchScalarGridSpec(
            num_scalar_prefetch=0,
            grid=grid,
            in_specs=[
                x_spec,
                _const_spec((D_pad, HIDDEN)),
                _const_spec((1, HIDDEN)),
                _const_spec((HIDDEN, HIDDEN)),
                _const_spec((1, HIDDEN)),
                _const_spec((HIDDEN, out_pad)),
                _const_spec((1, out_pad)),
            ],
            out_specs=pl.BlockSpec((tm, out_pad), lambda i: (i, 0)),
        ),
        compiler_params=pltpu.CompilerParams(
            dimension_semantics=("parallel",),
            vmem_limit_bytes=vmem_limit),
        cost_estimate=pl.CostEstimate(flops=flops, transcendentals=0,
                                      bytes_accessed=bytes_accessed),
    )(x, w1, b1, w2, b2, wh, bh)

    # cls/bbox split (and row de-pad) done once in the wrapper, lane-dense in
    # the kernel.
    scores = fused[:N, :nc]
    bbox_deltas = fused[:N, nc:5 * nc]
    return scores, bbox_deltas


# ----------------------------------------------------------------------------
# Parameters (PyTorch nn.Linear-style uniform +-1/sqrt(fan_in) init)
# ----------------------------------------------------------------------------
def _uniform(key, shape, fan_in):
    bound = 1.0 / np.sqrt(fan_in)
    return jax.random.uniform(key, shape, jnp.float32, -bound, bound)


class RoIHeadPallas:
    def __init__(self, in_channels, roi_size, num_classes, *, key):
        self.in_channels = in_channels
        self.roi_size = roi_size
        self.num_classes = num_classes
        D = in_channels * roi_size * roi_size
        D_pad = _round_up(D, LANE)
        out_dim = 5 * num_classes
        out_pad = _round_up(out_dim, LANE)

        keys = jax.random.split(key, 8)
        # fc1, fc2, cls_score, bbox_pred — weights stored as (in, out), f32.
        self.w1 = _uniform(keys[0], (D, HIDDEN), D)
        self.b1 = _uniform(keys[1], (HIDDEN,), D)
        self.w2 = _uniform(keys[2], (HIDDEN, HIDDEN), HIDDEN)
        self.b2 = _uniform(keys[3], (HIDDEN,), HIDDEN)
        self.w_cls = _uniform(keys[4], (HIDDEN, num_classes), HIDDEN)
        self.b_cls = _uniform(keys[5], (num_classes,), HIDDEN)
        self.w_bbox = _uniform(keys[6], (HIDDEN, num_classes * 4), HIDDEN)
        self.b_bbox = _uniform(keys[7], (num_classes * 4,), HIDDEN)

        # Kernel-side copies (one-time host cost):
        #  * w1 rows zero-padded so D is a multiple of 128 lanes,
        #  * cls/bbox weights fused and zero-padded to a lane-dense width,
        #  * bf16 matmul operands, 2-D f32 biases.
        w1p = jnp.pad(self.w1, ((0, D_pad - D), (0, 0)))
        wh = jnp.concatenate([self.w_cls, self.w_bbox], axis=1)
        wh = jnp.pad(wh, ((0, 0), (0, out_pad - out_dim)))
        bh = jnp.concatenate([self.b_cls, self.b_bbox], axis=0)
        bh = jnp.pad(bh, ((0, out_pad - out_dim),))

        self._k_w1 = w1p.astype(jnp.bfloat16)
        self._k_w2 = self.w2.astype(jnp.bfloat16)
        self._k_wh = wh.astype(jnp.bfloat16)
        self._k_b1 = self.b1.reshape(1, -1)
        self._k_b2 = self.b2.reshape(1, -1)
        self._k_bh = bh.reshape(1, -1)

    def __call__(self, roi_features):
        return roi_head_forward(
            roi_features,
            self._k_w1, self._k_b1,
            self._k_w2, self._k_b2,
            self._k_wh, self._k_bh,
            num_classes=self.num_classes)


# ----------------------------------------------------------------------------
# Pure-JAX f32 reference (matches the PyTorch forward semantics)
# ----------------------------------------------------------------------------
def reference_forward(roi_features, model):
    x = roi_features.reshape(roi_features.shape[0], -1)
    h = jnp.maximum(x @ model.w1 + model.b1, 0.0)
    h = jnp.maximum(h @ model.w2 + model.b2, 0.0)
    scores = h @ model.w_cls + model.b_cls
    bbox = h @ model.w_bbox + model.b_bbox
    return scores, bbox


if __name__ == "__main__":
    key = jax.random.PRNGKey(0)
    k_x, k_p = jax.random.split(key)

    num_roi, in_channels, roi_size, num_classes = 8, 4, 7, 10
    roi_features = jax.random.normal(
        k_x, (num_roi, in_channels, roi_size, roi_size), jnp.float32)

    model = RoIHeadPallas(in_channels, roi_size, num_classes, key=k_p)

    scores, bbox_deltas = model(roi_features)
    scores, bbox_deltas = jax.block_until_ready((scores, bbox_deltas))
    assert scores.shape == (num_roi, num_classes), scores.shape
    assert bbox_deltas.shape == (num_roi, num_classes * 4), bbox_deltas.shape

    ref_scores, ref_bbox = reference_forward(roi_features, model)
    # Tolerances account for bf16 inputs/weights (f32 MXU accumulation).
    np.testing.assert_allclose(np.asarray(scores), np.asarray(ref_scores),
                               rtol=5e-2, atol=5e-2)
    np.testing.assert_allclose(np.asarray(bbox_deltas), np.asarray(ref_bbox),
                               rtol=5e-2, atol=5e-2)

    print("KERNEL_OK")
</pallas_src>

<mosaic_0001>
module attributes {stable_mosaic.version = 11 : i64} {
  func.func @_roi_head_kernel(%arg0: i32, %arg1: memref<16x256xbf16, #tpu.memory_space<vmem>>, %arg2: memref<256x1024xbf16, #tpu.memory_space<vmem>>, %arg3: memref<1x1024xf32, #tpu.memory_space<vmem>>, %arg4: memref<1024x1024xbf16, #tpu.memory_space<vmem>>, %arg5: memref<1x1024xf32, #tpu.memory_space<vmem>>, %arg6: memref<1024x128xbf16, #tpu.memory_space<vmem>>, %arg7: memref<1x128xf32, #tpu.memory_space<vmem>>, %arg8: memref<16x128xf32, #tpu.memory_space<vmem>>) attributes {dimension_semantics = [#tpu.dimension_semantics<parallel>], iteration_bounds = array<i64: 1>, scalar_prefetch = 0 : i64, scratch_operands = 0 : i64, tpu.core_type = #tpu.core_type<tc>, window_params = [{transform_indices = @transform_0, window_bounds = array<i64: 16, 256>}, {pipeline_mode = #tpu.pipeline_mode<synchronous>, transform_indices = @transform_1, window_bounds = array<i64: 256, 1024>}, {pipeline_mode = #tpu.pipeline_mode<synchronous>, transform_indices = @transform_2, window_bounds = array<i64: 1, 1024>}, {pipeline_mode = #tpu.pipeline_mode<synchronous>, transform_indices = @transform_3, window_bounds = array<i64: 1024, 1024>}, {pipeline_mode = #tpu.pipeline_mode<synchronous>, transform_indices = @transform_4, window_bounds = array<i64: 1, 1024>}, {pipeline_mode = #tpu.pipeline_mode<synchronous>, transform_indices = @transform_5, window_bounds = array<i64: 1024, 128>}, {pipeline_mode = #tpu.pipeline_mode<synchronous>, transform_indices = @transform_6, window_bounds = array<i64: 1, 128>}, {transform_indices = @transform_7, window_bounds = array<i64: 16, 128>}]} {
    %c0 = arith.constant 0 : index
    %c0_0 = arith.constant 0 : index
    %0 = vector.load %arg1[%c0, %c0_0] : memref<16x256xbf16, #tpu.memory_space<vmem>>, vector<16x256xbf16>
    %c0_1 = arith.constant 0 : index
    %c0_2 = arith.constant 0 : index
    %1 = vector.load %arg2[%c0_1, %c0_2] : memref<256x1024xbf16, #tpu.memory_space<vmem>>, vector<256x1024xbf16>
    %cst = arith.constant dense<0.000000e+00> : vector<16x1024xf32>
    %2 = tpu.matmul %0, %1, %cst {dimension_numbers = #tpu.dot_dimension_numbers<[1], [0], [0], [1], [0, 0, 1, 1], [], []>} : vector<16x256xbf16>, vector<256x1024xbf16>, vector<16x1024xf32> -> vector<16x1024xf32>
    %c0_3 = arith.constant 0 : index
    %c0_4 = arith.constant 0 : index
    %3 = vector.load %arg3[%c0_3, %c0_4] : memref<1x1024xf32, #tpu.memory_space<vmem>>, vector<1x1024xf32>
    %4 = vector.broadcast %3 : vector<1x1024xf32> to vector<16x1024xf32>
    %5 = arith.addf %2, %4 : vector<16x1024xf32>
    %cst_5 = arith.constant 0.000000e+00 : f32
    %6 = vector.broadcast %cst_5 : f32 to vector<16x1024xf32>
    %7 = arith.maximumf %5, %6 : vector<16x1024xf32>
    %8 = arith.truncf %7 : vector<16x1024xf32> to vector<16x1024xbf16>
    %c0_6 = arith.constant 0 : index
    %c0_7 = arith.constant 0 : index
    %9 = vector.load %arg4[%c0_6, %c0_7] : memref<1024x1024xbf16, #tpu.memory_space<vmem>>, vector<1024x1024xbf16>
    %cst_8 = arith.constant dense<0.000000e+00> : vector<16x1024xf32>
    %10 = tpu.matmul %8, %9, %cst_8 {dimension_numbers = #tpu.dot_dimension_numbers<[1], [0], [0], [1], [0, 0, 1, 1], [], []>} : vector<16x1024xbf16>, vector<1024x1024xbf16>, vector<16x1024xf32> -> vector<16x1024xf32>
    %c0_9 = arith.constant 0 : index
    %c0_10 = arith.constant 0 : index
    %11 = vector.load %arg5[%c0_9, %c0_10] : memref<1x1024xf32, #tpu.memory_space<vmem>>, vector<1x1024xf32>
    %12 = vector.broadcast %11 : vector<1x1024xf32> to vector<16x1024xf32>
    %13 = arith.addf %10, %12 : vector<16x1024xf32>
    %cst_11 = arith.constant 0.000000e+00 : f32
    %14 = vector.broadcast %cst_11 : f32 to vector<16x1024xf32>
    %15 = arith.maximumf %13, %14 : vector<16x1024xf32>
    %16 = arith.truncf %15 : vector<16x1024xf32> to vector<16x1024xbf16>
    %c0_12 = arith.constant 0 : index
    %c0_13 = arith.constant 0 : index
    %17 = vector.load %arg6[%c0_12, %c0_13] : memref<1024x128xbf16, #tpu.memory_space<vmem>>, vector<1024x128xbf16>
    %cst_14 = arith.constant dense<0.000000e+00> : vector<16x128xf32>
    %18 = tpu.matmul %16, %17, %cst_14 {dimension_numbers = #tpu.dot_dimension_numbers<[1], [0], [0], [1], [0, 0, 1, 1], [], []>} : vector<16x1024xbf16>, vector<1024x128xbf16>, vector<16x128xf32> -> vector<16x128xf32>
    %c0_15 = arith.constant 0 : index
    %c0_16 = arith.constant 0 : index
    %19 = vector.load %arg7[%c0_15, %c0_16] : memref<1x128xf32, #tpu.memory_space<vmem>>, vector<1x128xf32>
    %20 = vector.broadcast %19 : vector<1x128xf32> to vector<16x128xf32>
    %21 = arith.addf %18, %20 : vector<16x128xf32>
    %c0_17 = arith.constant 0 : index
    %c0_18 = arith.constant 0 : index
    %22 = vector.load %arg8[%c0_17, %c0_18] : memref<16x128xf32, #tpu.memory_space<vmem>>, vector<16x128xf32>
    tpu.vector_store %arg8[%c0_17, %c0_18], %21 {strides = array<i32>} : memref<16x128xf32, #tpu.memory_space<vmem>>, vector<16x128xf32>,
    return
  }
  func.func @transform_0(%arg0: i32) -> (i32, i32) {
    %c0_i32 = arith.constant 0 : i32
    %c0_i32_0 = arith.constant 0 : i32
    return %arg0, %c0_i32 : i32, i32
  }
  func.func @transform_1(%arg0: i32) -> (i32, i32) {
    %c0_i32 = arith.constant 0 : i32
    %c0_i32_0 = arith.constant 0 : i32
    %c0_i32_1 = arith.constant 0 : i32
    return %c0_i32, %c0_i32_0 : i32, i32
  }
  func.func @transform_2(%arg0: i32) -> (i32, i32) {
    %c0_i32 = arith.constant 0 : i32
    %c0_i32_0 = arith.constant 0 : i32
    %c0_i32_1 = arith.constant 0 : i32
    return %c0_i32, %c0_i32_0 : i32, i32
  }
  func.func @transform_3(%arg0: i32) -> (i32, i32) {
    %c0_i32 = arith.constant 0 : i32
    %c0_i32_0 = arith.constant 0 : i32
    %c0_i32_1 = arith.constant 0 : i32
    return %c0_i32, %c0_i32_0 : i32, i32
  }
  func.func @transform_4(%arg0: i32) -> (i32, i32) {
    %c0_i32 = arith.constant 0 : i32
    %c0_i32_0 = arith.constant 0 : i32
    %c0_i32_1 = arith.constant 0 : i32
    return %c0_i32, %c0_i32_0 : i32, i32
  }
  func.func @transform_5(%arg0: i32) -> (i32, i32) {
    %c0_i32 = arith.constant 0 : i32
    %c0_i32_0 = arith.constant 0 : i32
    %c0_i32_1 = arith.constant 0 : i32
    return %c0_i32, %c0_i32_0 : i32, i32
  }
  func.func @transform_6(%arg0: i32) -> (i32, i32) {
    %c0_i32 = arith.constant 0 : i32
    %c0_i32_0 = arith.constant 0 : i32
    %c0_i32_1 = arith.constant 0 : i32
    return %c0_i32, %c0_i32_0 : i32, i32
  }
  func.func @transform_7(%arg0: i32) -> (i32, i32) {
    %c0_i32 = arith.constant 0 : i32
    %c0_i32_0 = arith.constant 0 : i32
    return %arg0, %c0_i32 : i32, i32
  }
}

</mosaic_0001>

<bundles_post_ra>
// kernel: tpu_custom_call.1
= control target key start
LH: loop header
LB: loop body
LE: loop exit
PB: predicated region body
PF: predicated region fallthrough
CT: control target
= control target key end

     0   :  { %12 = vsyncpa [#allocation3], 0  ;;  %s7018_s0 = inlined_call_operand.hbm [shape: bf16[16,256], index: 0, kind: input, shape index: {}]   ;;  %s7019_s1 = inlined_call_operand.hbm [shape: bf16[256,1024], index: 1, kind: input, shape index: {}]   ;;  %s7020_s2 = inlined_call_operand.hbm [shape: f32[1,1024], index: 2, kind: input, shape index: {}]   ;;  %s7021_s3 = inlined_call_operand.hbm [shape: bf16[1024,1024], index: 3, kind: input, shape index: {}]   ;;  %s7022_s4 = inlined_call_operand.hbm [shape: f32[1,1024], index: 4, kind: input, shape index: {}]   ;;  %s7023_s5 = inlined_call_operand.hbm [shape: bf16[1024,128], index: 5, kind: input, shape index: {}]   ;;  %s7024_s6 = inlined_call_operand.hbm [shape: f32[1,128], index: 6, kind: input, shape index: {}]   ;;  %s7025_s7 = inlined_call_operand.hbm [shape: f32[16,128], index: 7, kind: output, shape index: {}]  }
   0x1   :  { %13 = vsyncpa [#allocation6], 0 }
   0x2   :  { %14 = vsyncpa [#allocation9], 0 }
   0x3   :  { %15 = vsyncpa [#allocation12], 0 }
   0x4   :  { %16 = vsyncpa [#allocation4], 0  ;;  %s6712_s24 = smov [#allocation5]  }
   0x5   :  { %s34_s25 = sshll.u32 %s6712_s24, 4  ;;  %s35_s25 = int_to_ptr.vmem [resolvable:$true] %s34_s25 }
   0x6   :  { %s6550_s26 = scalar_lea.vmem %s35_s25, 16384  ;;  %p6555_p1 = scmp.lt.s32.totalorder %s35_s25, %s35_s25 }
   0x7   :  { %p6551_p0 = scmp.ne.s32.totalorder %s35_s25, %s6550_s26  ;;  %p6556_p2 = scmp.lt.s32.totalorder %s6550_s26, %s6550_s26 }
   0x9   :  { %p6557_p3 = por %p6556_p2, %p6555_p1 }
   0xb   :  { %p6558_p4 = pnand %p6557_p3, %p6551_p0 }
   0xd   :  { %6561 = shalt.err (!%p6558_p4)
}
   0xe   :  { %s6713_s27 = smov 512   ;;  %s6714_s28 = smov 32  }
   0xf   :  { %40 = dma.hbm_to_vmem [thread:$0]  %s7019_s1, 16384, %s35_s25, [#allocation6], %s6713_s27, %s6713_s27, %s6714_s28  }
  0x10   :  { %s6715_s8 = smov [#allocation8]   ;;  %s6716_s10 = smov [#allocation11]  }
  0x11   :  { %s56_s9 = sshll.u32 %s6715_s8, 4  ;;  %s78_s11 = sshll.u32 %s6716_s10, 4  ;;  %s57_s9 = int_to_ptr.vmem [resolvable:$true] %s56_s9  ;;  %s79_s11 = int_to_ptr.vmem [resolvable:$true] %s78_s11 }
  0x12   :  { %s6570_s12 = scalar_lea.vmem %s57_s9, 65536  ;;  %p6575_p6 = scmp.lt.s32.totalorder %s57_s9, %s57_s9 }
  0x13   :  { %p6571_p5 = scmp.ne.s32.totalorder %s57_s9, %s6570_s12  ;;  %p6576_p7 = scmp.lt.s32.totalorder %s6570_s12, %s6570_s12 }
  0x15   :  { %p6577_p8 = por %p6576_p7, %p6575_p6 }
  0x17   :  { %p6578_p9 = pnand %p6577_p8, %p6571_p5 }
  0x19   :  { %6581 = shalt.err (!%p6578_p9)
}
  0x1a   :  { %62 = dma.hbm_to_vmem [thread:$0]  %s7021_s3, 65536, %s57_s9, [#allocation9], %s6713_s27, %s6713_s27, %s6714_s28  }
  0x1b   :  { %s6590_s15 = scalar_lea.vmem %s79_s11, 8192  ;;  %p6595_p11 = scmp.lt.s32.totalorder %s79_s11, %s79_s11 }
  0x1c   :  { %p6591_p10 = scmp.ne.s32.totalorder %s79_s11, %s6590_s15  ;;  %p6596_p12 = scmp.lt.s32.totalorder %s6590_s15, %s6590_s15 }
  0x1e   :  { %p6597_p13 = por %p6596_p12, %p6595_p11 }
  0x20   :  { %p6598_p0 = pnand %p6597_p13, %p6591_p10 }
  0x22   :  { %6601 = shalt.err (!%p6598_p0)
}
  0x23   :  { %s6717_s1 = smov 64   ;;  %s6718_s16 = smov 4  }
  0x24   :  { %84 = dma.hbm_to_vmem [thread:$0]  %s7023_s5, 8192, %s79_s11, [#allocation12], %s6717_s1, %s6717_s1, %s6718_s16  }
  0x25   :  { %s6719_s19 = smov [#allocation2]  }
  0x26   :  { %s22_s20 = sshll.u32 %s6719_s19, 4  ;;  %s23_s20 = int_to_ptr.vmem [resolvable:$true] %s22_s20 }
  0x27   :  { %s6610_s21 = scalar_lea.vmem %s23_s20, 256  ;;  %p6615_p2 = scmp.lt.s32.totalorder %s23_s20, %s23_s20 }
  0x28   :  { %p6611_p1 = scmp.ne.s32.totalorder %s23_s20, %s6610_s21  ;;  %p6616_p3 = scmp.lt.s32.totalorder %s6610_s21, %s6610_s21 }
  0x2a   :  { %p6617_p4 = por %p6616_p3, %p6615_p2 }
  0x2c   :  { %p6618_p5 = pnand %p6617_p4, %p6611_p1 }
  0x2e   :  { %6621 = shalt.err (!%p6618_p5)
}
  0x2f   :  { %s6720_s3 = smov 128   ;;  %s6721_s22 = smov 8  }
  0x30   :  { %28 = dma.hbm_to_vmem [thread:$0]  %s7018_s0, 256, %s23_s20, [#allocation3], %s6720_s3, %s6720_s3, %s6721_s22  }
  0x31   :  { %s6722_s5 = smov [#allocation7]   ;;  %s6723_s26 = smov [#allocation10]  }
  0x32   :  { %s47_s25 = sshll.u32 %s6722_s5, 4  ;;  %s69_s27 = sshll.u32 %s6723_s26, 4  ;;  %s48_s25 = int_to_ptr.vmem [resolvable:$true] %s47_s25  ;;  %s70_s27 = int_to_ptr.vmem [resolvable:$true] %s69_s27 }
  0x33   :  { %s6630_s28 = scalar_lea.vmem %s48_s25, 128  ;;  %p6635_p7 = scmp.lt.s32.totalorder %s48_s25, %s48_s25 }
  0x34   :  { %p6631_p6 = scmp.ne.s32.totalorder %s48_s25, %s6630_s28  ;;  %p6636_p8 = scmp.lt.s32.totalorder %s6630_s28, %s6630_s28 }
  0x36   :  { %p6637_p9 = por %p6636_p8, %p6635_p7 }
  0x38   :  { %p6638_p10 = pnand %p6637_p9, %p6631_p6 }
  0x3a   :  { %6641 = shalt.err (!%p6638_p10)
}
  0x3b   :  { %50 = dma.hbm_to_vmem [thread:$0]  %s7020_s2, 128, %s48_s25, [#allocation6]  }
  0x3c   :  { %s6650_s8 = scalar_lea.vmem %s70_s27, 128  ;;  %p6655_p12 = scmp.lt.s32.totalorder %s70_s27, %s70_s27 }
  0x3d   :  { %p6651_p11 = scmp.ne.s32.totalorder %s70_s27, %s6650_s8  ;;  %p6656_p13 = scmp.lt.s32.totalorder %s6650_s8, %s6650_s8 }
  0x3f   :  { %p6657_p0 = por %p6656_p13, %p6655_p12 }
  0x41   :  { %p6658_p1 = pnand %p6657_p0, %p6651_p11 }
  0x43   :  { %6661 = shalt.err (!%p6658_p1)
}
  0x44   :  { %72 = dma.hbm_to_vmem [thread:$0]  %s7022_s4, 128, %s70_s27, [#allocation9]  }
  0x45   :  { %s6724_s10 = smov [#allocation13]  }
  0x46   :  { %s91_s11 = sshll.u32 %s6724_s10, 4  ;;  %s92_s11 = int_to_ptr.vmem [resolvable:$true] %s91_s11 }
  0x47   :  { %s6670_s12 = scalar_lea.vmem %s92_s11, 16  ;;  %s6674_s13 = scalar_lea.vmem %s92_s11, 32 }
  0x48   :  { %p6671_p2 = scmp.ne.s32.totalorder %s92_s11, %s6670_s12  ;;  %p6675_p3 = scmp.lt.s32.totalorder %s92_s11, %s92_s11 }
  0x49   :  { %p6676_p4 = scmp.lt.s32.totalorder %s6674_s13, %s6670_s12 }
  0x4b   :  { %p6677_p5 = por %p6676_p4, %p6675_p3 }
  0x4d   :  { %p6678_p6 = pnand %p6677_p5, %p6671_p2 }
  0x4f   :  { %6681 = shalt.err (!%p6678_p6)
}
  0x50   :  { %94 = dma.hbm_to_vmem [thread:$0]  %s7024_s6, 16, %s92_s11, [#allocation12]  }
  0x51   :  { %6702 = dma.done.wait [#allocation3], 256  }
  0x52   :  { %6703 = vsyncadd [#allocation3], 4294967040 }
  0x53   :  { %6704 = dma.done.wait [#allocation6], 16512  }
  0x54   :  { %6705 = vsyncadd [#allocation6], 4294950784 }
  0x55   :  { %6706 = dma.done.wait [#allocation9], 65664  }
  0x56   :  { %6707 = vsyncadd [#allocation9], 4294901632 }
  0x57   :  { %6708 = dma.done.wait [#allocation12], 8208  }
  0x58   :  { %6709 = vsyncadd [#allocation12], 4294959088  ;;  %v175_v0 = vld [vmem:[#allocation5 + $0x1c0] sm:$0xff]  ;;  %v176_v2 = vld [vmem:[#allocation5 + $0x1c8] sm:$0xff]  ;;  %s6725_s4 = smov [#allocation14]  }
  0x59   :  { %v179_v1 = vld [vmem:[#allocation5 + $0x1e0] sm:$0xff]  ;;  %v180_v4 = vld [vmem:[#allocation5 + $0x1e8] sm:$0xff]  ;;  %v6790_v56 = vld [vmem:[#allocation2 + $0x4] ss:$8 sps:$4 sm:$0xff]   ;;  %s5651_s6 = sshll.u32 %s6725_s4, 4  ;;  %s5652_s6 = int_to_ptr.vmem [resolvable:$true] %s5651_s6 }
  0x5a   :  { %v5725_v3 = vcombine.high %v175_v0, %v179_v1  ;;  %v5724_v5 = vcombine.low %v175_v0, %v179_v1  ;;  %v167_v6 = vld [vmem:[#allocation5 + $0x180] sm:$0xff]  ;;  %v5727_v8 = vcombine.high %v176_v2, %v180_v4  ;;  %v5726_v9 = vcombine.low %v176_v2, %v180_v4  ;;  %v168_v11 = vld [vmem:[#allocation5 + $0x188] sm:$0xff]  ;;  %971 = vmatprep.mubr.bf16.mxu0 %v6790_v56  ;;  %s6682_s15 = scalar_lea.vmem %s5652_s6, 256  ;;  %p6687_p8 = scmp.lt.s32.totalorder %s5652_s6, %s5652_s6 }
  0x5b   :  { %v171_v7 = vld [vmem:[#allocation5 + $0x1a0] sm:$0xff]  ;;  %v172_v12 = vld [vmem:[#allocation5 + $0x1a8] sm:$0xff]  ;;  %1014 = vmatprep.mubr.bf16.mxu1 %v6790_v56  ;;  %p6683_p7 = scmp.ne.s32.totalorder %s5652_s6, %s6682_s15  ;;  %p6688_p9 = scmp.lt.s32.totalorder %s6682_s15, %s6682_s15 }
  0x5c   :  { %v5717_v10 = vcombine.high %v167_v6, %v171_v7  ;;  %v159_v13 = vld [vmem:[#allocation5 + $0x140] sm:$0xff]  ;;  %939 = vmatprep.subr.bf16.mxu0 %v5725_v3  ;;  %v5719_v14 = vcombine.high %v168_v11, %v172_v12  ;;  %v160_v16 = vld [vmem:[#allocation5 + $0x148] sm:$0xff]  ;;  %982 = vmatprep.subr.bf16.mxu1 %v5727_v8  ;;  %v5716_v18 = vcombine.low %v167_v6, %v171_v7 }
  0x5d   :  { %v163_v15 = vld [vmem:[#allocation5 + $0x160] sm:$0xff]  ;;  %v164_v17 = vld [vmem:[#allocation5 + $0x168] sm:$0xff]  ;;  %940 = vmatpush1.bf16.msra.mxu0 %v5724_v5  ;;  %983 = vmatpush1.bf16.msra.mxu1 %v5726_v9  ;;  %v5718_v19 = vcombine.low %v168_v11, %v172_v12  ;;  %p6689_p10 = por %p6688_p9, %p6687_p8 }
  0x5e   :  { %941 = vmatprep.subr.bf16.mxu0 %v5717_v10  ;;  %v5709_v20 = vcombine.high %v159_v13, %v163_v15  ;;  %984 = vmatprep.subr.bf16.mxu1 %v5719_v14  ;;  %v5711_v21 = vcombine.high %v160_v16, %v164_v17  ;;  %v151_v22 = vld [vmem:[#allocation5 + $0x100] sm:$0xff]  ;;  %v152_v24 = vld [vmem:[#allocation5 + $0x108] sm:$0xff]  ;;  %v5708_v26 = vcombine.low %v159_v13, %v163_v15 }
  0x5f   :  { %v155_v23 = vld [vmem:[#allocation5 + $0x120] sm:$0xff]  ;;  %v156_v25 = vld [vmem:[#allocation5 + $0x128] sm:$0xff]  ;;  %v5710_v27 = vcombine.low %v160_v16, %v164_v17  ;;  %p6690_p11 = pnand %p6689_p10, %p6683_p7 }
  0x60   :  { %v5701_v28 = vcombine.high %v151_v22, %v155_v23  ;;  %v5703_v29 = vcombine.high %v152_v24, %v156_v25  ;;  %v143_v30 = vld [vmem:[#allocation5 + $0xc0] sm:$0xff]  ;;  %v144_v32 = vld [vmem:[#allocation5 + $0xc8] sm:$0xff]  ;;  %v5700_v34 = vcombine.low %v151_v22, %v155_v23  ;;  %v5702_v35 = vcombine.low %v152_v24, %v156_v25 }
  0x61   :  { %942 = vmatpush1.bf16.msra.mxu0 %v5716_v18  ;;  %985 = vmatpush1.bf16.msra.mxu1 %v5718_v19  ;;  %v147_v31 = vld [vmem:[#allocation5 + $0xe0] sm:$0xff]  ;;  %v148_v33 = vld [vmem:[#allocation5 + $0xe8] sm:$0xff] }
  0x62   :  { %943 = vmatprep.subr.bf16.mxu0 %v5709_v20  ;;  %986 = vmatprep.subr.bf16.mxu1 %v5711_v21  ;;  %v5693_v36 = vcombine.high %v143_v30, %v147_v31  ;;  %v5695_v37 = vcombine.high %v144_v32, %v148_v33  ;;  %v135_v38 = vld [vmem:[#allocation5 + $0x80] sm:$0xff]  ;;  %v136_v40 = vld [vmem:[#allocation5 + $0x88] sm:$0xff]  ;;  %v5692_v42 = vcombine.low %v143_v30, %v147_v31 }
  0x63   :  { %v139_v39 = vld [vmem:[#allocation5 + $0xa0] sm:$0xff]  ;;  %v140_v41 = vld [vmem:[#allocation5 + $0xa8] sm:$0xff]  ;;  %v5694_v43 = vcombine.low %v144_v32, %v148_v33 }
  0x64   :  { %v5685_v44 = vcombine.high %v135_v38, %v139_v39  ;;  %v5687_v45 = vcombine.high %v136_v40, %v140_v41  ;;  %v127_v46 = vld [vmem:[#allocation5 + $0x40] sm:$0xff]  ;;  %v128_v48 = vld [vmem:[#allocation5 + $0x48] sm:$0xff]  ;;  %v5684_v50 = vcombine.low %v135_v38, %v139_v39  ;;  %v5686_v51 = vcombine.low %v136_v40, %v140_v41 }
  0x65   :  { %944 = vmatpush1.bf16.msra.mxu0 %v5708_v26  ;;  %987 = vmatpush1.bf16.msra.mxu1 %v5710_v27  ;;  %v131_v47 = vld [vmem:[#allocation5 + $0x60] sm:$0xff]  ;;  %v132_v49 = vld [vmem:[#allocation5 + $0x68] sm:$0xff] }
  0x66   :  { %945 = vmatprep.subr.bf16.mxu0 %v5701_v28  ;;  %988 = vmatprep.subr.bf16.mxu1 %v5703_v29  ;;  %v5677_v52 = vcombine.high %v127_v46, %v131_v47  ;;  %v5679_v53 = vcombine.high %v128_v48, %v132_v49  ;;  %v119_v54 = vld [vmem:[#allocation5] sm:$0xff]  ;;  %v120_v57 = vld [vmem:[#allocation5 + $0x8] sm:$0xff]  ;;  %v5676_v59 = vcombine.low %v127_v46, %v131_v47 }
  0x67   :  { %v123_v55 = vld [vmem:[#allocation5 + $0x20] sm:$0xff]  ;;  %v124_v58 = vld [vmem:[#allocation5 + $0x28] sm:$0xff]  ;;  %v5678_v60 = vcombine.low %v128_v48, %v132_v49 }
  0x68   :  { %v5669_v61 = vcombine.high %v119_v54, %v123_v55  ;;  %v5671_v62 = vcombine.high %v120_v57, %v124_v58  ;;  %v239_v63 = vld [vmem:[#allocation5 + $0x3c0] sm:$0xff]  ;;  %v240_v1 = vld [vmem:[#allocation5 + $0x3c8] sm:$0xff]  ;;  %v5668_v3 = vcombine.low %v119_v54, %v123_v55  ;;  %v5670_v4 = vcombine.low %v120_v57, %v124_v58 }
  0x69   :  { %946 = vmatpush1.bf16.msra.mxu0 %v5700_v34  ;;  %989 = vmatpush1.bf16.msra.mxu1 %v5702_v35  ;;  %v243_v0 = vld [vmem:[#allocation5 + $0x3e0] sm:$0xff]  ;;  %v244_v2 = vld [vmem:[#allocation5 + $0x3e8] sm:$0xff] }
  0x6a   :  { %947 = vmatprep.subr.bf16.mxu0 %v5693_v36  ;;  %990 = vmatprep.subr.bf16.mxu1 %v5695_v37  ;;  %v5789_v5 = vcombine.high %v239_v63, %v243_v0  ;;  %v5791_v6 = vcombine.high %v240_v1, %v244_v2  ;;  %v231_v7 = vld [vmem:[#allocation5 + $0x380] sm:$0xff]  ;;  %v232_v9 = vld [vmem:[#allocation5 + $0x388] sm:$0xff]  ;;  %v5788_v11 = vcombine.low %v239_v63, %v243_v0  ;;  %v177_v0 = vld [vmem:[#allocation5 + $0x1d0] sm:$0xff] }
  0x6b   :  { %v235_v8 = vld [vmem:[#allocation5 + $0x3a0] sm:$0xff]  ;;  %v236_v10 = vld [vmem:[#allocation5 + $0x3a8] sm:$0xff]  ;;  %v5790_v12 = vcombine.low %v240_v1, %v244_v2  ;;  %v181_v1 = vld [vmem:[#allocation5 + $0x1f0] sm:$0xff] }
  0x6c   :  { %v5781_v13 = vcombine.high %v231_v7, %v235_v8  ;;  %v5783_v14 = vcombine.high %v232_v9, %v236_v10  ;;  %v223_v15 = vld [vmem:[#allocation5 + $0x340] sm:$0xff]  ;;  %v224_v17 = vld [vmem:[#allocation5 + $0x348] sm:$0xff]  ;;  %v5780_v19 = vcombine.low %v231_v7, %v235_v8  ;;  %v5782_v20 = vcombine.low %v232_v9, %v236_v10  ;;  %v178_v2 = vld [vmem:[#allocation5 + $0x1d8] sm:$0xff] }
  0x6d   :  { %948 = vmatpush1.bf16.msra.mxu0 %v5692_v42  ;;  %991 = vmatpush1.bf16.msra.mxu1 %v5694_v43  ;;  %v227_v16 = vld [vmem:[#allocation5 + $0x360] sm:$0xff]  ;;  %v228_v18 = vld [vmem:[#allocation5 + $0x368] sm:$0xff]  ;;  %v6794_v8 = vld [vmem:[#allocation2] ss:$8 sps:$4 sm:$0xff]   ;;  %v5729_v9 = vcombine.high %v177_v0, %v181_v1 }
  0x6e   :  { %949 = vmatprep.subr.bf16.mxu0 %v5685_v44  ;;  %992 = vmatprep.subr.bf16.mxu1 %v5687_v45  ;;  %v5773_v21 = vcombine.high %v223_v15, %v227_v16  ;;  %v5775_v22 = vcombine.high %v224_v17, %v228_v18  ;;  %v215_v23 = vld [vmem:[#allocation5 + $0x300] sm:$0xff]  ;;  %v216_v25 = vld [vmem:[#allocation5 + $0x308] sm:$0xff]  ;;  %v5772_v27 = vcombine.low %v223_v15, %v227_v16  ;;  %v170_v10 = vld [vmem:[#allocation5 + $0x198] sm:$0xff] }
  0x6f   :  { %v219_v24 = vld [vmem:[#allocation5 + $0x320] sm:$0xff]  ;;  %v220_v26 = vld [vmem:[#allocation5 + $0x328] sm:$0xff]  ;;  %v5774_v28 = vcombine.low %v224_v17, %v228_v18  ;;  %v165_v15 = vld [vmem:[#allocation5 + $0x170] sm:$0xff] }
  0x70   :  { %v5765_v29 = vcombine.high %v215_v23, %v219_v24  ;;  %v5767_v30 = vcombine.high %v216_v25, %v220_v26  ;;  %v207_v31 = vld [vmem:[#allocation5 + $0x2c0] sm:$0xff]  ;;  %v208_v33 = vld [vmem:[#allocation5 + $0x2c8] sm:$0xff]  ;;  %v5764_v35 = vcombine.low %v215_v23, %v219_v24  ;;  %v5766_v36 = vcombine.low %v216_v25, %v220_v26  ;;  %v162_v18 = vld [vmem:[#allocation5 + $0x158] sm:$0xff] }
  0x71   :  { %950 = vmatpush1.bf16.msra.mxu0 %v5684_v50  ;;  %993 = vmatpush1.bf16.msra.mxu1 %v5686_v51  ;;  %v211_v32 = vld [vmem:[#allocation5 + $0x2e0] sm:$0xff]  ;;  %v212_v34 = vld [vmem:[#allocation5 + $0x2e8] sm:$0xff]  ;;  %v157_v23 = vld [vmem:[#allocation5 + $0x130] sm:$0xff] }
  0x72   :  { %951 = vmatprep.subr.bf16.mxu0 %v5677_v52  ;;  %994 = vmatprep.subr.bf16.mxu1 %v5679_v53  ;;  %v5757_v37 = vcombine.high %v207_v31, %v211_v32  ;;  %v5759_v38 = vcombine.high %v208_v33, %v212_v34  ;;  %v199_v39 = vld [vmem:[#allocation5 + $0x280] sm:$0xff]  ;;  %v200_v41 = vld [vmem:[#allocation5 + $0x288] sm:$0xff]  ;;  %v5756_v43 = vcombine.low %v207_v31, %v211_v32  ;;  %v154_v26 = vld [vmem:[#allocation5 + $0x118] sm:$0xff] }
  0x73   :  { %v203_v40 = vld [vmem:[#allocation5 + $0x2a0] sm:$0xff]  ;;  %v204_v42 = vld [vmem:[#allocation5 + $0x2a8] sm:$0xff]  ;;  %v5758_v44 = vcombine.low %v208_v33, %v212_v34  ;;  %v149_v31 = vld [vmem:[#allocation5 + $0xf0] sm:$0xff] }
  0x74   :  { %v5749_v45 = vcombine.high %v199_v39, %v203_v40  ;;  %v5751_v46 = vcombine.high %v200_v41, %v204_v42  ;;  %v191_v47 = vld [vmem:[#allocation5 + $0x240] sm:$0xff]  ;;  %v192_v49 = vld [vmem:[#allocation5 + $0x248] sm:$0xff]  ;;  %v5748_v51 = vcombine.low %v199_v39, %v203_v40  ;;  %v5750_v52 = vcombine.low %v200_v41, %v204_v42  ;;  %v146_v34 = vld [vmem:[#allocation5 + $0xd8] sm:$0xff] }
  0x75   :  { %952 = vmatpush1.bf16.msra.mxu0 %v5676_v59  ;;  %995 = vmatpush1.bf16.msra.mxu1 %v5678_v60  ;;  %v195_v48 = vld [vmem:[#allocation5 + $0x260] sm:$0xff]  ;;  %v196_v50 = vld [vmem:[#allocation5 + $0x268] sm:$0xff]  ;;  %v141_v39 = vld [vmem:[#allocation5 + $0xb0] sm:$0xff] }
  0x76   :  { %953 = vmatprep.subr.bf16.mxu0 %v5669_v61  ;;  %996 = vmatprep.subr.bf16.mxu1 %v5671_v62  ;;  %v5741_v53 = vcombine.high %v191_v47, %v195_v48  ;;  %v5743_v54 = vcombine.high %v192_v49, %v196_v50  ;;  %v183_v55 = vld [vmem:[#allocation5 + $0x200] sm:$0xff]  ;;  %v184_v58 = vld [vmem:[#allocation5 + $0x208] sm:$0xff]  ;;  %v5740_v60 = vcombine.low %v191_v47, %v195_v48  ;;  %v138_v41 = vld [vmem:[#allocation5 + $0x98] sm:$0xff] }
  0x77   :  { %v187_v57 = vld [vmem:[#allocation5 + $0x220] sm:$0xff]  ;;  %v188_v59 = vld [vmem:[#allocation5 + $0x228] sm:$0xff]  ;;  %v5742_v61 = vcombine.low %v192_v49, %v196_v50  ;;  %v142_v42 = vld [vmem:[#allocation5 + $0xb8] sm:$0xff] }
  0x78   :  { %v5733_v62 = vcombine.high %v183_v55, %v187_v57  ;;  %v5735_v63 = vcombine.high %v184_v58, %v188_v59  ;;  %v5734_v7 = vcombine.low %v184_v58, %v188_v59  ;;  %v130_v49 = vld [vmem:[#allocation5 + $0x58] sm:$0xff] }
  0x79   :  { %954 = vmatpush1.bf16.msra.mxu0 %v5668_v3  ;;  %997 = vmatpush1.bf16.msra.mxu1 %v5670_v4  ;;  %v182_v3 = vld [vmem:[#allocation5 + $0x1f8] sm:$0xff]  ;;  %v5732_v4 = vcombine.low %v183_v55, %v187_v57  ;;  %v5690_v55 = vcombine.low %v138_v41, %v142_v42 }
  0x7a   :  { %955 = vmatprep.subr.bf16.mxu0 %v5789_v5  ;;  %998 = vmatprep.subr.bf16.mxu1 %v5791_v6  ;;  %v169_v5 = vld [vmem:[#allocation5 + $0x190] sm:$0xff]  ;;  %v5730_v16 = vcombine.low %v178_v2, %v182_v3  ;;  %v134_v50 = vld [vmem:[#allocation5 + $0x78] sm:$0xff] }
  0x7b   :  { %v173_v6 = vld [vmem:[#allocation5 + $0x1b0] sm:$0xff]  ;;  %v122_v58 = vld [vmem:[#allocation5 + $0x18] sm:$0xff] }
  0x7c   :  { %v5721_v17 = vcombine.high %v169_v5, %v173_v6  ;;  %v126_v59 = vld [vmem:[#allocation5 + $0x38] sm:$0xff] }
  0x7d   :  { %956 = vmatpush2.bf16.msra.mxu0 %v5788_v11  ;;  %999 = vmatpush2.bf16.msra.mxu1 %v5790_v12  ;;  %v174_v11 = vld [vmem:[#allocation5 + $0x1b8] sm:$0xff]  ;;  %v5731_v12 = vcombine.high %v178_v2, %v182_v3 }
  0x7e   :  { %957 = vmatprep.subr.bf16.mxu0 %v5781_v13  ;;  %1000 = vmatprep.subr.bf16.mxu1 %v5783_v14  ;;  %v5728_v13 = vcombine.low %v177_v0, %v181_v1  ;;  %v161_v14 = vld [vmem:[#allocation5 + $0x150] sm:$0xff]  ;;  %v5722_v24 = vcombine.low %v170_v10, %v174_v11  ;;  %v5682_v0 = vcombine.low %v130_v49, %v134_v50  ;;  %v242_v2 = vld [vmem:[#allocation5 + $0x3d8] sm:$0xff] }
  0x7f   :  { %v5713_v25 = vcombine.high %v161_v14, %v165_v15  ;;  %v246_v3 = vld [vmem:[#allocation5 + $0x3f8] sm:$0xff] }
  0x81   :  { %958 = vmatpush2.bf16.msra.mxu0 %v5780_v19  ;;  %1001 = vmatpush2.bf16.msra.mxu1 %v5782_v20  ;;  %v166_v19 = vld [vmem:[#allocation5 + $0x178] sm:$0xff]  ;;  %v5723_v20 = vcombine.high %v170_v10, %v174_v11 }
  0x82   :  { %959 = vmatprep.subr.bf16.mxu0 %v5773_v21  ;;  %1002 = vmatprep.subr.bf16.mxu1 %v5775_v22  ;;  %v5720_v21 = vcombine.low %v169_v5, %v173_v6  ;;  %v153_v22 = vld [vmem:[#allocation5 + $0x110] sm:$0xff]  ;;  %v5714_v32 = vcombine.low %v162_v18, %v166_v19  ;;  %v234_v11 = vld [vmem:[#allocation5 + $0x398] sm:$0xff] }
  0x83   :  { %v5705_v33 = vcombine.high %v153_v22, %v157_v23  ;;  %v233_v6 = vld [vmem:[#allocation5 + $0x390] sm:$0xff] }
  0x85   :  { %960 = vmatpush2.bf16.msra.mxu0 %v5772_v27  ;;  %1003 = vmatpush2.bf16.msra.mxu1 %v5774_v28  ;;  %v158_v27 = vld [vmem:[#allocation5 + $0x138] sm:$0xff]  ;;  %v5715_v28 = vcombine.high %v162_v18, %v166_v19 }
  0x86   :  { %961 = vmatprep.subr.bf16.mxu0 %v5765_v29  ;;  %1004 = vmatprep.subr.bf16.mxu1 %v5767_v30  ;;  %v5712_v29 = vcombine.low %v161_v14, %v165_v15  ;;  %v145_v30 = vld [vmem:[#allocation5 + $0xd0] sm:$0xff]  ;;  %v5706_v40 = vcombine.low %v154_v26, %v158_v27  ;;  %v226_v19 = vld [vmem:[#allocation5 + $0x358] sm:$0xff] }
  0x87   :  { %v225_v15 = vld [vmem:[#allocation5 + $0x350] sm:$0xff] }
  0x89   :  { %962 = vmatpush2.bf16.msra.mxu0 %v5764_v35  ;;  %1005 = vmatpush2.bf16.msra.mxu1 %v5766_v36  ;;  %v150_v35 = vld [vmem:[#allocation5 + $0xf8] sm:$0xff]  ;;  %v5707_v36 = vcombine.high %v154_v26, %v158_v27 }
  0x8a   :  { %963 = vmatprep.subr.bf16.mxu0 %v5757_v37  ;;  %1006 = vmatprep.subr.bf16.mxu1 %v5759_v38  ;;  %v5704_v37 = vcombine.low %v153_v22, %v157_v23  ;;  %v137_v38 = vld [vmem:[#allocation5 + $0x90] sm:$0xff]  ;;  %v5698_v47 = vcombine.low %v146_v34, %v150_v35  ;;  %v218_v27 = vld [vmem:[#allocation5 + $0x318] sm:$0xff] }
  0x8b   :  { %v5689_v48 = vcombine.high %v137_v38, %v141_v39  ;;  %v217_v23 = vld [vmem:[#allocation5 + $0x310] sm:$0xff] }
  0x8d   :  { %964 = vmatpush2.bf16.msra.mxu0 %v5756_v43  ;;  %1007 = vmatpush2.bf16.msra.mxu1 %v5758_v44  ;;  %v5699_v43 = vcombine.high %v146_v34, %v150_v35  ;;  %v5696_v44 = vcombine.low %v145_v30, %v149_v31  ;;  %v209_v34 = vld [vmem:[#allocation5 + $0x2d0] sm:$0xff] }
  0x8e   :  { %965 = vmatprep.subr.bf16.mxu0 %v5749_v45  ;;  %1008 = vmatprep.subr.bf16.mxu1 %v5751_v46  ;;  %v129_v45 = vld [vmem:[#allocation5 + $0x50] sm:$0xff] }
  0x8f   :  { %v133_v46 = vld [vmem:[#allocation5 + $0x70] sm:$0xff] }
  0x90   :  { %v5681_v57 = vcombine.high %v129_v45, %v133_v46  ;;  %v213_v35 = vld [vmem:[#allocation5 + $0x2f0] sm:$0xff] }
  0x91   :  { %966 = vmatpush2.bf16.msra.mxu0 %v5748_v51  ;;  %1009 = vmatpush2.bf16.msra.mxu1 %v5750_v52  ;;  %v5691_v51 = vcombine.high %v138_v41, %v142_v42  ;;  %v5688_v52 = vcombine.low %v137_v38, %v141_v39  ;;  %v201_v41 = vld [vmem:[#allocation5 + $0x290] sm:$0xff] }
  0x92   :  { %967 = vmatprep.subr.bf16.mxu0 %v5741_v53  ;;  %1010 = vmatprep.subr.bf16.mxu1 %v5743_v54  ;;  %v121_v53 = vld [vmem:[#allocation5 + $0x10] sm:$0xff] }
  0x93   :  { %v125_v54 = vld [vmem:[#allocation5 + $0x30] sm:$0xff] }
  0x94   :  { %v5673_v1 = vcombine.high %v121_v53, %v125_v54  ;;  %v5672_v5 = vcombine.low %v121_v53, %v125_v54  ;;  %v205_v42 = vld [vmem:[#allocation5 + $0x2b0] sm:$0xff] }
  0x95   :  { %968 = vmatpush2.bf16.msra.mxu0 %v5740_v60  ;;  %1011 = vmatpush2.bf16.msra.mxu1 %v5742_v61  ;;  %v5683_v60 = vcombine.high %v130_v49, %v134_v50  ;;  %v5680_v61 = vcombine.low %v129_v45, %v133_v46  ;;  %v5760_v45 = vcombine.low %v209_v34, %v213_v35  ;;  %v193_v49 = vld [vmem:[#allocation5 + $0x250] sm:$0xff] }
  0x96   :  { %969 = vmatprep.subr.bf16.mxu0 %v5733_v62  ;;  %1012 = vmatprep.subr.bf16.mxu1 %v5735_v63  ;;  %v241_v62 = vld [vmem:[#allocation5 + $0x3d0] sm:$0xff]  ;;  %v5752_v53 = vcombine.low %v201_v41, %v205_v42 }
  0x97   :  { %v245_v63 = vld [vmem:[#allocation5 + $0x3f0] sm:$0xff] }
  0x98   :  { %v5793_v10 = vcombine.high %v241_v62, %v245_v63  ;;  %v5792_v14 = vcombine.low %v241_v62, %v245_v63  ;;  %v197_v50 = vld [vmem:[#allocation5 + $0x270] sm:$0xff] }
  0x99   :  { %970 = vmatpush2.bf16.msra.mxu0 %v5732_v4  ;;  %1013 = vmatpush2.bf16.msra.mxu1 %v5734_v7  ;;  %v5675_v4 = vcombine.high %v122_v58, %v126_v59  ;;  %v237_v7 = vld [vmem:[#allocation5 + $0x3b0] sm:$0xff]  ;;  %v5744_v62 = vcombine.low %v193_v49, %v197_v50 }
  0x9a   :  { %1025 = vmatprep.subr.bf16.mxu0 %v5729_v9  ;;  %1068 = vmatprep.subr.bf16.mxu1 %v5731_v12  ;;  %v5674_v9 = vcombine.low %v122_v58, %v126_v59  ;;  %v238_v12 = vld [vmem:[#allocation5 + $0x3b8] sm:$0xff]  ;;  %v5785_v18 = vcombine.high %v233_v6, %v237_v7  ;;  %v5784_v22 = vcombine.low %v233_v6, %v237_v7  ;;  %v185_v58 = vld [vmem:[#allocation5 + $0x210] sm:$0xff] }
  0x9b   :  { %v189_v59 = vld [vmem:[#allocation5 + $0x230] sm:$0xff] }
  0x9c   :  { %972 = vmatmul.mubr.bf16.vlgmr.msra.gmra.mxu0 %v6794_v8  ;;  %1015 = vmatmul.mubr.bf16.vlgmr.msra.gmra.mxu1 %v6794_v8  ;;  %v5736_v6 = vcombine.low %v185_v58, %v189_v59 }
  0x9d   :  { %1026 = vmatpush1.bf16.msra.mxu0 %v5728_v13  ;;  %1069 = vmatpush1.bf16.msra.mxu1 %v5730_v16  ;;  %v5795_v13 = vcombine.high %v242_v2, %v246_v3  ;;  %v229_v16 = vld [vmem:[#allocation5 + $0x370] sm:$0xff] }
  0x9e   :  { %1027 = vmatprep.subr.bf16.mxu0 %v5721_v17  ;;  %1070 = vmatprep.subr.bf16.mxu1 %v5723_v20  ;;  %v5794_v17 = vcombine.low %v242_v2, %v246_v3  ;;  %v230_v20 = vld [vmem:[#allocation5 + $0x378] sm:$0xff]  ;;  %v5777_v26 = vcombine.high %v225_v15, %v229_v16  ;;  %v1191_v2 = vld [vmem:[#allocation8 + $0x1c0] sm:$0xff] }
  0x9f   :  { %1057 = vmatprep.mubr.bf16.mxu0 %v6790_v56  ;;  %1100 = vmatprep.mubr.bf16.mxu1 %v6790_v56  ;;  %v5697_v56 = vcombine.high %v145_v30, %v149_v31  ;;  %v5776_v30 = vcombine.low %v225_v15, %v229_v16  ;;  %v5778_v31 = vcombine.low %v226_v19, %v230_v20  ;;  %v1195_v3 = vld [vmem:[#allocation8 + $0x1e0] sm:$0xff] }
  0xa0   :  { %v5852_v15 = vcombine.low %v1191_v2, %v1195_v3 }
  0xa1   :  { %1028 = vmatpush1.bf16.msra.mxu0 %v5720_v21  ;;  %1071 = vmatpush1.bf16.msra.mxu1 %v5722_v24  ;;  %v5787_v21 = vcombine.high %v234_v11, %v238_v12  ;;  %v221_v24 = vld [vmem:[#allocation5 + $0x330] sm:$0xff] }
  0xa2   :  { %1029 = vmatprep.subr.bf16.mxu0 %v5713_v25  ;;  %1072 = vmatprep.subr.bf16.mxu1 %v5715_v28  ;;  %v5786_v25 = vcombine.low %v234_v11, %v238_v12  ;;  %v222_v28 = vld [vmem:[#allocation5 + $0x338] sm:$0xff]  ;;  %v5768_v38 = vcombine.low %v217_v23, %v221_v24  ;;  %v1183_v11 = vld [vmem:[#allocation8 + $0x180] sm:$0xff] }
  0xa3   :  { %v5770_v39 = vcombine.low %v218_v27, %v222_v28  ;;  %v1187_v12 = vld [vmem:[#allocation8 + $0x1a0] sm:$0xff] }
  0xa5   :  { %1030 = vmatpush1.bf16.msra.mxu0 %v5712_v29  ;;  %1073 = vmatpush1.bf16.msra.mxu1 %v5714_v32  ;;  %v5779_v29 = vcombine.high %v226_v19, %v230_v20  ;;  %v5769_v32 = vcombine.high %v217_v23, %v221_v24  ;;  %v1175_v19 = vld [vmem:[#allocation8 + $0x140] sm:$0xff]  ;;  %v5844_v23 = vcombine.low %v1183_v11, %v1187_v12 }
  0xa6   :  { %1031 = vmatprep.subr.bf16.mxu0 %v5705_v33  ;;  %1074 = vmatprep.subr.bf16.mxu1 %v5707_v36  ;;  %v5771_v33 = vcombine.high %v218_v27, %v222_v28  ;;  %v210_v36 = vld [vmem:[#allocation5 + $0x2d8] sm:$0xff]  ;;  %v1179_v20 = vld [vmem:[#allocation8 + $0x160] sm:$0xff] }
  0xa7   :  { %v1167_v27 = vld [vmem:[#allocation8 + $0x100] sm:$0xff] }
  0xa8   :  { %v1171_v28 = vld [vmem:[#allocation8 + $0x120] sm:$0xff] }
  0xa9   :  { %1032 = vmatpush1.bf16.msra.mxu0 %v5704_v37  ;;  %1075 = vmatpush1.bf16.msra.mxu1 %v5706_v40  ;;  %v214_v37 = vld [vmem:[#allocation5 + $0x2f8] sm:$0xff]  ;;  %v5761_v40 = vcombine.high %v209_v34, %v213_v35  ;;  %v1159_v34 = vld [vmem:[#allocation8 + $0xc0] sm:$0xff] }
  0xaa   :  { %1033 = vmatprep.subr.bf16.mxu0 %v5697_v56  ;;  %1076 = vmatprep.subr.bf16.mxu1 %v5699_v43  ;;  %v5763_v56 = vcombine.high %v210_v36, %v214_v37  ;;  %v202_v43 = vld [vmem:[#allocation5 + $0x298] sm:$0xff]  ;;  %v5762_v46 = vcombine.low %v210_v36, %v214_v37  ;;  %v1163_v35 = vld [vmem:[#allocation8 + $0xe0] sm:$0xff] }
  0xab   :  { %v1287_v36 = vld [vmem:[#allocation8 + $0x4c0] sm:$0xff] }
  0xac   :  { %v1291_v37 = vld [vmem:[#allocation8 + $0x4e0] sm:$0xff] }
  0xad   :  { %1034 = vmatpush1.bf16.msra.mxu0 %v5696_v44  ;;  %1077 = vmatpush1.bf16.msra.mxu1 %v5698_v47  ;;  %v206_v44 = vld [vmem:[#allocation5 + $0x2b8] sm:$0xff]  ;;  %v5753_v47 = vcombine.high %v201_v41, %v205_v42  ;;  %v1155_v41 = vld [vmem:[#allocation8 + $0xa0] sm:$0xff]  ;;  %v5949_v42 = vcombine.high %v1287_v36, %v1291_v37 }
  0xae   :  { %1035 = vmatprep.subr.bf16.mxu0 %v5689_v48  ;;  %1078 = vmatprep.subr.bf16.mxu1 %v5691_v51  ;;  %v5755_v48 = vcombine.high %v202_v43, %v206_v44  ;;  %v194_v51 = vld [vmem:[#allocation5 + $0x258] sm:$0xff]  ;;  %v5754_v54 = vcombine.low %v202_v43, %v206_v44  ;;  %v6802_v43 = vld [vmem:[#allocation8 + $0x9c0] sm:$0xff] }
  0xaf   :  { %v6804_v44 = vld [vmem:[#allocation8 + $0x9e0] sm:$0xff] }
  0xb1   :  { %1036 = vmatpush1.bf16.msra.mxu0 %v5688_v52  ;;  %1079 = vmatpush1.bf16.msra.mxu1 %v5690_v55  ;;  %v198_v52 = vld [vmem:[#allocation5 + $0x278] sm:$0xff]  ;;  %v5745_v55 = vcombine.high %v193_v49, %v197_v50  ;;  %v5820_v49 = vcombine.low %v1159_v34, %v1163_v35  ;;  %v6108_v50 = vcombine.low %v6802_v43, %v6804_v44 }
  0xb2   :  { %1037 = vmatprep.subr.bf16.mxu0 %v5681_v57  ;;  %1080 = vmatprep.subr.bf16.mxu1 %v5683_v60  ;;  %v5747_v57 = vcombine.high %v194_v51, %v198_v52  ;;  %v186_v60 = vld [vmem:[#allocation5 + $0x218] sm:$0xff]  ;;  %v5746_v63 = vcombine.low %v194_v51, %v198_v52  ;;  %v5948_v52 = vcombine.low %v1287_v36, %v1291_v37 }
  0xb5   :  { %1038 = vmatpush1.bf16.msra.mxu0 %v5680_v61  ;;  %1081 = vmatpush1.bf16.msra.mxu1 %v5682_v0  ;;  %v190_v61 = vld [vmem:[#allocation5 + $0x238] sm:$0xff]  ;;  %v5737_v0 = vcombine.high %v185_v58, %v189_v59  ;;  %v1271_v58 = vld [vmem:[#allocation8 + $0x440] sm:$0xff] }
  0xb6   :  { %1039 = vmatprep.subr.bf16.mxu0 %v5673_v1  ;;  %1082 = vmatprep.subr.bf16.mxu1 %v5675_v4  ;;  %v5739_v1 = vcombine.high %v186_v60, %v190_v61  ;;  %v1319_v4 = vld [vmem:[#allocation8 + $0x5c0] sm:$0xff]  ;;  %v5738_v7 = vcombine.low %v186_v60, %v190_v61 }
  0xb7   :  { %v1275_v59 = vld [vmem:[#allocation8 + $0x460] sm:$0xff] }
  0xb9   :  { %1040 = vmatpush1.bf16.msra.mxu0 %v5672_v5  ;;  %1083 = vmatpush1.bf16.msra.mxu1 %v5674_v9  ;;  %v1323_v5 = vld [vmem:[#allocation8 + $0x5e0] sm:$0xff]  ;;  %v5853_v9 = vcombine.high %v1191_v2, %v1195_v3 }
  0xba   :  { %1041 = vmatprep.subr.bf16.mxu0 %v5793_v10  ;;  %1084 = vmatprep.subr.bf16.mxu1 %v5795_v13  ;;  %v5981_v10 = vcombine.high %v1319_v4, %v1323_v5  ;;  %v1311_v13 = vld [vmem:[#allocation8 + $0x580] sm:$0xff]  ;;  %v5980_v16 = vcombine.low %v1319_v4, %v1323_v5  ;;  %v5932_v5 = vcombine.low %v1271_v58, %v1275_v59 }
  0xbb   :  { %v1263_v2 = vld [vmem:[#allocation8 + $0x400] sm:$0xff] }
  0xbc   :  { %v1267_v3 = vld [vmem:[#allocation8 + $0x420] sm:$0xff] }
  0xbd   :  { %1042 = vmatpush2.bf16.msra.mxu0 %v5792_v14  ;;  %1085 = vmatpush2.bf16.msra.mxu1 %v5794_v17  ;;  %v1315_v14 = vld [vmem:[#allocation8 + $0x5a0] sm:$0xff]  ;;  %v5845_v17 = vcombine.high %v1183_v11, %v1187_v12 }
  0xbe   :  { %1043 = vmatprep.subr.bf16.mxu0 %v5785_v18  ;;  %1086 = vmatprep.subr.bf16.mxu1 %v5787_v21  ;;  %v5973_v18 = vcombine.high %v1311_v13, %v1315_v14  ;;  %v1303_v21 = vld [vmem:[#allocation8 + $0x540] sm:$0xff]  ;;  %v5972_v24 = vcombine.low %v1311_v13, %v1315_v14  ;;  %v5924_v14 = vcombine.low %v1263_v2, %v1267_v3 }
  0xbf   :  { %v1383_v11 = vld [vmem:[#allocation8 + $0x7c0] sm:$0xff] }
  0xc0   :  { %v1387_v12 = vld [vmem:[#allocation8 + $0x7e0] sm:$0xff] }
  0xc1   :  { %1044 = vmatpush2.bf16.msra.mxu0 %v5784_v22  ;;  %1087 = vmatpush2.bf16.msra.mxu1 %v5786_v25  ;;  %v1307_v22 = vld [vmem:[#allocation8 + $0x560] sm:$0xff]  ;;  %v5837_v25 = vcombine.high %v1175_v19, %v1179_v20 }
  0xc2   :  { %1045 = vmatprep.subr.bf16.mxu0 %v5777_v26  ;;  %1088 = vmatprep.subr.bf16.mxu1 %v5779_v29  ;;  %v5965_v26 = vcombine.high %v1303_v21, %v1307_v22  ;;  %v1295_v29 = vld [vmem:[#allocation8 + $0x500] sm:$0xff] }
  0xc5   :  { %1046 = vmatpush2.bf16.msra.mxu0 %v5776_v30  ;;  %1089 = vmatpush2.bf16.msra.mxu1 %v5778_v31  ;;  %v1299_v30 = vld [vmem:[#allocation8 + $0x520] sm:$0xff]  ;;  %v5836_v31 = vcombine.low %v1175_v19, %v1179_v20 }
  0xc6   :  { %1047 = vmatprep.subr.bf16.mxu0 %v5769_v32  ;;  %1090 = vmatprep.subr.bf16.mxu1 %v5771_v33  ;;  %v5964_v32 = vcombine.low %v1303_v21, %v1307_v22  ;;  %v5829_v33 = vcombine.high %v1167_v27, %v1171_v28  ;;  %v1375_v19 = vld [vmem:[#allocation8 + $0x780] sm:$0xff]  ;;  %v6044_v22 = vcombine.low %v1383_v11, %v1387_v12 }
  0xc7   :  { %v1379_v20 = vld [vmem:[#allocation8 + $0x7a0] sm:$0xff] }
  0xc9   :  { %1048 = vmatpush2.bf16.msra.mxu0 %v5768_v38  ;;  %1091 = vmatpush2.bf16.msra.mxu1 %v5770_v39  ;;  %v5828_v38 = vcombine.low %v1167_v27, %v1171_v28  ;;  %v5956_v39 = vcombine.low %v1295_v29, %v1299_v30  ;;  %v1367_v27 = vld [vmem:[#allocation8 + $0x740] sm:$0xff] }
  0xca   :  { %1049 = vmatprep.subr.bf16.mxu0 %v5761_v40  ;;  %1092 = vmatprep.subr.bf16.mxu1 %v5763_v56  ;;  %v5821_v40 = vcombine.high %v1159_v34, %v1163_v35  ;;  %v1151_v56 = vld [vmem:[#allocation8 + $0x80] sm:$0xff] }
  0xcb   :  { %v5812_v60 = vcombine.low %v1151_v56, %v1155_v41  ;;  %v1371_v28 = vld [vmem:[#allocation8 + $0x760] sm:$0xff] }
  0xcc   :  { %v1359_v34 = vld [vmem:[#allocation8 + $0x700] sm:$0xff]  ;;  %v6028_v37 = vcombine.low %v1367_v27, %v1371_v28 }
  0xcd   :  { %1050 = vmatpush2.bf16.msra.mxu0 %v5760_v45  ;;  %1093 = vmatpush2.bf16.msra.mxu1 %v5762_v46  ;;  %v6806_v45 = vld [vmem:[#allocation8 + $0xdc0] sm:$0xff] }
  0xce   :  { %1051 = vmatprep.subr.bf16.mxu0 %v5753_v47  ;;  %1094 = vmatprep.subr.bf16.mxu1 %v5755_v48  ;;  %v1279_v46 = vld [vmem:[#allocation8 + $0x480] sm:$0xff] }
  0xcf   :  { %v1283_v47 = vld [vmem:[#allocation8 + $0x4a0] sm:$0xff] }
  0xd0   :  { %v6808_v48 = vld [vmem:[#allocation8 + $0xde0] sm:$0xff]  ;;  %v5940_v61 = vcombine.low %v1279_v46, %v1283_v47 }
  0xd1   :  { %1052 = vmatpush2.bf16.msra.mxu0 %v5752_v53  ;;  %1095 = vmatpush2.bf16.msra.mxu1 %v5754_v54  ;;  %v6236_v51 = vcombine.low %v6806_v45, %v6808_v48  ;;  %v5813_v53 = vcombine.high %v1151_v56, %v1155_v41  ;;  %v5941_v54 = vcombine.high %v1279_v46, %v1283_v47  ;;  %v1363_v35 = vld [vmem:[#allocation8 + $0x720] sm:$0xff] }
  0xd2   :  { %1053 = vmatprep.subr.bf16.mxu0 %v5745_v55  ;;  %1096 = vmatprep.subr.bf16.mxu1 %v5747_v57  ;;  %v1143_v55 = vld [vmem:[#allocation8 + $0x40] sm:$0xff]  ;;  %v6020_v47 = vcombine.low %v1359_v34, %v1363_v35 }
  0xd3   :  { %v1147_v57 = vld [vmem:[#allocation8 + $0x60] sm:$0xff] }
  0xd4   :  { %v5804_v4 = vcombine.low %v1143_v55, %v1147_v57  ;;  %v1227_v56 = vld [vmem:[#allocation8 + $0x2e0] sm:$0xff] }
  0xd5   :  { %1054 = vmatpush2.bf16.msra.mxu0 %v5744_v62  ;;  %1097 = vmatpush2.bf16.msra.mxu1 %v5746_v63  ;;  %v5805_v62 = vcombine.high %v1143_v55, %v1147_v57  ;;  %v5933_v63 = vcombine.high %v1271_v58, %v1275_v59  ;;  %v1351_v41 = vld [vmem:[#allocation8 + $0x6c0] sm:$0xff] }
  0xd6   :  { %1055 = vmatprep.subr.bf16.mxu0 %v5737_v0  ;;  %1098 = vmatprep.subr.bf16.mxu1 %v5739_v1  ;;  %v1135_v0 = vld [vmem:[#allocation8] sm:$0xff] }
  0xd7   :  { %v1139_v1 = vld [vmem:[#allocation8 + $0x20] sm:$0xff] }
  0xd8   :  { %v5796_v13 = vcombine.low %v1135_v0, %v1139_v1  ;;  %v1343_v55 = vld [vmem:[#allocation8 + $0x680] sm:$0xff] }
  0xd9   :  { %1056 = vmatpush2.bf16.msra.mxu0 %v5736_v6  ;;  %1099 = vmatpush2.bf16.msra.mxu1 %v5738_v7  ;;  %v5797_v6 = vcombine.high %v1135_v0, %v1139_v1  ;;  %v5925_v7 = vcombine.high %v1263_v2, %v1267_v3  ;;  %v1347_v57 = vld [vmem:[#allocation8 + $0x6a0] sm:$0xff] }
  0xda   :  { %4249 = vmatprep.subr.bf16.mxu0 %v5853_v9  ;;  %4292 = vmatprep.subr.bf16.mxu1 %v5981_v10  ;;  %v1255_v9 = vld [vmem:[#allocation8 + $0x3c0] sm:$0xff]  ;;  %v6004_v3 = vcombine.low %v1343_v55, %v1347_v57 }
  0xdb   :  { %v1259_v10 = vld [vmem:[#allocation8 + $0x3e0] sm:$0xff] }
  0xdc   :  { %1058 = vmatmul.mubr.bf16.vlgmr.msra.gmra.mxu0 %v6794_v8  ;;  %1101 = vmatmul.mubr.bf16.vlgmr.msra.gmra.mxu1 %v6794_v8  ;;  %v5957_v8 = vcombine.high %v1295_v29, %v1299_v30  ;;  %v5916_v21 = vcombine.low %v1255_v9, %v1259_v10  ;;  %v6036_v30 = vcombine.low %v1375_v19, %v1379_v20  ;;  %v1335_v0 = vld [vmem:[#allocation8 + $0x640] sm:$0xff] }
  0xdd   :  { %4250 = vmatpush1.bf16.msra.mxu0 %v5852_v15  ;;  %4293 = vmatpush1.bf16.msra.mxu1 %v5980_v16  ;;  %v5917_v15 = vcombine.high %v1255_v9, %v1259_v10  ;;  %v6045_v16 = vcombine.high %v1383_v11, %v1387_v12  ;;  %v1339_v1 = vld [vmem:[#allocation8 + $0x660] sm:$0xff] }
  0xde   :  { %4251 = vmatprep.subr.bf16.mxu0 %v5845_v17  ;;  %4294 = vmatprep.subr.bf16.mxu1 %v5973_v18  ;;  %v1247_v17 = vld [vmem:[#allocation8 + $0x380] sm:$0xff]  ;;  %v5996_v12 = vcombine.low %v1335_v0, %v1339_v1 }
  0xdf   :  { %v1251_v18 = vld [vmem:[#allocation8 + $0x3a0] sm:$0xff] }
  0xe0   :  { %v5908_v29 = vcombine.low %v1247_v17, %v1251_v18  ;;  %v1327_v9 = vld [vmem:[#allocation8 + $0x600] sm:$0xff] }
  0xe1   :  { %4252 = vmatpush1.bf16.msra.mxu0 %v5844_v23  ;;  %4295 = vmatpush1.bf16.msra.mxu1 %v5972_v24  ;;  %v5909_v23 = vcombine.high %v1247_v17, %v1251_v18  ;;  %v6037_v24 = vcombine.high %v1375_v19, %v1379_v20  ;;  %v1331_v10 = vld [vmem:[#allocation8 + $0x620] sm:$0xff]  ;;  %v6109_v17 = vcombine.high %v6802_v43, %v6804_v44  ;;  %v249_v19 = vlaneseq }
  0xe2   :  { %4253 = vmatprep.subr.bf16.mxu0 %v5837_v25  ;;  %4296 = vmatprep.subr.bf16.mxu1 %v5965_v26  ;;  %v1239_v25 = vld [vmem:[#allocation8 + $0x340] sm:$0xff]  ;;  %v6237_v18 = vcombine.high %v6806_v45, %v6808_v48 }
  0xe3   :  { %v1243_v26 = vld [vmem:[#allocation8 + $0x360] sm:$0xff]  ;;  %v6818_v20 = vshrl.u32 %v249_v19, 7 }
  0xe4   :  { %v5900_v36 = vcombine.low %v1239_v25, %v1243_v26  ;;  %v1415_v19 = vld [vmem:[#allocation8 + $0x8c0] sm:$0xff] }
  0xe5   :  { %4254 = vmatpush1.bf16.msra.mxu0 %v5836_v31  ;;  %4297 = vmatpush1.bf16.msra.mxu1 %v5964_v32  ;;  %v5901_v31 = vcombine.high %v1239_v25, %v1243_v26  ;;  %v6029_v32 = vcombine.high %v1367_v27, %v1371_v28  ;;  %v259_v25 = vsub.s32 2, %v6818_v20  ;;  %v1419_v45 = vld [vmem:[#allocation8 + $0x8e0] sm:$0xff] }
  0xe6   :  { %4255 = vmatprep.subr.bf16.mxu0 %v5829_v33  ;;  %4298 = vmatprep.subr.bf16.mxu1 %v5957_v8  ;;  %v1231_v33 = vld [vmem:[#allocation8 + $0x300] sm:$0xff] }
  0xe7   :  { %v1235_v8 = vld [vmem:[#allocation8 + $0x320] sm:$0xff] }
  0xe8   :  { %v5892_v46 = vcombine.low %v1231_v33, %v1235_v8  ;;  %v1543_v48 = vld [vmem:[#allocation8 + $0xcc0] sm:$0xff] }
  0xe9   :  { %4256 = vmatpush1.bf16.msra.mxu0 %v5828_v38  ;;  %4299 = vmatpush1.bf16.msra.mxu1 %v5956_v39  ;;  %v5893_v38 = vcombine.high %v1231_v33, %v1235_v8  ;;  %v6021_v39 = vcombine.high %v1359_v34, %v1363_v35 }
  0xea   :  { %4257 = vmatprep.subr.bf16.mxu0 %v5821_v40  ;;  %4300 = vmatprep.subr.bf16.mxu1 %v5949_v42  ;;  %v1223_v40 = vld [vmem:[#allocation8 + $0x2c0] sm:$0xff] }
  0xeb   :  { %v1355_v42 = vld [vmem:[#allocation8 + $0x6e0] sm:$0xff]  ;;  %v5884_v58 = vcombine.low %v1223_v40, %v1227_v56 }
  0xec   :  { %v6012_v59 = vcombine.low %v1351_v41, %v1355_v42 }
  0xed   :  { %4258 = vmatpush1.bf16.msra.mxu0 %v5820_v49  ;;  %4301 = vmatpush1.bf16.msra.mxu1 %v5948_v52  ;;  %v5885_v49 = vcombine.high %v1223_v40, %v1227_v56  ;;  %v6013_v52 = vcombine.high %v1351_v41, %v1355_v42 }
  0xee   :  { %4259 = vmatprep.subr.bf16.mxu0 %v5813_v53  ;;  %4302 = vmatprep.subr.bf16.mxu1 %v5941_v54  ;;  %v1215_v53 = vld [vmem:[#allocation8 + $0x280] sm:$0xff] }
  0xef   :  { %v1219_v54 = vld [vmem:[#allocation8 + $0x2a0] sm:$0xff] }
  0xf0   :  { %v5876_v2 = vcombine.low %v1215_v53, %v1219_v54 }
  0xf1   :  { %4260 = vmatpush1.bf16.msra.mxu0 %v5812_v60  ;;  %4303 = vmatpush1.bf16.msra.mxu1 %v5940_v61  ;;  %v5877_v60 = vcombine.high %v1215_v53, %v1219_v54  ;;  %v6005_v61 = vcombine.high %v1343_v55, %v1347_v57  ;;  %v1439_v54 = vld [vmem:[#allocation8 + $0x980] sm:$0xff] }
  0xf2   :  { %4261 = vmatprep.subr.bf16.mxu0 %v5805_v62  ;;  %4304 = vmatprep.subr.bf16.mxu1 %v5933_v63  ;;  %v1207_v62 = vld [vmem:[#allocation8 + $0x240] sm:$0xff] }
  0xf3   :  { %v1211_v63 = vld [vmem:[#allocation8 + $0x260] sm:$0xff] }
  0xf4   :  { %v5868_v11 = vcombine.low %v1207_v62, %v1211_v63  ;;  %v1443_v55 = vld [vmem:[#allocation8 + $0x9a0] sm:$0xff] }
  0xf5   :  { %4262 = vmatpush1.bf16.msra.mxu0 %v5804_v4  ;;  %4305 = vmatpush1.bf16.msra.mxu1 %v5932_v5  ;;  %v5869_v4 = vcombine.high %v1207_v62, %v1211_v63  ;;  %v5997_v5 = vcombine.high %v1335_v0, %v1339_v1 }
  0xf6   :  { %4263 = vmatprep.subr.bf16.mxu0 %v5797_v6  ;;  %4306 = vmatprep.subr.bf16.mxu1 %v5925_v7  ;;  %v1199_v6 = vld [vmem:[#allocation8 + $0x200] sm:$0xff] }
  0xf7   :  { %v1203_v7 = vld [vmem:[#allocation8 + $0x220] sm:$0xff] }
  0xf9   :  { %4264 = vmatpush1.bf16.msra.mxu0 %v5796_v13  ;;  %4307 = vmatpush1.bf16.msra.mxu1 %v5924_v14  ;;  %v5861_v13 = vcombine.high %v1199_v6, %v1203_v7  ;;  %v5989_v14 = vcombine.high %v1327_v9, %v1331_v10 }
  0xfa   :  { %4265 = vmatprep.subr.bf16.mxu0 %v5917_v15  ;;  %4308 = vmatprep.subr.bf16.mxu1 %v6045_v16  ;;  %v5860_v15 = vcombine.low %v1199_v6, %v1203_v7  ;;  %v5988_v16 = vcombine.low %v1327_v9, %v1331_v10  ;;  %v1435_v6 = vld [vmem:[#allocation8 + $0x960] sm:$0xff]  ;;  %v6100_v10 = vcombine.low %v1439_v54, %v1443_v55 }
  0xfb   :  { %v1559_v7 = vld [vmem:[#allocation8 + $0xd40] sm:$0xff] }
  0xfc   :  { %v1563_v9 = vld [vmem:[#allocation8 + $0xd60] sm:$0xff] }
  0xfd   :  { %4266 = vmatpush2.bf16.msra.mxu0 %v5916_v21  ;;  %4309 = vmatpush2.bf16.msra.mxu1 %v6044_v22  ;;  %v255_v21 = vsub.s32 1, %v6818_v20  ;;  %v251_v22 = vsub.s32 0, %v6818_v20  ;;  %v6220_v43 = vcombine.low %v1559_v7, %v1563_v9 }
  0xfe   :  { %4267 = vmatprep.subr.bf16.mxu0 %v5909_v23  ;;  %4310 = vmatprep.subr.bf16.mxu1 %v6037_v24  ;;  %v263_v23 = vsub.s32 3, %v6818_v20  ;;  %v6823_v24 = vld [vmem:[#allocation7] sm:$0xff] }
  0xff   :  { %v256_v28 = vrot.slane %v6823_v24, %v255_v21 }
 0x101   :  { %4268 = vmatpush2.bf16.msra.mxu0 %v5908_v29  ;;  %4311 = vmatpush2.bf16.msra.mxu1 %v6036_v30  ;;  %v252_v29 = vrot.slane %v6823_v24, %v251_v22 }
 0x102   :  { %4269 = vmatprep.subr.bf16.mxu0 %v5901_v31  ;;  %4312 = vmatprep.subr.bf16.mxu1 %v6029_v32  ;;  %v264_v31 = vrot.slane %v6823_v24, %v263_v23  ;;  %v260_v32 = vrot.slane %v6823_v24, %v259_v25 }
 0x105   :  { %4270 = vmatpush2.bf16.msra.mxu0 %v5900_v36  ;;  %4313 = vmatpush2.bf16.msra.mxu1 %v6028_v37 }
 0x106   :  { %4271 = vmatprep.subr.bf16.mxu0 %v5893_v38  ;;  %4314 = vmatprep.subr.bf16.mxu1 %v6021_v39 }
 0x109   :  { %4272 = vmatpush2.bf16.msra.mxu0 %v5892_v46  ;;  %4315 = vmatpush2.bf16.msra.mxu1 %v6020_v47 }
 0x10a   :  { %4273 = vmatprep.subr.bf16.mxu0 %v5885_v49  ;;  %4316 = vmatprep.subr.bf16.mxu1 %v6013_v52 }
 0x10d   :  { %4274 = vmatpush2.bf16.msra.mxu0 %v5884_v58  ;;  %4317 = vmatpush2.bf16.msra.mxu1 %v6012_v59 }
 0x10e   :  { %4275 = vmatprep.subr.bf16.mxu0 %v5877_v60  ;;  %4318 = vmatprep.subr.bf16.mxu1 %v6005_v61  ;;  %v1567_v60 = vld [vmem:[#allocation8 + $0xd80] sm:$0xff] }
 0x10f   :  { %v1571_v61 = vld [vmem:[#allocation8 + $0xda0] sm:$0xff] }
 0x111   :  { %4276 = vmatpush2.bf16.msra.mxu0 %v5876_v2  ;;  %4319 = vmatpush2.bf16.msra.mxu1 %v6004_v3  ;;  %v6101_v2 = vcombine.high %v1439_v54, %v1443_v55 }
 0x112   :  { %4277 = vmatprep.subr.bf16.mxu0 %v5869_v4  ;;  %4320 = vmatprep.subr.bf16.mxu1 %v5997_v5  ;;  %v6229_v4 = vcombine.high %v1567_v60, %v1571_v61  ;;  %v1431_v5 = vld [vmem:[#allocation8 + $0x940] sm:$0xff] }
 0x115   :  { %4278 = vmatpush2.bf16.msra.mxu0 %v5868_v11  ;;  %4321 = vmatpush2.bf16.msra.mxu1 %v5996_v12  ;;  %v6228_v11 = vcombine.low %v1567_v60, %v1571_v61  ;;  %v6093_v12 = vcombine.high %v1431_v5, %v1435_v6  ;;  %v1515_v60 = vld [vmem:[#allocation8 + $0xbe0] sm:$0xff] }
 0x116   :  { %4279 = vmatprep.subr.bf16.mxu0 %v5861_v13  ;;  %4322 = vmatprep.subr.bf16.mxu1 %v5989_v14  ;;  %v6221_v13 = vcombine.high %v1559_v7, %v1563_v9  ;;  %v1423_v14 = vld [vmem:[#allocation8 + $0x900] sm:$0xff] }
 0x117   :  { %v1639_v61 = vld [vmem:[#allocation8 + $0xfc0] sm:$0xff] }
 0x118   :  { %v1503_v7 = vld [vmem:[#allocation8 + $0xb80] sm:$0xff] }
 0x119   :  { %4280 = vmatpush2.bf16.msra.mxu0 %v5860_v15  ;;  %4323 = vmatpush2.bf16.msra.mxu1 %v5988_v16  ;;  %v1427_v15 = vld [vmem:[#allocation8 + $0x920] sm:$0xff] }
 0x11a   :  { %4335 = vmatprep.subr.bf16.mxu0 %v6109_v17  ;;  %4378 = vmatprep.subr.bf16.mxu1 %v6237_v18  ;;  %v1551_v16 = vld [vmem:[#allocation8 + $0xd00] sm:$0xff]  ;;  %v6092_v18 = vcombine.low %v1431_v5, %v1435_v6  ;;  %v6085_v44 = vcombine.high %v1423_v14, %v1427_v15 }
 0x11b   :  { %v1555_v17 = vld [vmem:[#allocation8 + $0xd20] sm:$0xff] }
 0x11c   :  { %v1507_v9 = vld [vmem:[#allocation8 + $0xba0] sm:$0xff] }
 0x15c   :  { %v973_v26 = vpop.f32.mrf.mxu0  ;;  %v1016_v27 = vpop.f32.mrf.mxu1 }
 0x15d   :  { %v974_v37 = vadd.f32 %v973_v26, %v252_v29  ;;  %v1017_v56 = vadd.f32 %v1016_v27, %v260_v32  ;;  %v6084_v26 = vcombine.low %v1423_v14, %v1427_v15  ;;  %v6212_v27 = vcombine.low %v1551_v16, %v1555_v17 }
 0x15e   :  { %v975_v30 = vpop.f32.mrf.mxu0  ;;  %v1018_v33 = vpop.f32.mrf.mxu1  ;;  %v6165_v14 = vcombine.high %v1503_v7, %v1507_v9 }
 0x15f   :  { %v976_v34 = vadd.f32 %v975_v30, %v256_v28  ;;  %v1019_v38 = vadd.f32 %v1018_v33, %v264_v31  ;;  %v1111_v57 = vmax.f32 %v974_v37, 0.0  ;;  %v1113_v62 = vmax.f32 %v1017_v56, 0.0  ;;  %v1407_v30 = vld [vmem:[#allocation8 + $0x880] sm:$0xff] }
 0x160   :  { %v977_v8 = vpop.f32.mrf.mxu0  ;;  %v1020_v36 = vpop.f32.mrf.mxu1  ;;  %v1539_v33 = vld [vmem:[#allocation8 + $0xca0] sm:$0xff] }
 0x161   :  { %v978_v35 = vadd.f32 %v977_v8, %v252_v29  ;;  %v1021_v39 = vadd.f32 %v1020_v36, %v260_v32  ;;  %v1112_v49 = vmax.f32 %v976_v34, 0.0  ;;  %v1114_v58 = vmax.f32 %v1019_v38, 0.0  ;;  %v1535_v32 = vld [vmem:[#allocation8 + $0xc80] sm:$0xff] }
 0x162   :  { %v979_v40 = vpop.f32.mrf.mxu0  ;;  %v1022_v42 = vpop.f32.mrf.mxu1  ;;  %v6076_v8 = vcombine.low %v1415_v19, %v1419_v45  ;;  %v6197_v36 = vcombine.high %v1535_v32, %v1539_v33  ;;  %v1399_v37 = vld [vmem:[#allocation8 + $0x840] sm:$0xff] }
 0x163   :  { %v980_v41 = vadd.f32 %v979_v40, %v256_v28  ;;  %v1119_v46 = vmax.f32 %v978_v35, 0.0  ;;  %v1023_v47 = vadd.f32 %v1022_v42, %v264_v31  ;;  %v1121_v52 = vmax.f32 %v1021_v39, 0.0  ;;  %v1411_v31 = vld [vmem:[#allocation8 + $0x8a0] sm:$0xff] }
 0x164   :  { %v6077_v28 = vcombine.high %v1415_v19, %v1419_v45  ;;  %v6069_v35 = vcombine.high %v1407_v30, %v1411_v31  ;;  %v1403_v38 = vld [vmem:[#allocation8 + $0x860] sm:$0xff]  ;;  %v6068_v56 = vcombine.low %v1407_v30, %v1411_v31 }
 0x165   :  { %v1120_v53 = vmax.f32 %v980_v41, 0.0  ;;  %v1122_v59 = vmax.f32 %v1023_v47, 0.0  ;;  %v6840_v0 = vpack.c.bf16 %v1119_v46, %v1111_v57  ;;  %v6844_v3 = vpack.c.bf16 %v1121_v52, %v1113_v62  ;;  %v1527_v39 = vld [vmem:[#allocation8 + $0xc40] sm:$0xff] }
 0x166   :  { %v1531_v40 = vld [vmem:[#allocation8 + $0xc60] sm:$0xff]  ;;  %v6196_v41 = vcombine.low %v1535_v32, %v1539_v33  ;;  %v6061_v42 = vcombine.high %v1399_v37, %v1403_v38  ;;  %v6060_v54 = vcombine.low %v1399_v37, %v1403_v38 }
 0x167   :  { %v6838_v63 = vpack.c.bf16 %v1120_v53, %v1112_v49  ;;  %v6842_v1 = vpack.c.bf16 %v1122_v59, %v1114_v58  ;;  %v6189_v46 = vcombine.high %v1527_v39, %v1531_v40  ;;  %v1391_v47 = vld [vmem:[#allocation8 + $0x800] sm:$0xff]  ;;  %v6188_v55 = vcombine.low %v1527_v39, %v1531_v40 }
 0x168   :  { %v1395_v49 = vld [vmem:[#allocation8 + $0x820] sm:$0xff] }
 0x169   :  { %4281 = vmatprep.mubr.bf16.mxu0 %v6838_v63  ;;  %4324 = vmatprep.mubr.bf16.mxu1 %v6842_v1  ;;  %v1519_v52 = vld [vmem:[#allocation8 + $0xc00] sm:$0xff]  ;;  %v6053_v57 = vcombine.high %v1391_v47, %v1395_v49 }
 0x16a   :  { %4282 = vmatmul.mubr.bf16.vlgmr.msra.gmra.mxu0 %v6840_v0  ;;  %4325 = vmatmul.mubr.bf16.vlgmr.msra.gmra.mxu1 %v6844_v3  ;;  %v1523_v53 = vld [vmem:[#allocation8 + $0xc20] sm:$0xff] }
 0x16b   :  { %4336 = vmatpush1.bf16.msra.mxu0 %v6108_v50  ;;  %4379 = vmatpush1.bf16.msra.mxu1 %v6236_v51  ;;  %v6213_v50 = vcombine.high %v1551_v16, %v1555_v17  ;;  %v1547_v51 = vld [vmem:[#allocation8 + $0xce0] sm:$0xff]  ;;  %v6181_v58 = vcombine.high %v1519_v52, %v1523_v53 }
 0x16c   :  { %4337 = vmatprep.subr.bf16.mxu0 %v6101_v2  ;;  %4380 = vmatprep.subr.bf16.mxu1 %v6229_v4  ;;  %v6205_v29 = vcombine.high %v1543_v48, %v1547_v51  ;;  %v6204_v34 = vcombine.low %v1543_v48, %v1547_v51  ;;  %v1511_v59 = vld [vmem:[#allocation8 + $0xbc0] sm:$0xff]  ;;  %v6052_v2 = vcombine.low %v1391_v47, %v1395_v49 }
 0x16d   :  { %v1643_v62 = vld [vmem:[#allocation8 + $0xfe0] sm:$0xff]  ;;  %v6180_v4 = vcombine.low %v1519_v52, %v1523_v53  ;;  %v6173_v5 = vcombine.high %v1511_v59, %v1515_v60  ;;  %v271_v52 = vsub.s32 5, %v6818_v20 }
 0x16e   :  { %v6301_v6 = vcombine.high %v1639_v61, %v1643_v62  ;;  %v1495_v16 = vld [vmem:[#allocation8 + $0xb40] sm:$0xff] }
 0x16f   :  { %4338 = vmatpush1.bf16.msra.mxu0 %v6100_v10  ;;  %4381 = vmatpush1.bf16.msra.mxu1 %v6228_v11  ;;  %v1631_v10 = vld [vmem:[#allocation8 + $0xf80] sm:$0xff] }
 0x170   :  { %4339 = vmatprep.subr.bf16.mxu0 %v6093_v12  ;;  %4382 = vmatprep.subr.bf16.mxu1 %v6221_v13  ;;  %v1635_v11 = vld [vmem:[#allocation8 + $0xfa0] sm:$0xff]  ;;  %v6172_v12 = vcombine.low %v1511_v59, %v1515_v60  ;;  %v6300_v13 = vcombine.low %v1639_v61, %v1643_v62  ;;  %v7026_v60 = vsub.s32 6, %v6818_v20 }
 0x171   :  { %v6293_v15 = vcombine.high %v1631_v10, %v1635_v11  ;;  %v1499_v17 = vld [vmem:[#allocation8 + $0xb60] sm:$0xff] }
 0x172   :  { %v6157_v19 = vcombine.high %v1495_v16, %v1499_v17  ;;  %v1487_v48 = vld [vmem:[#allocation8 + $0xb00] sm:$0xff] }
 0x173   :  { %4340 = vmatpush1.bf16.msra.mxu0 %v6092_v18  ;;  %4383 = vmatpush1.bf16.msra.mxu1 %v6220_v43  ;;  %v1623_v18 = vld [vmem:[#allocation8 + $0xf40] sm:$0xff] }
 0x174   :  { %4341 = vmatprep.subr.bf16.mxu0 %v6085_v44  ;;  %4384 = vmatprep.subr.bf16.mxu1 %v6213_v50  ;;  %v1627_v43 = vld [vmem:[#allocation8 + $0xf60] sm:$0xff]  ;;  %v6164_v44 = vcombine.low %v1503_v7, %v1507_v9  ;;  %v6292_v50 = vcombine.low %v1631_v10, %v1635_v11 }
 0x175   :  { %v6285_v45 = vcombine.high %v1623_v18, %v1627_v43  ;;  %v1491_v51 = vld [vmem:[#allocation8 + $0xb20] sm:$0xff] }
 0x176   :  { %v6149_v30 = vcombine.high %v1487_v48, %v1491_v51  ;;  %v1479_v32 = vld [vmem:[#allocation8 + $0xac0] sm:$0xff] }
 0x177   :  { %4342 = vmatpush1.bf16.msra.mxu0 %v6084_v26  ;;  %4385 = vmatpush1.bf16.msra.mxu1 %v6212_v27  ;;  %v1615_v26 = vld [vmem:[#allocation8 + $0xf00] sm:$0xff] }
 0x178   :  { %4343 = vmatprep.subr.bf16.mxu0 %v6077_v28  ;;  %4386 = vmatprep.subr.bf16.mxu1 %v6205_v29  ;;  %v1619_v27 = vld [vmem:[#allocation8 + $0xf20] sm:$0xff]  ;;  %v6156_v28 = vcombine.low %v1495_v16, %v1499_v17  ;;  %v6284_v29 = vcombine.low %v1623_v18, %v1627_v43  ;;  %v276_v16 = vrot.slane %v6823_v24, %v7026_v60 }
 0x179   :  { %v6277_v31 = vcombine.high %v1615_v26, %v1619_v27  ;;  %v1483_v33 = vld [vmem:[#allocation8 + $0xae0] sm:$0xff] }
 0x17a   :  { %v6141_v37 = vcombine.high %v1479_v32, %v1483_v33  ;;  %v1471_v39 = vld [vmem:[#allocation8 + $0xa80] sm:$0xff] }
 0x17b   :  { %4344 = vmatpush1.bf16.msra.mxu0 %v6076_v8  ;;  %4387 = vmatpush1.bf16.msra.mxu1 %v6204_v34  ;;  %v1607_v8 = vld [vmem:[#allocation8 + $0xec0] sm:$0xff] }
 0x17c   :  { %4345 = vmatprep.subr.bf16.mxu0 %v6069_v35  ;;  %4388 = vmatprep.subr.bf16.mxu1 %v6197_v36  ;;  %v1611_v34 = vld [vmem:[#allocation8 + $0xee0] sm:$0xff]  ;;  %v6148_v35 = vcombine.low %v1487_v48, %v1491_v51  ;;  %v6276_v36 = vcombine.low %v1615_v26, %v1619_v27  ;;  %v1192_v26 = vld [vmem:[#allocation8 + $0x1c8] sm:$0xff] }
 0x17d   :  { %v6269_v38 = vcombine.high %v1607_v8, %v1611_v34  ;;  %v1475_v40 = vld [vmem:[#allocation8 + $0xaa0] sm:$0xff]  ;;  %v1196_v27 = vld [vmem:[#allocation8 + $0x1e8] sm:$0xff] }
 0x17e   :  { %v6133_v47 = vcombine.high %v1471_v39, %v1475_v40  ;;  %v1463_v53 = vld [vmem:[#allocation8 + $0xa40] sm:$0xff]  ;;  %v6132_v61 = vcombine.low %v1471_v39, %v1475_v40  ;;  %v5855_v39 = vcombine.high %v1192_v26, %v1196_v27 }
 0x17f   :  { %4346 = vmatpush1.bf16.msra.mxu0 %v6068_v56  ;;  %4389 = vmatpush1.bf16.msra.mxu1 %v6196_v41  ;;  %v1599_v56 = vld [vmem:[#allocation8 + $0xe80] sm:$0xff] }
 0x180   :  { %4347 = vmatprep.subr.bf16.mxu0 %v6061_v42  ;;  %4390 = vmatprep.subr.bf16.mxu1 %v6189_v46  ;;  %v1603_v41 = vld [vmem:[#allocation8 + $0xea0] sm:$0xff]  ;;  %v6140_v42 = vcombine.low %v1479_v32, %v1483_v33  ;;  %v6268_v46 = vcombine.low %v1607_v8, %v1611_v34  ;;  %v1324_v32 = vld [vmem:[#allocation8 + $0x5e8] sm:$0xff] }
 0x181   :  { %v6261_v49 = vcombine.high %v1599_v56, %v1603_v41  ;;  %v1595_v59 = vld [vmem:[#allocation8 + $0xe60] sm:$0xff] }
 0x182   :  { %v1455_v9 = vld [vmem:[#allocation8 + $0xa00] sm:$0xff] }
 0x183   :  { %4348 = vmatpush1.bf16.msra.mxu0 %v6060_v54  ;;  %4391 = vmatpush1.bf16.msra.mxu1 %v6188_v55  ;;  %v1467_v54 = vld [vmem:[#allocation8 + $0xa60] sm:$0xff]  ;;  %v267_v55 = vsub.s32 4, %v6818_v20 }
 0x184   :  { %4349 = vmatprep.subr.bf16.mxu0 %v6053_v57  ;;  %4392 = vmatprep.subr.bf16.mxu1 %v6181_v58  ;;  %v279_v57 = vsub.s32 7, %v6818_v20  ;;  %v1591_v58 = vld [vmem:[#allocation8 + $0xe40] sm:$0xff]  ;;  %v6124_v18 = vcombine.low %v1463_v53, %v1467_v54 }
 0x185   :  { %v6253_v7 = vcombine.high %v1591_v58, %v1595_v59  ;;  %v1459_v10 = vld [vmem:[#allocation8 + $0xa20] sm:$0xff]  ;;  %v268_v11 = vrot.slane %v6823_v24, %v267_v55 }
 0x187   :  { %4350 = vmatpush1.bf16.msra.mxu0 %v6052_v2  ;;  %4393 = vmatpush1.bf16.msra.mxu1 %v6180_v4  ;;  %v6260_v2 = vcombine.low %v1599_v56, %v1603_v41  ;;  %v6125_v4 = vcombine.high %v1463_v53, %v1467_v54  ;;  %v1184_v53 = vld [vmem:[#allocation8 + $0x188] sm:$0xff] }
 0x188   :  { %4351 = vmatprep.subr.bf16.mxu0 %v6173_v5  ;;  %4394 = vmatprep.subr.bf16.mxu1 %v6301_v6  ;;  %v272_v6 = vrot.slane %v6823_v24, %v271_v52  ;;  %v1188_v54 = vld [vmem:[#allocation8 + $0x1a8] sm:$0xff] }
 0x18b   :  { %4352 = vmatpush2.bf16.msra.mxu0 %v6172_v12  ;;  %4395 = vmatpush2.bf16.msra.mxu1 %v6300_v13  ;;  %v280_v13 = vrot.slane %v6823_v24, %v279_v57  ;;  %v1320_v24 = vld [vmem:[#allocation8 + $0x5c8] sm:$0xff] }
 0x18c   :  { %4353 = vmatprep.subr.bf16.mxu0 %v6165_v14  ;;  %4396 = vmatprep.subr.bf16.mxu1 %v6293_v15  ;;  %v1583_v14 = vld [vmem:[#allocation8 + $0xe00] sm:$0xff] }
 0x18d   :  { %v1587_v15 = vld [vmem:[#allocation8 + $0xe20] sm:$0xff] }
 0x18e   :  { %v6245_v51 = vcombine.high %v1583_v14, %v1587_v15 }
 0x18f   :  { %4354 = vmatpush2.bf16.msra.mxu0 %v6164_v44  ;;  %4397 = vmatpush2.bf16.msra.mxu1 %v6292_v50  ;;  %v6252_v44 = vcombine.low %v1591_v58, %v1595_v59  ;;  %v6117_v50 = vcombine.high %v1455_v9, %v1459_v10 }
 0x190   :  { %4355 = vmatprep.subr.bf16.mxu0 %v6157_v19  ;;  %4398 = vmatprep.subr.bf16.mxu1 %v6285_v45 }
 0x193   :  { %4356 = vmatpush2.bf16.msra.mxu0 %v6156_v28  ;;  %4399 = vmatpush2.bf16.msra.mxu1 %v6284_v29 }
 0x194   :  { %4357 = vmatprep.subr.bf16.mxu0 %v6149_v30  ;;  %4400 = vmatprep.subr.bf16.mxu1 %v6277_v31 }
 0x197   :  { %4358 = vmatpush2.bf16.msra.mxu0 %v6148_v35  ;;  %4401 = vmatpush2.bf16.msra.mxu1 %v6276_v36  ;;  %v6116_v35 = vcombine.low %v1455_v9, %v1459_v10  ;;  %v5847_v9 = vcombine.high %v1184_v53, %v1188_v54  ;;  %v1176_v10 = vld [vmem:[#allocation8 + $0x148] sm:$0xff] }
 0x198   :  { %4359 = vmatprep.subr.bf16.mxu0 %v6141_v37  ;;  %4402 = vmatprep.subr.bf16.mxu1 %v6269_v38  ;;  %v6244_v38 = vcombine.low %v1583_v14, %v1587_v15  ;;  %v1308_v14 = vld [vmem:[#allocation8 + $0x568] sm:$0xff]  ;;  %v5846_v15 = vcombine.low %v1184_v53, %v1188_v54 }
 0x19b   :  { %4360 = vmatpush2.bf16.msra.mxu0 %v6140_v42  ;;  %4403 = vmatpush2.bf16.msra.mxu1 %v6268_v46  ;;  %v5983_v42 = vcombine.high %v1320_v24, %v1324_v32 }
 0x19c   :  { %v1059_v62 = vpop.f32.mrf.mxu0  ;;  %4361 = vmatprep.subr.bf16.mxu0 %v6133_v47  ;;  %v1102_v5 = vpop.f32.mrf.mxu1  ;;  %4404 = vmatprep.subr.bf16.mxu1 %v6261_v49 }
 0x19d   :  { %v1060_v28 = vadd.f32 %v1059_v62, %v268_v11  ;;  %v1103_v33 = vadd.f32 %v1102_v5, %v276_v16  ;;  %v1312_v62 = vld [vmem:[#allocation8 + $0x588] sm:$0xff] }
 0x19e   :  { %v1061_v12 = vpop.f32.mrf.mxu0  ;;  %v1104_v17 = vpop.f32.mrf.mxu1 }
 0x19f   :  { %4362 = vmatpush2.bf16.msra.mxu0 %v6132_v61  ;;  %4405 = vmatpush2.bf16.msra.mxu1 %v6260_v2  ;;  %v1062_v19 = vadd.f32 %v1061_v12, %v272_v6  ;;  %v1105_v29 = vadd.f32 %v1104_v17, %v280_v13  ;;  %v1115_v46 = vmax.f32 %v1060_v28, 0.0  ;;  %v1117_v58 = vmax.f32 %v1103_v33, 0.0  ;;  %v1316_v2 = vld [vmem:[#allocation8 + $0x5a8] sm:$0xff] }
 0x1a0   :  { %v1063_v43 = vpop.f32.mrf.mxu0  ;;  %4363 = vmatprep.subr.bf16.mxu0 %v6125_v4  ;;  %v1106_v48 = vpop.f32.mrf.mxu1  ;;  %4406 = vmatprep.subr.bf16.mxu1 %v6253_v7  ;;  %v5854_v61 = vcombine.low %v1192_v26, %v1196_v27  ;;  %v5975_v12 = vcombine.high %v1312_v62, %v1316_v2  ;;  %v1160_v27 = vld [vmem:[#allocation8 + $0xc8] sm:$0xff] }
 0x1a1   :  { %v1064_v45 = vadd.f32 %v1063_v43, %v268_v11  ;;  %v1107_v30 = vadd.f32 %v1106_v48, %v276_v16  ;;  %v1116_v40 = vmax.f32 %v1062_v19, 0.0  ;;  %v1118_v47 = vmax.f32 %v1105_v29, 0.0  ;;  %v1180_v11 = vld [vmem:[#allocation8 + $0x168] sm:$0xff] }
 0x1a2   :  { %v1065_v31 = vpop.f32.mrf.mxu0  ;;  %v1108_v34 = vpop.f32.mrf.mxu1  ;;  %v5974_v16 = vcombine.low %v1312_v62, %v1316_v2  ;;  %v5839_v17 = vcombine.high %v1176_v10, %v1180_v11  ;;  %v1168_v43 = vld [vmem:[#allocation8 + $0x108] sm:$0xff] }
 0x1a3   :  { %v1066_v8 = vadd.f32 %v1065_v31, %v272_v6  ;;  %4364 = vmatpush2.bf16.msra.mxu0 %v6124_v18  ;;  %v1123_v36 = vmax.f32 %v1064_v45, 0.0  ;;  %v1109_v37 = vadd.f32 %v1108_v34, %v280_v13  ;;  %4407 = vmatpush2.bf16.msra.mxu1 %v6252_v44  ;;  %v1125_v56 = vmax.f32 %v1107_v30, 0.0  ;;  %v1304_v13 = vld [vmem:[#allocation8 + $0x548] sm:$0xff] }
 0x1a4   :  { %4365 = vmatprep.subr.bf16.mxu0 %v6117_v50  ;;  %4408 = vmatprep.subr.bf16.mxu1 %v6245_v51  ;;  %v5982_v6 = vcombine.low %v1320_v24, %v1324_v32  ;;  %v5967_v18 = vcombine.high %v1304_v13, %v1308_v14  ;;  %v1172_v44 = vld [vmem:[#allocation8 + $0x128] sm:$0xff]  ;;  %v5838_v45 = vcombine.low %v1176_v10, %v1180_v11 }
 0x1a5   :  { %v1124_v41 = vmax.f32 %v1066_v8, 0.0  ;;  %v1126_v49 = vmax.f32 %v1109_v37, 0.0  ;;  %v6874_v4 = vpack.c.bf16 %v1123_v36, %v1115_v46  ;;  %v6878_v7 = vpack.c.bf16 %v1125_v56, %v1117_v58  ;;  %v1296_v50 = vld [vmem:[#allocation8 + $0x508] sm:$0xff] }
 0x1a6   :  { %v1300_v19 = vld [vmem:[#allocation8 + $0x528] sm:$0xff]  ;;  %v5966_v48 = vcombine.low %v1304_v13, %v1308_v14  ;;  %v5831_v51 = vcombine.high %v1168_v43, %v1172_v44  ;;  %v5830_v31 = vcombine.low %v1168_v43, %v1172_v44 }
 0x1a7   :  { %v6872_v59 = vpack.c.bf16 %v1124_v41, %v1116_v40  ;;  %4366 = vmatpush2.bf16.msra.mxu0 %v6116_v35  ;;  %v6876_v5 = vpack.c.bf16 %v1126_v49, %v1118_v47  ;;  %4409 = vmatpush2.bf16.msra.mxu1 %v6244_v38  ;;  %v5959_v26 = vcombine.high %v1296_v50, %v1300_v19  ;;  %v1164_v28 = vld [vmem:[#allocation8 + $0xe8] sm:$0xff] }
 0x1a8   :  { %4421 = vmatprep.subr.bf16.mxu0 %v5855_v39  ;;  %4464 = vmatprep.subr.bf16.mxu1 %v5983_v42  ;;  %v1288_v29 = vld [vmem:[#allocation8 + $0x4c8] sm:$0xff]  ;;  %v5958_v24 = vcombine.low %v1296_v50, %v1300_v19  ;;  %v5823_v32 = vcombine.high %v1160_v27, %v1164_v28  ;;  %v5822_v37 = vcombine.low %v1160_v27, %v1164_v28 }
 0x1a9   :  { %4367 = vmatprep.mubr.bf16.mxu0 %v6872_v59  ;;  %4410 = vmatprep.mubr.bf16.mxu1 %v6876_v5  ;;  %v1292_v30 = vld [vmem:[#allocation8 + $0x4e8] sm:$0xff] }
 0x1aa   :  { %4368 = vmatmul.mubr.bf16.vlgmr.msra.gmra.mxu0 %v6874_v4  ;;  %4411 = vmatmul.mubr.bf16.vlgmr.msra.gmra.mxu1 %v6878_v7  ;;  %v5951_v33 = vcombine.high %v1288_v29, %v1292_v30  ;;  %v1152_v8 = vld [vmem:[#allocation8 + $0x88] sm:$0xff]  ;;  %v5950_v38 = vcombine.low %v1288_v29, %v1292_v30 }
 0x1ab   :  { %4422 = vmatpush1.bf16.msra.mxu0 %v5854_v61  ;;  %4465 = vmatpush1.bf16.msra.mxu1 %v5982_v6  ;;  %v1156_v34 = vld [vmem:[#allocation8 + $0xa8] sm:$0xff] }
 0x1ac   :  { %4453 = vmatprep.mubr.bf16.mxu0 %v6838_v63  ;;  %4496 = vmatprep.mubr.bf16.mxu1 %v6842_v1  ;;  %v1280_v35 = vld [vmem:[#allocation8 + $0x488] sm:$0xff]  ;;  %v5815_v39 = vcombine.high %v1152_v8, %v1156_v34  ;;  %v5814_v47 = vcombine.low %v1152_v8, %v1156_v34 }
 0x1ad   :  { %4423 = vmatprep.subr.bf16.mxu0 %v5847_v9  ;;  %4466 = vmatprep.subr.bf16.mxu1 %v5975_v12  ;;  %v1284_v36 = vld [vmem:[#allocation8 + $0x4a8] sm:$0xff] }
 0x1ae   :  { %v5943_v40 = vcombine.high %v1280_v35, %v1284_v36  ;;  %v1144_v56 = vld [vmem:[#allocation8 + $0x48] sm:$0xff]  ;;  %v5942_v49 = vcombine.low %v1280_v35, %v1284_v36 }
 0x1af   :  { %4424 = vmatpush1.bf16.msra.mxu0 %v5846_v15  ;;  %4467 = vmatpush1.bf16.msra.mxu1 %v5974_v16  ;;  %v1148_v41 = vld [vmem:[#allocation8 + $0x68] sm:$0xff] }
 0x1b0   :  { %4425 = vmatprep.subr.bf16.mxu0 %v5839_v17  ;;  %4468 = vmatprep.subr.bf16.mxu1 %v5967_v18  ;;  %v1272_v42 = vld [vmem:[#allocation8 + $0x448] sm:$0xff]  ;;  %v5807_v53 = vcombine.high %v1144_v56, %v1148_v41  ;;  %v5806_v6 = vcombine.low %v1144_v56, %v1148_v41 }
 0x1b1   :  { %v1276_v46 = vld [vmem:[#allocation8 + $0x468] sm:$0xff] }
 0x1b2   :  { %v5935_v54 = vcombine.high %v1272_v42, %v1276_v46  ;;  %v1136_v58 = vld [vmem:[#allocation8 + $0x8] sm:$0xff]  ;;  %v5934_v9 = vcombine.low %v1272_v42, %v1276_v46 }
 0x1b3   :  { %4426 = vmatpush1.bf16.msra.mxu0 %v5838_v45  ;;  %4469 = vmatpush1.bf16.msra.mxu1 %v5966_v48  ;;  %v1140_v61 = vld [vmem:[#allocation8 + $0x28] sm:$0xff] }
 0x1b4   :  { %4427 = vmatprep.subr.bf16.mxu0 %v5831_v51  ;;  %4470 = vmatprep.subr.bf16.mxu1 %v5959_v26  ;;  %v1264_v62 = vld [vmem:[#allocation8 + $0x408] sm:$0xff]  ;;  %v5799_v10 = vcombine.high %v1136_v58, %v1140_v61  ;;  %v5798_v16 = vcombine.low %v1136_v58, %v1140_v61 }
 0x1b5   :  { %v1268_v2 = vld [vmem:[#allocation8 + $0x428] sm:$0xff] }
 0x1b6   :  { %v5927_v11 = vcombine.high %v1264_v62, %v1268_v2  ;;  %v1256_v12 = vld [vmem:[#allocation8 + $0x3c8] sm:$0xff]  ;;  %v5926_v17 = vcombine.low %v1264_v62, %v1268_v2 }
 0x1b7   :  { %4428 = vmatpush1.bf16.msra.mxu0 %v5830_v31  ;;  %4471 = vmatpush1.bf16.msra.mxu1 %v5958_v24  ;;  %v1260_v13 = vld [vmem:[#allocation8 + $0x3e8] sm:$0xff] }
 0x1b8   :  { %4429 = vmatprep.subr.bf16.mxu0 %v5823_v32  ;;  %4472 = vmatprep.subr.bf16.mxu1 %v5951_v33  ;;  %v1384_v14 = vld [vmem:[#allocation8 + $0x7c8] sm:$0xff]  ;;  %v5919_v18 = vcombine.high %v1256_v12, %v1260_v13  ;;  %v5918_v48 = vcombine.low %v1256_v12, %v1260_v13 }
 0x1b9   :  { %v1388_v15 = vld [vmem:[#allocation8 + $0x7e8] sm:$0xff] }
 0x1ba   :  { %v6047_v43 = vcombine.high %v1384_v14, %v1388_v15  ;;  %v1248_v44 = vld [vmem:[#allocation8 + $0x388] sm:$0xff]  ;;  %v6046_v51 = vcombine.low %v1384_v14, %v1388_v15 }
 0x1bb   :  { %4430 = vmatpush1.bf16.msra.mxu0 %v5822_v37  ;;  %4473 = vmatpush1.bf16.msra.mxu1 %v5950_v38  ;;  %v1252_v50 = vld [vmem:[#allocation8 + $0x3a8] sm:$0xff] }
 0x1bc   :  { %4431 = vmatprep.subr.bf16.mxu0 %v5815_v39  ;;  %4474 = vmatprep.subr.bf16.mxu1 %v5943_v40  ;;  %v1376_v19 = vld [vmem:[#allocation8 + $0x788] sm:$0xff]  ;;  %v5911_v26 = vcombine.high %v1248_v44, %v1252_v50  ;;  %v5910_v24 = vcombine.low %v1248_v44, %v1252_v50 }
 0x1bd   :  { %v1380_v45 = vld [vmem:[#allocation8 + $0x7a8] sm:$0xff] }
 0x1be   :  { %v6039_v27 = vcombine.high %v1376_v19, %v1380_v45  ;;  %v1240_v28 = vld [vmem:[#allocation8 + $0x348] sm:$0xff]  ;;  %v6038_v32 = vcombine.low %v1376_v19, %v1380_v45 }
 0x1bf   :  { %4432 = vmatpush1.bf16.msra.mxu0 %v5814_v47  ;;  %4475 = vmatpush1.bf16.msra.mxu1 %v5942_v49  ;;  %v1244_v29 = vld [vmem:[#allocation8 + $0x368] sm:$0xff] }
 0x1c0   :  { %4433 = vmatprep.subr.bf16.mxu0 %v5807_v53  ;;  %4476 = vmatprep.subr.bf16.mxu1 %v5935_v54  ;;  %v1368_v30 = vld [vmem:[#allocation8 + $0x748] sm:$0xff]  ;;  %v5903_v33 = vcombine.high %v1240_v28, %v1244_v29  ;;  %v5902_v38 = vcombine.low %v1240_v28, %v1244_v29 }
 0x1c1   :  { %v1372_v31 = vld [vmem:[#allocation8 + $0x768] sm:$0xff] }
 0x1c2   :  { %v6031_v8 = vcombine.high %v1368_v30, %v1372_v31  ;;  %v1232_v34 = vld [vmem:[#allocation8 + $0x308] sm:$0xff]  ;;  %v6030_v39 = vcombine.low %v1368_v30, %v1372_v31 }
 0x1c3   :  { %4434 = vmatpush1.bf16.msra.mxu0 %v5806_v6  ;;  %4477 = vmatpush1.bf16.msra.mxu1 %v5934_v9  ;;  %v1236_v35 = vld [vmem:[#allocation8 + $0x328] sm:$0xff] }
 0x1c4   :  { %4435 = vmatprep.subr.bf16.mxu0 %v5799_v10  ;;  %4478 = vmatprep.subr.bf16.mxu1 %v5927_v11  ;;  %v1360_v36 = vld [vmem:[#allocation8 + $0x708] sm:$0xff]  ;;  %v5895_v40 = vcombine.high %v1232_v34, %v1236_v35  ;;  %v5894_v49 = vcombine.low %v1232_v34, %v1236_v35 }
 0x1c5   :  { %v1364_v37 = vld [vmem:[#allocation8 + $0x728] sm:$0xff] }
 0x1c6   :  { %v6023_v56 = vcombine.high %v1360_v36, %v1364_v37  ;;  %v1224_v41 = vld [vmem:[#allocation8 + $0x2c8] sm:$0xff]  ;;  %v6022_v53 = vcombine.low %v1360_v36, %v1364_v37 }
 0x1c7   :  { %4436 = vmatpush1.bf16.msra.mxu0 %v5798_v16  ;;  %4479 = vmatpush1.bf16.msra.mxu1 %v5926_v17  ;;  %v1228_v42 = vld [vmem:[#allocation8 + $0x2e8] sm:$0xff] }
 0x1c8   :  { %4437 = vmatprep.subr.bf16.mxu0 %v5919_v18  ;;  %4480 = vmatprep.subr.bf16.mxu1 %v6047_v43  ;;  %v1352_v46 = vld [vmem:[#allocation8 + $0x6c8] sm:$0xff]  ;;  %v5887_v54 = vcombine.high %v1224_v41, %v1228_v42  ;;  %v5886_v9 = vcombine.low %v1224_v41, %v1228_v42 }
 0x1c9   :  { %v1356_v47 = vld [vmem:[#allocation8 + $0x6e8] sm:$0xff] }
 0x1ca   :  { %v6015_v58 = vcombine.high %v1352_v46, %v1356_v47  ;;  %v1216_v61 = vld [vmem:[#allocation8 + $0x288] sm:$0xff]  ;;  %v6014_v10 = vcombine.low %v1352_v46, %v1356_v47 }
 0x1cb   :  { %4438 = vmatpush2.bf16.msra.mxu0 %v5918_v48  ;;  %4481 = vmatpush2.bf16.msra.mxu1 %v6046_v51  ;;  %v1220_v62 = vld [vmem:[#allocation8 + $0x2a8] sm:$0xff] }
 0x1cc   :  { %4439 = vmatprep.subr.bf16.mxu0 %v5911_v26  ;;  %4482 = vmatprep.subr.bf16.mxu1 %v6039_v27  ;;  %v1344_v2 = vld [vmem:[#allocation8 + $0x688] sm:$0xff]  ;;  %v5879_v11 = vcombine.high %v1216_v61, %v1220_v62  ;;  %v5878_v17 = vcombine.low %v1216_v61, %v1220_v62 }
 0x1cd   :  { %v1348_v6 = vld [vmem:[#allocation8 + $0x6a8] sm:$0xff] }
 0x1ce   :  { %v6007_v12 = vcombine.high %v1344_v2, %v1348_v6  ;;  %v1208_v13 = vld [vmem:[#allocation8 + $0x248] sm:$0xff]  ;;  %v6006_v18 = vcombine.low %v1344_v2, %v1348_v6 }
 0x1cf   :  { %4440 = vmatpush2.bf16.msra.mxu0 %v5910_v24  ;;  %4483 = vmatpush2.bf16.msra.mxu1 %v6038_v32  ;;  %v1212_v14 = vld [vmem:[#allocation8 + $0x268] sm:$0xff] }
 0x1d0   :  { %4441 = vmatprep.subr.bf16.mxu0 %v5903_v33  ;;  %4484 = vmatprep.subr.bf16.mxu1 %v6031_v8  ;;  %v1336_v15 = vld [vmem:[#allocation8 + $0x648] sm:$0xff]  ;;  %v5871_v43 = vcombine.high %v1208_v13, %v1212_v14  ;;  %v5870_v51 = vcombine.low %v1208_v13, %v1212_v14 }
 0x1d1   :  { %v1340_v16 = vld [vmem:[#allocation8 + $0x668] sm:$0xff] }
 0x1d2   :  { %v5999_v44 = vcombine.high %v1336_v15, %v1340_v16  ;;  %v1200_v50 = vld [vmem:[#allocation8 + $0x208] sm:$0xff]  ;;  %v5998_v26 = vcombine.low %v1336_v15, %v1340_v16 }
 0x1d3   :  { %4442 = vmatpush2.bf16.msra.mxu0 %v5902_v38  ;;  %4485 = vmatpush2.bf16.msra.mxu1 %v6030_v39  ;;  %v1204_v19 = vld [vmem:[#allocation8 + $0x228] sm:$0xff] }
 0x1d4   :  { %4443 = vmatprep.subr.bf16.mxu0 %v5895_v40  ;;  %4486 = vmatprep.subr.bf16.mxu1 %v6023_v56  ;;  %v1328_v45 = vld [vmem:[#allocation8 + $0x608] sm:$0xff]  ;;  %v5863_v27 = vcombine.high %v1200_v50, %v1204_v19  ;;  %v5862_v32 = vcombine.low %v1200_v50, %v1204_v19 }
 0x1d5   :  { %v1332_v48 = vld [vmem:[#allocation8 + $0x628] sm:$0xff] }
 0x1d6   :  { %v5991_v28 = vcombine.high %v1328_v45, %v1332_v48  ;;  %v1448_v29 = vld [vmem:[#allocation8 + $0x9c8] sm:$0xff]  ;;  %v5990_v33 = vcombine.low %v1328_v45, %v1332_v48 }
 0x1d7   :  { %4444 = vmatpush2.bf16.msra.mxu0 %v5894_v49  ;;  %4487 = vmatpush2.bf16.msra.mxu1 %v6022_v53  ;;  %v1452_v30 = vld [vmem:[#allocation8 + $0x9e8] sm:$0xff] }
 0x1d8   :  { %4445 = vmatprep.subr.bf16.mxu0 %v5887_v54  ;;  %4488 = vmatprep.subr.bf16.mxu1 %v6015_v58  ;;  %v1576_v31 = vld [vmem:[#allocation8 + $0xdc8] sm:$0xff]  ;;  %v6111_v8 = vcombine.high %v1448_v29, %v1452_v30  ;;  %v6110_v37 = vcombine.low %v1448_v29, %v1452_v30 }
 0x1d9   :  { %v1580_v24 = vld [vmem:[#allocation8 + $0xde8] sm:$0xff] }
 0x1da   :  { %v6239_v34 = vcombine.high %v1576_v31, %v1580_v24  ;;  %v1440_v35 = vld [vmem:[#allocation8 + $0x988] sm:$0xff]  ;;  %v6238_v40 = vcombine.low %v1576_v31, %v1580_v24 }
 0x1db   :  { %4446 = vmatpush2.bf16.msra.mxu0 %v5886_v9  ;;  %4489 = vmatpush2.bf16.msra.mxu1 %v6014_v10  ;;  %v1444_v36 = vld [vmem:[#allocation8 + $0x9a8] sm:$0xff] }
 0x1dc   :  { %4447 = vmatprep.subr.bf16.mxu0 %v5879_v11  ;;  %4490 = vmatprep.subr.bf16.mxu1 %v6007_v12  ;;  %v1568_v38 = vld [vmem:[#allocation8 + $0xd88] sm:$0xff]  ;;  %v6103_v56 = vcombine.high %v1440_v35, %v1444_v36  ;;  %v6102_v53 = vcombine.low %v1440_v35, %v1444_v36 }
 0x1dd   :  { %v1572_v39 = vld [vmem:[#allocation8 + $0xda8] sm:$0xff] }
 0x1de   :  { %v1432_v41 = vld [vmem:[#allocation8 + $0x948] sm:$0xff]  ;;  %v6231_v46 = vcombine.high %v1568_v38, %v1572_v39  ;;  %v6230_v54 = vcombine.low %v1568_v38, %v1572_v39 }
 0x1df   :  { %4448 = vmatpush2.bf16.msra.mxu0 %v5878_v17  ;;  %4491 = vmatpush2.bf16.msra.mxu1 %v6006_v18  ;;  %v1436_v42 = vld [vmem:[#allocation8 + $0x968] sm:$0xff] }
 0x1e0   :  { %4449 = vmatprep.subr.bf16.mxu0 %v5871_v43  ;;  %4492 = vmatprep.subr.bf16.mxu1 %v5999_v44  ;;  %v1560_v47 = vld [vmem:[#allocation8 + $0xd48] sm:$0xff]  ;;  %v6095_v58 = vcombine.high %v1432_v41, %v1436_v42  ;;  %v6094_v10 = vcombine.low %v1432_v41, %v1436_v42 }
 0x1e1   :  { %v1564_v49 = vld [vmem:[#allocation8 + $0xd68] sm:$0xff] }
 0x1e2   :  { %v6223_v61 = vcombine.high %v1560_v47, %v1564_v49  ;;  %v1424_v62 = vld [vmem:[#allocation8 + $0x908] sm:$0xff]  ;;  %v6222_v11 = vcombine.low %v1560_v47, %v1564_v49 }
 0x1e3   :  { %4450 = vmatpush2.bf16.msra.mxu0 %v5870_v51  ;;  %4493 = vmatpush2.bf16.msra.mxu1 %v5998_v26  ;;  %v1428_v2 = vld [vmem:[#allocation8 + $0x928] sm:$0xff] }
 0x1e4   :  { %4451 = vmatprep.subr.bf16.mxu0 %v5863_v27  ;;  %4494 = vmatprep.subr.bf16.mxu1 %v5991_v28  ;;  %v1552_v6 = vld [vmem:[#allocation8 + $0xd08] sm:$0xff]  ;;  %v6087_v12 = vcombine.high %v1424_v62, %v1428_v2  ;;  %v6086_v18 = vcombine.low %v1424_v62, %v1428_v2 }
 0x1e5   :  { %v1556_v9 = vld [vmem:[#allocation8 + $0xd28] sm:$0xff] }
 0x1e6   :  { %v6215_v13 = vcombine.high %v1552_v6, %v1556_v9  ;;  %v1416_v14 = vld [vmem:[#allocation8 + $0x8c8] sm:$0xff]  ;;  %v6214_v43 = vcombine.low %v1552_v6, %v1556_v9 }
 0x1e7   :  { %4452 = vmatpush2.bf16.msra.mxu0 %v5862_v32  ;;  %4495 = vmatpush2.bf16.msra.mxu1 %v5990_v33  ;;  %v1420_v15 = vld [vmem:[#allocation8 + $0x8e8] sm:$0xff] }
 0x1e8   :  { %4507 = vmatprep.subr.bf16.mxu0 %v6111_v8  ;;  %4550 = vmatprep.subr.bf16.mxu1 %v6239_v34  ;;  %v1544_v16 = vld [vmem:[#allocation8 + $0xcc8] sm:$0xff]  ;;  %v6079_v44 = vcombine.high %v1416_v14, %v1420_v15  ;;  %v6078_v26 = vcombine.low %v1416_v14, %v1420_v15 }
 0x1e9   :  { %v1548_v17 = vld [vmem:[#allocation8 + $0xce8] sm:$0xff] }
 0x1ea   :  { %4454 = vmatmul.mubr.bf16.vlgmr.msra.gmra.mxu0 %v6840_v0  ;;  %4497 = vmatmul.mubr.bf16.vlgmr.msra.gmra.mxu1 %v6844_v3  ;;  %v6207_v50 = vcombine.high %v1544_v16, %v1548_v17  ;;  %v1408_v19 = vld [vmem:[#allocation8 + $0x888] sm:$0xff]  ;;  %v6206_v27 = vcombine.low %v1544_v16, %v1548_v17 }
 0x1eb   :  { %4508 = vmatpush1.bf16.msra.mxu0 %v6110_v37  ;;  %4539 = vmatprep.mubr.bf16.mxu0 %v6872_v59  ;;  %v1412_v45 = vld [vmem:[#allocation8 + $0x8a8] sm:$0xff] }
 0x1ec   :  { %4551 = vmatpush1.bf16.msra.mxu1 %v6238_v40  ;;  %4582 = vmatprep.mubr.bf16.mxu1 %v6876_v5  ;;  %v1536_v48 = vld [vmem:[#allocation8 + $0xc88] sm:$0xff]  ;;  %v6071_v28 = vcombine.high %v1408_v19, %v1412_v45  ;;  %v6070_v33 = vcombine.low %v1408_v19, %v1412_v45 }
 0x1ed   :  { %4509 = vmatprep.subr.bf16.mxu0 %v6103_v56  ;;  %4552 = vmatprep.subr.bf16.mxu1 %v6231_v46  ;;  %v1540_v51 = vld [vmem:[#allocation8 + $0xca8] sm:$0xff] }
 0x1ee   :  { %v6199_v29 = vcombine.high %v1536_v48, %v1540_v51  ;;  %v1400_v30 = vld [vmem:[#allocation8 + $0x848] sm:$0xff]  ;;  %v6198_v8 = vcombine.low %v1536_v48, %v1540_v51 }
 0x1ef   :  { %4510 = vmatpush1.bf16.msra.mxu0 %v6102_v53  ;;  %v1404_v31 = vld [vmem:[#allocation8 + $0x868] sm:$0xff] }
 0x1f0   :  { %4553 = vmatpush1.bf16.msra.mxu1 %v6230_v54  ;;  %4511 = vmatprep.subr.bf16.mxu0 %v6095_v58  ;;  %v1528_v24 = vld [vmem:[#allocation8 + $0xc48] sm:$0xff]  ;;  %v6063_v34 = vcombine.high %v1400_v30, %v1404_v31  ;;  %v6062_v40 = vcombine.low %v1400_v30, %v1404_v31 }
 0x1f1   :  { %4554 = vmatprep.subr.bf16.mxu1 %v6223_v61  ;;  %v1532_v32 = vld [vmem:[#allocation8 + $0xc68] sm:$0xff] }
 0x1f2   :  { %v6191_v35 = vcombine.high %v1528_v24, %v1532_v32  ;;  %v1392_v36 = vld [vmem:[#allocation8 + $0x808] sm:$0xff]  ;;  %v6190_v56 = vcombine.low %v1528_v24, %v1532_v32 }
 0x1f3   :  { %4512 = vmatpush1.bf16.msra.mxu0 %v6094_v10  ;;  %v1396_v37 = vld [vmem:[#allocation8 + $0x828] sm:$0xff] }
 0x1f4   :  { %4555 = vmatpush1.bf16.msra.mxu1 %v6222_v11  ;;  %4513 = vmatprep.subr.bf16.mxu0 %v6087_v12  ;;  %v1520_v38 = vld [vmem:[#allocation8 + $0xc08] sm:$0xff]  ;;  %v6055_v41 = vcombine.high %v1392_v36, %v1396_v37  ;;  %v6054_v54 = vcombine.low %v1392_v36, %v1396_v37 }
 0x1f5   :  { %4556 = vmatprep.subr.bf16.mxu1 %v6215_v13  ;;  %v1524_v39 = vld [vmem:[#allocation8 + $0xc28] sm:$0xff] }
 0x1f6   :  { %v6183_v42 = vcombine.high %v1520_v38, %v1524_v39  ;;  %v1512_v46 = vld [vmem:[#allocation8 + $0xbc8] sm:$0xff]  ;;  %v6182_v58 = vcombine.low %v1520_v38, %v1524_v39 }
 0x1f7   :  { %4514 = vmatpush1.bf16.msra.mxu0 %v6086_v18  ;;  %v1516_v47 = vld [vmem:[#allocation8 + $0xbe8] sm:$0xff] }
 0x1f8   :  { %4557 = vmatpush1.bf16.msra.mxu1 %v6214_v43  ;;  %4515 = vmatprep.subr.bf16.mxu0 %v6079_v44  ;;  %v1640_v49 = vld [vmem:[#allocation8 + $0xfc8] sm:$0xff]  ;;  %v6175_v61 = vcombine.high %v1512_v46, %v1516_v47  ;;  %v6174_v11 = vcombine.low %v1512_v46, %v1516_v47 }
 0x1f9   :  { %4558 = vmatprep.subr.bf16.mxu1 %v6207_v50  ;;  %v1644_v53 = vld [vmem:[#allocation8 + $0xfe8] sm:$0xff] }
 0x1fa   :  { %v6303_v62 = vcombine.high %v1640_v49, %v1644_v53  ;;  %v1504_v2 = vld [vmem:[#allocation8 + $0xb88] sm:$0xff]  ;;  %v6302_v12 = vcombine.low %v1640_v49, %v1644_v53 }
 0x1fb   :  { %4516 = vmatpush1.bf16.msra.mxu0 %v6078_v26  ;;  %v1508_v6 = vld [vmem:[#allocation8 + $0xba8] sm:$0xff] }
 0x1fc   :  { %4559 = vmatpush1.bf16.msra.mxu1 %v6206_v27  ;;  %4517 = vmatprep.subr.bf16.mxu0 %v6071_v28  ;;  %v1632_v9 = vld [vmem:[#allocation8 + $0xf88] sm:$0xff]  ;;  %v6167_v13 = vcombine.high %v1504_v2, %v1508_v6  ;;  %v6166_v43 = vcombine.low %v1504_v2, %v1508_v6 }
 0x1fd   :  { %4560 = vmatprep.subr.bf16.mxu1 %v6199_v29  ;;  %v1636_v10 = vld [vmem:[#allocation8 + $0xfa8] sm:$0xff] }
 0x1fe   :  { %v6295_v14 = vcombine.high %v1632_v9, %v1636_v10  ;;  %v1496_v15 = vld [vmem:[#allocation8 + $0xb48] sm:$0xff]  ;;  %v6294_v44 = vcombine.low %v1632_v9, %v1636_v10 }
 0x1ff   :  { %4518 = vmatpush1.bf16.msra.mxu0 %v6070_v33  ;;  %v1500_v16 = vld [vmem:[#allocation8 + $0xb68] sm:$0xff] }
 0x200   :  { %4561 = vmatpush1.bf16.msra.mxu1 %v6198_v8  ;;  %4519 = vmatprep.subr.bf16.mxu0 %v6063_v34  ;;  %v1624_v17 = vld [vmem:[#allocation8 + $0xf48] sm:$0xff]  ;;  %v6159_v50 = vcombine.high %v1496_v15, %v1500_v16  ;;  %v6158_v27 = vcombine.low %v1496_v15, %v1500_v16  ;;  %v1193_v16 = vld [vmem:[#allocation8 + $0x1d0] sm:$0xff] }
 0x201   :  { %4562 = vmatprep.subr.bf16.mxu1 %v6191_v35  ;;  %v1628_v18 = vld [vmem:[#allocation8 + $0xf68] sm:$0xff] }
 0x202   :  { %v6287_v19 = vcombine.high %v1624_v17, %v1628_v18  ;;  %v1488_v45 = vld [vmem:[#allocation8 + $0xb08] sm:$0xff]  ;;  %v6286_v28 = vcombine.low %v1624_v17, %v1628_v18  ;;  %v1197_v17 = vld [vmem:[#allocation8 + $0x1f0] sm:$0xff] }
 0x203   :  { %4520 = vmatpush1.bf16.msra.mxu0 %v6062_v40  ;;  %v1492_v48 = vld [vmem:[#allocation8 + $0xb28] sm:$0xff]  ;;  %v1321_v18 = vld [vmem:[#allocation8 + $0x5d0] sm:$0xff] }
 0x204   :  { %4563 = vmatpush1.bf16.msra.mxu1 %v6190_v56  ;;  %4521 = vmatprep.subr.bf16.mxu0 %v6055_v41  ;;  %v1616_v51 = vld [vmem:[#allocation8 + $0xf08] sm:$0xff]  ;;  %v6151_v29 = vcombine.high %v1488_v45, %v1492_v48  ;;  %v6150_v8 = vcombine.low %v1488_v45, %v1492_v48  ;;  %v1185_v48 = vld [vmem:[#allocation8 + $0x190] sm:$0xff] }
 0x205   :  { %4564 = vmatprep.subr.bf16.mxu1 %v6183_v42  ;;  %v1620_v26 = vld [vmem:[#allocation8 + $0xf28] sm:$0xff] }
 0x206   :  { %v6279_v30 = vcombine.high %v1616_v51, %v1620_v26  ;;  %v1480_v31 = vld [vmem:[#allocation8 + $0xac8] sm:$0xff]  ;;  %v6278_v34 = vcombine.low %v1616_v51, %v1620_v26  ;;  %v1189_v51 = vld [vmem:[#allocation8 + $0x1b0] sm:$0xff]  ;;  %v5856_v26 = vcombine.low %v1193_v16, %v1197_v17 }
 0x207   :  { %4522 = vmatpush1.bf16.msra.mxu0 %v6054_v54  ;;  %v1484_v24 = vld [vmem:[#allocation8 + $0xae8] sm:$0xff] }
 0x208   :  { %4565 = vmatpush1.bf16.msra.mxu1 %v6182_v58  ;;  %4523 = vmatprep.subr.bf16.mxu0 %v6175_v61  ;;  %v1608_v32 = vld [vmem:[#allocation8 + $0xec8] sm:$0xff]  ;;  %v6143_v35 = vcombine.high %v1480_v31, %v1484_v24  ;;  %v6142_v56 = vcombine.low %v1480_v31, %v1484_v24  ;;  %v1177_v31 = vld [vmem:[#allocation8 + $0x150] sm:$0xff] }
 0x209   :  { %4566 = vmatprep.subr.bf16.mxu1 %v6303_v62  ;;  %v1612_v33 = vld [vmem:[#allocation8 + $0xee8] sm:$0xff]  ;;  %v1181_v24 = vld [vmem:[#allocation8 + $0x170] sm:$0xff] }
 0x20a   :  { %v6271_v36 = vcombine.high %v1608_v32, %v1612_v33  ;;  %v1472_v37 = vld [vmem:[#allocation8 + $0xa88] sm:$0xff]  ;;  %v6270_v41 = vcombine.low %v1608_v32, %v1612_v33  ;;  %v1305_v33 = vld [vmem:[#allocation8 + $0x550] sm:$0xff] }
 0x20b   :  { %4524 = vmatpush2.bf16.msra.mxu0 %v6174_v11  ;;  %v1476_v38 = vld [vmem:[#allocation8 + $0xaa8] sm:$0xff] }
 0x20c   :  { %4567 = vmatpush2.bf16.msra.mxu1 %v6302_v12  ;;  %4525 = vmatprep.subr.bf16.mxu0 %v6167_v13  ;;  %v1600_v39 = vld [vmem:[#allocation8 + $0xe88] sm:$0xff]  ;;  %v6135_v42 = vcombine.high %v1472_v37, %v1476_v38  ;;  %v6134_v58 = vcombine.low %v1472_v37, %v1476_v38  ;;  %v1169_v38 = vld [vmem:[#allocation8 + $0x110] sm:$0xff] }
 0x20d   :  { %4568 = vmatprep.subr.bf16.mxu1 %v6295_v14  ;;  %v1604_v40 = vld [vmem:[#allocation8 + $0xea8] sm:$0xff] }
 0x20e   :  { %v6263_v46 = vcombine.high %v1600_v39, %v1604_v40  ;;  %v1464_v47 = vld [vmem:[#allocation8 + $0xa48] sm:$0xff]  ;;  %v6262_v61 = vcombine.low %v1600_v39, %v1604_v40  ;;  %v1173_v39 = vld [vmem:[#allocation8 + $0x130] sm:$0xff] }
 0x20f   :  { %4526 = vmatpush2.bf16.msra.mxu0 %v6166_v43  ;;  %v1468_v49 = vld [vmem:[#allocation8 + $0xa68] sm:$0xff]  ;;  %v1325_v43 = vld [vmem:[#allocation8 + $0x5f0] sm:$0xff] }
 0x210   :  { %4569 = vmatpush2.bf16.msra.mxu1 %v6294_v44  ;;  %4527 = vmatprep.subr.bf16.mxu0 %v6159_v50  ;;  %v1592_v53 = vld [vmem:[#allocation8 + $0xe48] sm:$0xff]  ;;  %v6127_v62 = vcombine.high %v1464_v47, %v1468_v49  ;;  %v6126_v12 = vcombine.low %v1464_v47, %v1468_v49  ;;  %v5985_v45 = vcombine.high %v1321_v18, %v1325_v43  ;;  %v1297_v40 = vld [vmem:[#allocation8 + $0x510] sm:$0xff] }
 0x211   :  { %4570 = vmatprep.subr.bf16.mxu1 %v6287_v19  ;;  %v1596_v54 = vld [vmem:[#allocation8 + $0xe68] sm:$0xff]  ;;  %v5857_v19 = vcombine.high %v1193_v16, %v1197_v17  ;;  %v1161_v49 = vld [vmem:[#allocation8 + $0xd0] sm:$0xff] }
 0x212   :  { %v6255_v2 = vcombine.high %v1592_v53, %v1596_v54  ;;  %v1456_v6 = vld [vmem:[#allocation8 + $0xa08] sm:$0xff]  ;;  %v6254_v13 = vcombine.low %v1592_v53, %v1596_v54  ;;  %v1165_v53 = vld [vmem:[#allocation8 + $0xf0] sm:$0xff] }
 0x213   :  { %4528 = vmatpush2.bf16.msra.mxu0 %v6158_v27  ;;  %v1460_v9 = vld [vmem:[#allocation8 + $0xa28] sm:$0xff]  ;;  %v1313_v27 = vld [vmem:[#allocation8 + $0x590] sm:$0xff] }
 0x214   :  { %4571 = vmatpush2.bf16.msra.mxu1 %v6286_v28  ;;  %4529 = vmatprep.subr.bf16.mxu0 %v6151_v29  ;;  %v1584_v10 = vld [vmem:[#allocation8 + $0xe08] sm:$0xff]  ;;  %v6119_v14 = vcombine.high %v1456_v6, %v1460_v9  ;;  %v6118_v44 = vcombine.low %v1456_v6, %v1460_v9  ;;  %v1317_v28 = vld [vmem:[#allocation8 + $0x5b0] sm:$0xff]  ;;  %v5984_v29 = vcombine.low %v1321_v18, %v1325_v43 }
 0x215   :  { %4572 = vmatprep.subr.bf16.mxu1 %v6279_v30  ;;  %v1588_v11 = vld [vmem:[#allocation8 + $0xe28] sm:$0xff]  ;;  %v5849_v30 = vcombine.high %v1185_v48, %v1189_v51  ;;  %v5977_v32 = vcombine.high %v1313_v27, %v1317_v28  ;;  %v1289_v54 = vld [vmem:[#allocation8 + $0x4d0] sm:$0xff] }
 0x216   :  { %v6247_v15 = vcombine.high %v1584_v10, %v1588_v11  ;;  %v6246_v50 = vcombine.low %v1584_v10, %v1588_v11  ;;  %v1153_v9 = vld [vmem:[#allocation8 + $0x90] sm:$0xff] }
 0x217   :  { %4530 = vmatpush2.bf16.msra.mxu0 %v6150_v8  ;;  %v1309_v8 = vld [vmem:[#allocation8 + $0x570] sm:$0xff] }
 0x218   :  { %4573 = vmatpush2.bf16.msra.mxu1 %v6278_v34  ;;  %4531 = vmatprep.subr.bf16.mxu0 %v6143_v35  ;;  %v5848_v34 = vcombine.low %v1185_v48, %v1189_v51  ;;  %v5976_v35 = vcombine.low %v1313_v27, %v1317_v28  ;;  %v5969_v37 = vcombine.high %v1305_v33, %v1309_v8  ;;  %v1157_v10 = vld [vmem:[#allocation8 + $0xb0] sm:$0xff] }
 0x219   :  { %4574 = vmatprep.subr.bf16.mxu1 %v6271_v36  ;;  %v5841_v36 = vcombine.high %v1177_v31, %v1181_v24  ;;  %v1281_v11 = vld [vmem:[#allocation8 + $0x490] sm:$0xff] }
 0x21a   :  { %v1145_v17 = vld [vmem:[#allocation8 + $0x50] sm:$0xff] }
 0x21b   :  { %4532 = vmatpush2.bf16.msra.mxu0 %v6142_v56  ;;  %v1301_v56 = vld [vmem:[#allocation8 + $0x530] sm:$0xff] }
 0x21c   :  { %4575 = vmatpush2.bf16.msra.mxu1 %v6270_v41  ;;  %4533 = vmatprep.subr.bf16.mxu0 %v6135_v42  ;;  %v5840_v41 = vcombine.low %v1177_v31, %v1181_v24  ;;  %v5968_v42 = vcombine.low %v1305_v33, %v1309_v8  ;;  %v5961_v47 = vcombine.high %v1297_v40, %v1301_v56  ;;  %v1149_v18 = vld [vmem:[#allocation8 + $0x70] sm:$0xff] }
 0x21d   :  { %4576 = vmatprep.subr.bf16.mxu1 %v6263_v46  ;;  %v5833_v46 = vcombine.high %v1169_v38, %v1173_v39  ;;  %v1273_v43 = vld [vmem:[#allocation8 + $0x450] sm:$0xff] }
 0x21e   :  { %v1137_v51 = vld [vmem:[#allocation8 + $0x10] sm:$0xff] }
 0x21f   :  { %4534 = vmatpush2.bf16.msra.mxu0 %v6134_v58  ;;  %v1293_v58 = vld [vmem:[#allocation8 + $0x4f0] sm:$0xff] }
 0x220   :  { %4577 = vmatpush2.bf16.msra.mxu1 %v6262_v61  ;;  %4535 = vmatprep.subr.bf16.mxu0 %v6127_v62  ;;  %v5832_v61 = vcombine.low %v1169_v38, %v1173_v39  ;;  %v5960_v62 = vcombine.low %v1297_v40, %v1301_v56  ;;  %v5953_v6 = vcombine.high %v1289_v54, %v1293_v58  ;;  %v1265_v27 = vld [vmem:[#allocation8 + $0x410] sm:$0xff] }
 0x221   :  { %4578 = vmatprep.subr.bf16.mxu1 %v6255_v2  ;;  %v5825_v2 = vcombine.high %v1161_v49, %v1165_v53  ;;  %v1269_v28 = vld [vmem:[#allocation8 + $0x430] sm:$0xff] }
 0x222   :  { %v5929_v24 = vcombine.high %v1265_v27, %v1269_v28  ;;  %v1261_v33 = vld [vmem:[#allocation8 + $0x3f0] sm:$0xff] }
 0x223   :  { %4536 = vmatpush2.bf16.msra.mxu0 %v6126_v12  ;;  %v1285_v12 = vld [vmem:[#allocation8 + $0x4b0] sm:$0xff] }
 0x224   :  { %4579 = vmatpush2.bf16.msra.mxu1 %v6254_v13  ;;  %4537 = vmatprep.subr.bf16.mxu0 %v6119_v14  ;;  %v5824_v13 = vcombine.low %v1161_v49, %v1165_v53  ;;  %v5952_v14 = vcombine.low %v1289_v54, %v1293_v58  ;;  %v5945_v16 = vcombine.high %v1281_v11, %v1285_v12  ;;  %v1385_v8 = vld [vmem:[#allocation8 + $0x7d0] sm:$0xff] }
 0x225   :  { %4580 = vmatprep.subr.bf16.mxu1 %v6247_v15  ;;  %v5817_v15 = vcombine.high %v1153_v9, %v1157_v10  ;;  %v1249_v39 = vld [vmem:[#allocation8 + $0x390] sm:$0xff] }
 0x226   :  { %v1253_v40 = vld [vmem:[#allocation8 + $0x3b0] sm:$0xff] }
 0x227   :  { %4538 = vmatpush2.bf16.msra.mxu0 %v6118_v44  ;;  %v1277_v44 = vld [vmem:[#allocation8 + $0x470] sm:$0xff] }
 0x228   :  { %4581 = vmatpush2.bf16.msra.mxu1 %v6246_v50  ;;  %4593 = vmatprep.subr.bf16.mxu0 %v5857_v19  ;;  %v5816_v50 = vcombine.low %v1153_v9, %v1157_v10  ;;  %v5944_v19 = vcombine.low %v1281_v11, %v1285_v12  ;;  %v5937_v48 = vcombine.high %v1273_v43, %v1277_v44  ;;  %v1377_v56 = vld [vmem:[#allocation8 + $0x790] sm:$0xff] }
 0x229   :  { %4636 = vmatprep.subr.bf16.mxu1 %v5985_v45  ;;  %v5809_v45 = vcombine.high %v1145_v17, %v1149_v18  ;;  %v1241_v53 = vld [vmem:[#allocation8 + $0x350] sm:$0xff] }
 0x22a   :  { %4540 = vmatmul.mubr.bf16.vlgmr.msra.gmra.mxu0 %v6874_v4  ;;  %v1245_v54 = vld [vmem:[#allocation8 + $0x370] sm:$0xff] }
 0x22b   :  { %4583 = vmatmul.mubr.bf16.vlgmr.msra.gmra.mxu1 %v6878_v7  ;;  %4594 = vmatpush1.bf16.msra.mxu0 %v5856_v26  ;;  %v1141_v26 = vld [vmem:[#allocation8 + $0x30] sm:$0xff] }
 0x22c   :  { %4625 = vmatprep.mubr.bf16.mxu0 %v6838_v63  ;;  %4637 = vmatpush1.bf16.msra.mxu1 %v5984_v29  ;;  %v5808_v29 = vcombine.low %v1145_v17, %v1149_v18  ;;  %v5801_v31 = vcombine.high %v1137_v51, %v1141_v26  ;;  %v1369_v58 = vld [vmem:[#allocation8 + $0x750] sm:$0xff] }
 0x22d   :  { %4668 = vmatprep.mubr.bf16.mxu1 %v6842_v1  ;;  %4595 = vmatprep.subr.bf16.mxu0 %v5849_v30  ;;  %v5936_v30 = vcombine.low %v1273_v43, %v1277_v44  ;;  %v1233_v10 = vld [vmem:[#allocation8 + $0x310] sm:$0xff] }
 0x22e   :  { %4638 = vmatprep.subr.bf16.mxu1 %v5977_v32  ;;  %v1257_v32 = vld [vmem:[#allocation8 + $0x3d0] sm:$0xff] }
 0x22f   :  { %4596 = vmatpush1.bf16.msra.mxu0 %v5848_v34  ;;  %v1389_v34 = vld [vmem:[#allocation8 + $0x7f0] sm:$0xff] }
 0x230   :  { %4639 = vmatpush1.bf16.msra.mxu1 %v5976_v35  ;;  %4597 = vmatprep.subr.bf16.mxu0 %v5841_v36  ;;  %v5800_v35 = vcombine.low %v1137_v51, %v1141_v26  ;;  %v5928_v36 = vcombine.low %v1265_v27, %v1269_v28  ;;  %v6049_v38 = vcombine.high %v1385_v8, %v1389_v34  ;;  %v1237_v11 = vld [vmem:[#allocation8 + $0x330] sm:$0xff] }
 0x231   :  { %4640 = vmatprep.subr.bf16.mxu1 %v5969_v37  ;;  %v5921_v37 = vcombine.high %v1257_v32, %v1261_v33  ;;  %v1361_v12 = vld [vmem:[#allocation8 + $0x710] sm:$0xff] }
 0x232   :  { %v1225_v18 = vld [vmem:[#allocation8 + $0x2d0] sm:$0xff] }
 0x233   :  { %4598 = vmatpush1.bf16.msra.mxu0 %v5840_v41  ;;  %v1381_v41 = vld [vmem:[#allocation8 + $0x7b0] sm:$0xff] }
 0x234   :  { %4641 = vmatpush1.bf16.msra.mxu1 %v5968_v42  ;;  %4599 = vmatprep.subr.bf16.mxu0 %v5833_v46  ;;  %v5920_v42 = vcombine.low %v1257_v32, %v1261_v33  ;;  %v6048_v46 = vcombine.low %v1385_v8, %v1389_v34  ;;  %v6041_v49 = vcombine.high %v1377_v56, %v1381_v41  ;;  %v1229_v43 = vld [vmem:[#allocation8 + $0x2f0] sm:$0xff] }
 0x235   :  { %4642 = vmatprep.subr.bf16.mxu1 %v5961_v47  ;;  %v5913_v47 = vcombine.high %v1249_v39, %v1253_v40  ;;  %v1353_v44 = vld [vmem:[#allocation8 + $0x6d0] sm:$0xff] }
 0x236   :  { %v1217_v26 = vld [vmem:[#allocation8 + $0x290] sm:$0xff] }
 0x237   :  { %4600 = vmatpush1.bf16.msra.mxu0 %v5832_v61  ;;  %v1373_v61 = vld [vmem:[#allocation8 + $0x770] sm:$0xff] }
 0x238   :  { %4643 = vmatpush1.bf16.msra.mxu1 %v5960_v62  ;;  %4601 = vmatprep.subr.bf16.mxu0 %v5825_v2  ;;  %v5912_v62 = vcombine.low %v1249_v39, %v1253_v40  ;;  %v6040_v2 = vcombine.low %v1377_v56, %v1381_v41  ;;  %v6033_v9 = vcombine.high %v1369_v58, %v1373_v61  ;;  %v1221_v27 = vld [vmem:[#allocation8 + $0x2b0] sm:$0xff] }
 0x239   :  { %4644 = vmatprep.subr.bf16.mxu1 %v5953_v6  ;;  %v5905_v6 = vcombine.high %v1241_v53, %v1245_v54  ;;  %v1345_v28 = vld [vmem:[#allocation8 + $0x690] sm:$0xff] }
 0x23a   :  { %v1209_v33 = vld [vmem:[#allocation8 + $0x250] sm:$0xff] }
 0x23b   :  { %4602 = vmatpush1.bf16.msra.mxu0 %v5824_v13  ;;  %v1365_v13 = vld [vmem:[#allocation8 + $0x730] sm:$0xff] }
 0x23c   :  { %4645 = vmatpush1.bf16.msra.mxu1 %v5952_v14  ;;  %4603 = vmatprep.subr.bf16.mxu0 %v5817_v15  ;;  %v5904_v14 = vcombine.low %v1241_v53, %v1245_v54  ;;  %v6032_v15 = vcombine.low %v1369_v58, %v1373_v61  ;;  %v6025_v17 = vcombine.high %v1361_v12, %v1365_v13  ;;  %v1213_v8 = vld [vmem:[#allocation8 + $0x270] sm:$0xff] }
 0x23d   :  { %4646 = vmatprep.subr.bf16.mxu1 %v5945_v16  ;;  %v5897_v16 = vcombine.high %v1233_v10, %v1237_v11  ;;  %v1337_v34 = vld [vmem:[#allocation8 + $0x650] sm:$0xff] }
 0x23e   :  { %v1201_v40 = vld [vmem:[#allocation8 + $0x210] sm:$0xff] }
 0x23f   :  { %4604 = vmatpush1.bf16.msra.mxu0 %v5816_v50  ;;  %v1357_v50 = vld [vmem:[#allocation8 + $0x6f0] sm:$0xff] }
 0x240   :  { %4647 = vmatpush1.bf16.msra.mxu1 %v5944_v19  ;;  %4605 = vmatprep.subr.bf16.mxu0 %v5809_v45  ;;  %v5896_v19 = vcombine.low %v1233_v10, %v1237_v11  ;;  %v6024_v45 = vcombine.low %v1361_v12, %v1365_v13  ;;  %v6017_v51 = vcombine.high %v1353_v44, %v1357_v50  ;;  %v1205_v56 = vld [vmem:[#allocation8 + $0x230] sm:$0xff] }
 0x241   :  { %4648 = vmatprep.subr.bf16.mxu1 %v5937_v48  ;;  %v5889_v48 = vcombine.high %v1225_v18, %v1229_v43  ;;  %v1329_v41 = vld [vmem:[#allocation8 + $0x610] sm:$0xff] }
 0x242   :  { %v1449_v54 = vld [vmem:[#allocation8 + $0x9d0] sm:$0xff] }
 0x243   :  { %4606 = vmatpush1.bf16.msra.mxu0 %v5808_v29  ;;  %v1349_v29 = vld [vmem:[#allocation8 + $0x6b0] sm:$0xff] }
 0x244   :  { %4649 = vmatpush1.bf16.msra.mxu1 %v5936_v30  ;;  %4607 = vmatprep.subr.bf16.mxu0 %v5801_v31  ;;  %v5888_v30 = vcombine.low %v1225_v18, %v1229_v43  ;;  %v6016_v31 = vcombine.low %v1353_v44, %v1357_v50  ;;  %v6009_v32 = vcombine.high %v1345_v28, %v1349_v29  ;;  %v1453_v58 = vld [vmem:[#allocation8 + $0x9f0] sm:$0xff] }
 0x245   :  { %4650 = vmatprep.subr.bf16.mxu1 %v5929_v24  ;;  %v5881_v24 = vcombine.high %v1217_v26, %v1221_v27  ;;  %v1577_v61 = vld [vmem:[#allocation8 + $0xdd0] sm:$0xff]  ;;  %v6112_v13 = vcombine.low %v1449_v54, %v1453_v58 }
 0x246   :  { %v1441_v11 = vld [vmem:[#allocation8 + $0x990] sm:$0xff] }
 0x247   :  { %4608 = vmatpush1.bf16.msra.mxu0 %v5800_v35  ;;  %v1341_v35 = vld [vmem:[#allocation8 + $0x670] sm:$0xff] }
 0x248   :  { %4651 = vmatpush1.bf16.msra.mxu1 %v5928_v36  ;;  %4609 = vmatprep.subr.bf16.mxu0 %v5921_v37  ;;  %v5880_v36 = vcombine.low %v1217_v26, %v1221_v27  ;;  %v6008_v37 = vcombine.low %v1345_v28, %v1349_v29  ;;  %v6001_v39 = vcombine.high %v1337_v34, %v1341_v35  ;;  %v1445_v12 = vld [vmem:[#allocation8 + $0x9b0] sm:$0xff] }
 0x249   :  { %4652 = vmatprep.subr.bf16.mxu1 %v6049_v38  ;;  %v5873_v38 = vcombine.high %v1209_v33, %v1213_v8  ;;  %v1433_v18 = vld [vmem:[#allocation8 + $0x950] sm:$0xff] }
 0x24a   :  { %v1437_v43 = vld [vmem:[#allocation8 + $0x970] sm:$0xff] }
 0x24b   :  { %4610 = vmatpush2.bf16.msra.mxu0 %v5920_v42  ;;  %v1333_v42 = vld [vmem:[#allocation8 + $0x630] sm:$0xff] }
 0x24c   :  { %4653 = vmatpush2.bf16.msra.mxu1 %v6048_v46  ;;  %4611 = vmatprep.subr.bf16.mxu0 %v5913_v47  ;;  %v5872_v46 = vcombine.low %v1209_v33, %v1213_v8  ;;  %v6000_v47 = vcombine.low %v1337_v34, %v1341_v35  ;;  %v5993_v53 = vcombine.high %v1329_v41, %v1333_v42  ;;  %v1561_v50 = vld [vmem:[#allocation8 + $0xd50] sm:$0xff] }
 0x24d   :  { %4654 = vmatprep.subr.bf16.mxu1 %v6041_v49  ;;  %v5865_v49 = vcombine.high %v1201_v40, %v1205_v56  ;;  %v1425_v27 = vld [vmem:[#allocation8 + $0x910] sm:$0xff] }
 0x24e   :  { %v1429_v28 = vld [vmem:[#allocation8 + $0x930] sm:$0xff] }
 0x24f   :  { %4612 = vmatpush2.bf16.msra.mxu0 %v5912_v62  ;;  %v1581_v62 = vld [vmem:[#allocation8 + $0xdf0] sm:$0xff] }
 0x250   :  { %4655 = vmatpush2.bf16.msra.mxu1 %v6040_v2  ;;  %4613 = vmatprep.subr.bf16.mxu0 %v5905_v6  ;;  %v5864_v2 = vcombine.low %v1201_v40, %v1205_v56  ;;  %v5992_v6 = vcombine.low %v1329_v41, %v1333_v42  ;;  %v6241_v10 = vcombine.high %v1577_v61, %v1581_v62  ;;  %v1553_v29 = vld [vmem:[#allocation8 + $0xd10] sm:$0xff] }
 0x251   :  { %4656 = vmatprep.subr.bf16.mxu1 %v6033_v9  ;;  %v6113_v9 = vcombine.high %v1449_v54, %v1453_v58  ;;  %v1417_v8 = vld [vmem:[#allocation8 + $0x8d0] sm:$0xff] }
 0x252   :  { %v1421_v34 = vld [vmem:[#allocation8 + $0x8f0] sm:$0xff] }
 0x253   :  { %4614 = vmatpush2.bf16.msra.mxu0 %v5904_v14  ;;  %v1569_v14 = vld [vmem:[#allocation8 + $0xd90] sm:$0xff] }
 0x254   :  { %4657 = vmatpush2.bf16.msra.mxu1 %v6032_v15  ;;  %4615 = vmatprep.subr.bf16.mxu0 %v5897_v16  ;;  %v1573_v15 = vld [vmem:[#allocation8 + $0xdb0] sm:$0xff]  ;;  %v6240_v16 = vcombine.low %v1577_v61, %v1581_v62 }
 0x255   :  { %4658 = vmatprep.subr.bf16.mxu1 %v6025_v17  ;;  %v6105_v17 = vcombine.high %v1441_v11, %v1445_v12  ;;  %v6233_v44 = vcombine.high %v1569_v14, %v1573_v15  ;;  %v1545_v35 = vld [vmem:[#allocation8 + $0xcd0] sm:$0xff] }
 0x256   :  { %v1409_v56 = vld [vmem:[#allocation8 + $0x890] sm:$0xff] }
 0x257   :  { %4616 = vmatpush2.bf16.msra.mxu0 %v5896_v19  ;;  %v1565_v19 = vld [vmem:[#allocation8 + $0xd70] sm:$0xff] }
 0x258   :  { %4659 = vmatpush2.bf16.msra.mxu1 %v6024_v45  ;;  %4617 = vmatprep.subr.bf16.mxu0 %v5889_v48  ;;  %v6104_v45 = vcombine.low %v1441_v11, %v1445_v12  ;;  %v6232_v48 = vcombine.low %v1569_v14, %v1573_v15  ;;  %v6225_v26 = vcombine.high %v1561_v50, %v1565_v19  ;;  %v1413_v41 = vld [vmem:[#allocation8 + $0x8b0] sm:$0xff] }
 0x259   :  { %4660 = vmatprep.subr.bf16.mxu1 %v6017_v51  ;;  %v6097_v51 = vcombine.high %v1433_v18, %v1437_v43  ;;  %v1537_v42 = vld [vmem:[#allocation8 + $0xc90] sm:$0xff] }
 0x25a   :  { %v1401_v58 = vld [vmem:[#allocation8 + $0x850] sm:$0xff] }
 0x25b   :  { %4618 = vmatpush2.bf16.msra.mxu0 %v5888_v30  ;;  %v1557_v30 = vld [vmem:[#allocation8 + $0xd30] sm:$0xff] }
 0x25c   :  { %4661 = vmatpush2.bf16.msra.mxu1 %v6016_v31  ;;  %4619 = vmatprep.subr.bf16.mxu0 %v5881_v24  ;;  %v6096_v31 = vcombine.low %v1433_v18, %v1437_v43  ;;  %v6224_v24 = vcombine.low %v1561_v50, %v1565_v19  ;;  %v6217_v33 = vcombine.high %v1553_v29, %v1557_v30  ;;  %v1405_v61 = vld [vmem:[#allocation8 + $0x870] sm:$0xff] }
 0x25d   :  { %4662 = vmatprep.subr.bf16.mxu1 %v6009_v32  ;;  %v6089_v32 = vcombine.high %v1425_v27, %v1429_v28  ;;  %v1529_v62 = vld [vmem:[#allocation8 + $0xc50] sm:$0xff] }
 0x25e   :  { %v1393_v12 = vld [vmem:[#allocation8 + $0x810] sm:$0xff] }
 0x25f   :  { %4620 = vmatpush2.bf16.msra.mxu0 %v5880_v36  ;;  %v1549_v36 = vld [vmem:[#allocation8 + $0xcf0] sm:$0xff] }
 0x260   :  { %4663 = vmatpush2.bf16.msra.mxu1 %v6008_v37  ;;  %4621 = vmatprep.subr.bf16.mxu0 %v5873_v38  ;;  %v6088_v37 = vcombine.low %v1425_v27, %v1429_v28  ;;  %v6216_v38 = vcombine.low %v1553_v29, %v1557_v30  ;;  %v6209_v40 = vcombine.high %v1545_v35, %v1549_v36  ;;  %v1521_v14 = vld [vmem:[#allocation8 + $0xc10] sm:$0xff] }
 0x261   :  { %4664 = vmatprep.subr.bf16.mxu1 %v6001_v39  ;;  %v6081_v39 = vcombine.high %v1417_v8, %v1421_v34  ;;  %v1525_v15 = vld [vmem:[#allocation8 + $0xc30] sm:$0xff] }
 0x262   :  { %v6185_v43 = vcombine.high %v1521_v14, %v1525_v15  ;;  %v1517_v50 = vld [vmem:[#allocation8 + $0xbf0] sm:$0xff] }
 0x263   :  { %4622 = vmatpush2.bf16.msra.mxu0 %v5872_v46  ;;  %v1541_v46 = vld [vmem:[#allocation8 + $0xcb0] sm:$0xff] }
 0x264   :  { %4665 = vmatpush2.bf16.msra.mxu1 %v6000_v47  ;;  %4623 = vmatprep.subr.bf16.mxu0 %v5865_v49  ;;  %v6080_v47 = vcombine.low %v1417_v8, %v1421_v34  ;;  %v6208_v49 = vcombine.low %v1545_v35, %v1549_v36  ;;  %v6201_v54 = vcombine.high %v1537_v42, %v1541_v46  ;;  %v1641_v19 = vld [vmem:[#allocation8 + $0xfd0] sm:$0xff] }
 0x265   :  { %4666 = vmatprep.subr.bf16.mxu1 %v5993_v53  ;;  %v6073_v53 = vcombine.high %v1409_v56, %v1413_v41  ;;  %v1505_v28 = vld [vmem:[#allocation8 + $0xb90] sm:$0xff] }
 0x266   :  { %v1509_v29 = vld [vmem:[#allocation8 + $0xbb0] sm:$0xff] }
 0x267   :  { %4624 = vmatpush2.bf16.msra.mxu0 %v5864_v2  ;;  %v1533_v2 = vld [vmem:[#allocation8 + $0xc70] sm:$0xff] }
 0x268   :  { %4667 = vmatpush2.bf16.msra.mxu1 %v5992_v6  ;;  %4679 = vmatprep.subr.bf16.mxu0 %v6113_v9  ;;  %v6072_v6 = vcombine.low %v1409_v56, %v1413_v41  ;;  %v6200_v9 = vcombine.low %v1537_v42, %v1541_v46  ;;  %v6193_v11 = vcombine.high %v1529_v62, %v1533_v2  ;;  %v1633_v30 = vld [vmem:[#allocation8 + $0xf90] sm:$0xff] }
 0x269   :  { %4722 = vmatprep.subr.bf16.mxu1 %v6241_v10  ;;  %v6065_v10 = vcombine.high %v1401_v58, %v1405_v61  ;;  %v1497_v34 = vld [vmem:[#allocation8 + $0xb50] sm:$0xff] }
 0x26a   :  { %4626 = vmatmul.mubr.bf16.vlgmr.msra.gmra.mxu0 %v6840_v0  ;;  %v1501_v35 = vld [vmem:[#allocation8 + $0xb70] sm:$0xff] }
 0x26b   :  { %4669 = vmatmul.mubr.bf16.vlgmr.msra.gmra.mxu1 %v6844_v3  ;;  %4680 = vmatpush1.bf16.msra.mxu0 %v6112_v13  ;;  %v1397_v13 = vld [vmem:[#allocation8 + $0x830] sm:$0xff] }
 0x26c   :  { %4711 = vmatprep.mubr.bf16.mxu0 %v6872_v59  ;;  %4723 = vmatpush1.bf16.msra.mxu1 %v6240_v16  ;;  %v6064_v16 = vcombine.low %v1401_v58, %v1405_v61  ;;  %v6057_v18 = vcombine.high %v1393_v12, %v1397_v13  ;;  %v1625_v36 = vld [vmem:[#allocation8 + $0xf50] sm:$0xff] }
 0x26d   :  { %4754 = vmatprep.mubr.bf16.mxu1 %v6876_v5  ;;  %4681 = vmatprep.subr.bf16.mxu0 %v6105_v17  ;;  %v6192_v17 = vcombine.low %v1529_v62, %v1533_v2  ;;  %v1489_v41 = vld [vmem:[#allocation8 + $0xb10] sm:$0xff] }
 0x26e   :  { %4724 = vmatprep.subr.bf16.mxu1 %v6233_v44  ;;  %v1513_v44 = vld [vmem:[#allocation8 + $0xbd0] sm:$0xff] }
 0x26f   :  { %4682 = vmatpush1.bf16.msra.mxu0 %v6104_v45  ;;  %v1645_v45 = vld [vmem:[#allocation8 + $0xff0] sm:$0xff] }
 0x270   :  { %4725 = vmatpush1.bf16.msra.mxu1 %v6232_v48  ;;  %4683 = vmatprep.subr.bf16.mxu0 %v6097_v51  ;;  %v6056_v48 = vcombine.low %v1393_v12, %v1397_v13  ;;  %v6184_v51 = vcombine.low %v1521_v14, %v1525_v15  ;;  %v6305_v27 = vcombine.high %v1641_v19, %v1645_v45  ;;  %v1493_v42 = vld [vmem:[#allocation8 + $0xb30] sm:$0xff] }
 0x271   :  { %4726 = vmatprep.subr.bf16.mxu1 %v6225_v26  ;;  %v6177_v26 = vcombine.high %v1513_v44, %v1517_v50  ;;  %v1617_v46 = vld [vmem:[#allocation8 + $0xf10] sm:$0xff] }
 0x272   :  { %v1481_v61 = vld [vmem:[#allocation8 + $0xad0] sm:$0xff] }
 0x273   :  { %4684 = vmatpush1.bf16.msra.mxu0 %v6096_v31  ;;  %v1637_v31 = vld [vmem:[#allocation8 + $0xfb0] sm:$0xff] }
 0x274   :  { %4727 = vmatpush1.bf16.msra.mxu1 %v6224_v24  ;;  %4685 = vmatprep.subr.bf16.mxu0 %v6089_v32  ;;  %v6176_v24 = vcombine.low %v1513_v44, %v1517_v50  ;;  %v6304_v32 = vcombine.low %v1641_v19, %v1645_v45  ;;  %v6297_v8 = vcombine.high %v1633_v30, %v1637_v31  ;;  %v1485_v62 = vld [vmem:[#allocation8 + $0xaf0] sm:$0xff] }
 0x275   :  { %4728 = vmatprep.subr.bf16.mxu1 %v6217_v33  ;;  %v6169_v33 = vcombine.high %v1505_v28, %v1509_v29  ;;  %v1609_v2 = vld [vmem:[#allocation8 + $0xed0] sm:$0xff] }
 0x276   :  { %v1473_v13 = vld [vmem:[#allocation8 + $0xa90] sm:$0xff] }
 0x277   :  { %4686 = vmatpush1.bf16.msra.mxu0 %v6088_v37  ;;  %v1629_v37 = vld [vmem:[#allocation8 + $0xf70] sm:$0xff] }
 0x278   :  { %4729 = vmatpush1.bf16.msra.mxu1 %v6216_v38  ;;  %4687 = vmatprep.subr.bf16.mxu0 %v6081_v39  ;;  %v6168_v38 = vcombine.low %v1505_v28, %v1509_v29  ;;  %v6296_v39 = vcombine.low %v1633_v30, %v1637_v31  ;;  %v6289_v56 = vcombine.high %v1625_v36, %v1629_v37  ;;  %v1477_v14 = vld [vmem:[#allocation8 + $0xab0] sm:$0xff] }
 0x279   :  { %4730 = vmatprep.subr.bf16.mxu1 %v6209_v40  ;;  %v6161_v40 = vcombine.high %v1497_v34, %v1501_v35  ;;  %v1601_v15 = vld [vmem:[#allocation8 + $0xe90] sm:$0xff] }
 0x27a   :  { %v1465_v50 = vld [vmem:[#allocation8 + $0xa50] sm:$0xff] }
 0x27b   :  { %4688 = vmatpush1.bf16.msra.mxu0 %v6080_v47  ;;  %v1621_v47 = vld [vmem:[#allocation8 + $0xf30] sm:$0xff] }
 0x27c   :  { %4731 = vmatpush1.bf16.msra.mxu1 %v6208_v49  ;;  %4689 = vmatprep.subr.bf16.mxu0 %v6073_v53  ;;  %v6160_v49 = vcombine.low %v1497_v34, %v1501_v35  ;;  %v6288_v53 = vcombine.low %v1625_v36, %v1629_v37  ;;  %v6281_v58 = vcombine.high %v1617_v46, %v1621_v47  ;;  %v1469_v19 = vld [vmem:[#allocation8 + $0xa70] sm:$0xff]  ;;  %v1194_v35 = vld [vmem:[#allocation8 + $0x1d8] sm:$0xff] }
 0x27d   :  { %4732 = vmatprep.subr.bf16.mxu1 %v6201_v54  ;;  %v6153_v54 = vcombine.high %v1489_v41, %v1493_v42  ;;  %v1593_v45 = vld [vmem:[#allocation8 + $0xe50] sm:$0xff]  ;;  %v1198_v36 = vld [vmem:[#allocation8 + $0x1f8] sm:$0xff] }
 0x27e   :  { %v1457_v29 = vld [vmem:[#allocation8 + $0xa10] sm:$0xff]  ;;  %v1322_v37 = vld [vmem:[#allocation8 + $0x5d8] sm:$0xff] }
 0x27f   :  { %4690 = vmatpush1.bf16.msra.mxu0 %v6072_v6  ;;  %v1613_v6 = vld [vmem:[#allocation8 + $0xef0] sm:$0xff] }
 0x280   :  { %4733 = vmatpush1.bf16.msra.mxu1 %v6200_v9  ;;  %4691 = vmatprep.subr.bf16.mxu0 %v6065_v10  ;;  %v6152_v9 = vcombine.low %v1489_v41, %v1493_v42  ;;  %v6280_v10 = vcombine.low %v1617_v46, %v1621_v47  ;;  %v6273_v12 = vcombine.high %v1609_v2, %v1613_v6  ;;  %v1461_v30 = vld [vmem:[#allocation8 + $0xa30] sm:$0xff]  ;;  %v1186_v42 = vld [vmem:[#allocation8 + $0x198] sm:$0xff] }
 0x281   :  { %4734 = vmatprep.subr.bf16.mxu1 %v6193_v11  ;;  %v6145_v11 = vcombine.high %v1481_v61, %v1485_v62  ;;  %v1585_v31 = vld [vmem:[#allocation8 + $0xe10] sm:$0xff]  ;;  %v1190_v46 = vld [vmem:[#allocation8 + $0x1b8] sm:$0xff]  ;;  %v5858_v47 = vcombine.low %v1194_v35, %v1198_v36 }
 0x283   :  { %4692 = vmatpush1.bf16.msra.mxu0 %v6064_v16  ;;  %v1605_v16 = vld [vmem:[#allocation8 + $0xeb0] sm:$0xff] }
 0x284   :  { %4735 = vmatpush1.bf16.msra.mxu1 %v6192_v17  ;;  %4693 = vmatprep.subr.bf16.mxu0 %v6057_v18  ;;  %v6144_v17 = vcombine.low %v1481_v61, %v1485_v62  ;;  %v6272_v18 = vcombine.low %v1609_v2, %v1613_v6  ;;  %v6265_v44 = vcombine.high %v1601_v15, %v1605_v16  ;;  %v1178_v61 = vld [vmem:[#allocation8 + $0x158] sm:$0xff] }
 0x285   :  { %4736 = vmatprep.subr.bf16.mxu1 %v6185_v43  ;;  %v6137_v43 = vcombine.high %v1473_v13, %v1477_v14  ;;  %v1182_v62 = vld [vmem:[#allocation8 + $0x178] sm:$0xff] }
 0x286   :  { %v1306_v6 = vld [vmem:[#allocation8 + $0x558] sm:$0xff] }
 0x287   :  { %4694 = vmatpush1.bf16.msra.mxu0 %v6056_v48  ;;  %v1597_v48 = vld [vmem:[#allocation8 + $0xe70] sm:$0xff] }
 0x288   :  { %4737 = vmatpush1.bf16.msra.mxu1 %v6184_v51  ;;  %4695 = vmatprep.subr.bf16.mxu0 %v6177_v26  ;;  %v6136_v51 = vcombine.low %v1473_v13, %v1477_v14  ;;  %v6264_v26 = vcombine.low %v1601_v15, %v1605_v16  ;;  %v6257_v28 = vcombine.high %v1593_v45, %v1597_v48  ;;  %v1170_v14 = vld [vmem:[#allocation8 + $0x118] sm:$0xff] }
 0x289   :  { %4738 = vmatprep.subr.bf16.mxu1 %v6305_v27  ;;  %v6129_v27 = vcombine.high %v1465_v50, %v1469_v19  ;;  %v1174_v15 = vld [vmem:[#allocation8 + $0x138] sm:$0xff] }
 0x28a   :  { %v1298_v16 = vld [vmem:[#allocation8 + $0x518] sm:$0xff] }
 0x28b   :  { %4696 = vmatpush2.bf16.msra.mxu0 %v6176_v24  ;;  %v1589_v24 = vld [vmem:[#allocation8 + $0xe30] sm:$0xff] }
 0x28c   :  { %4739 = vmatpush2.bf16.msra.mxu1 %v6304_v32  ;;  %4697 = vmatprep.subr.bf16.mxu0 %v6169_v33  ;;  %v6128_v32 = vcombine.low %v1465_v50, %v1469_v19  ;;  %v6256_v33 = vcombine.low %v1593_v45, %v1597_v48  ;;  %v6249_v34 = vcombine.high %v1585_v31, %v1589_v24  ;;  %v1162_v50 = vld [vmem:[#allocation8 + $0xd8] sm:$0xff] }
 0x28d   :  { %4740 = vmatprep.subr.bf16.mxu1 %v6297_v8  ;;  %v6121_v8 = vcombine.high %v1457_v29, %v1461_v30  ;;  %v1166_v19 = vld [vmem:[#allocation8 + $0xf8] sm:$0xff] }
 0x28e   :  { %v1290_v45 = vld [vmem:[#allocation8 + $0x4d8] sm:$0xff] }
 0x28f   :  { %4698 = vmatpush2.bf16.msra.mxu0 %v6168_v38  ;;  %v1326_v38 = vld [vmem:[#allocation8 + $0x5f8] sm:$0xff] }
 0x290   :  { %4741 = vmatpush2.bf16.msra.mxu1 %v6296_v39  ;;  %4699 = vmatprep.subr.bf16.mxu0 %v6161_v40  ;;  %v6120_v39 = vcombine.low %v1457_v29, %v1461_v30  ;;  %v6248_v40 = vcombine.low %v1585_v31, %v1589_v24  ;;  %v5987_v41 = vcombine.high %v1322_v37, %v1326_v38  ;;  %v1294_v48 = vld [vmem:[#allocation8 + $0x4f8] sm:$0xff] }
 0x291   :  { %4742 = vmatprep.subr.bf16.mxu1 %v6289_v56  ;;  %v5859_v56 = vcombine.high %v1194_v35, %v1198_v36  ;;  %v1158_v29 = vld [vmem:[#allocation8 + $0xb8] sm:$0xff]  ;;  %v5826_v24 = vcombine.low %v1162_v50, %v1166_v19 }
 0x292   :  { %v1282_v30 = vld [vmem:[#allocation8 + $0x498] sm:$0xff] }
 0x293   :  { %4700 = vmatpush2.bf16.msra.mxu0 %v6160_v49  ;;  %v1314_v49 = vld [vmem:[#allocation8 + $0x598] sm:$0xff] }
 0x294   :  { %4743 = vmatpush2.bf16.msra.mxu1 %v6288_v53  ;;  %4701 = vmatprep.subr.bf16.mxu0 %v6153_v54  ;;  %v1318_v53 = vld [vmem:[#allocation8 + $0x5b8] sm:$0xff]  ;;  %v5986_v54 = vcombine.low %v1322_v37, %v1326_v38 }
 0x295   :  { %4744 = vmatprep.subr.bf16.mxu1 %v6281_v58  ;;  %v5851_v58 = vcombine.high %v1186_v42, %v1190_v46  ;;  %v5979_v2 = vcombine.high %v1314_v49, %v1318_v53  ;;  %v1286_v31 = vld [vmem:[#allocation8 + $0x4b8] sm:$0xff] }
 0x296   :  { %v1150_v35 = vld [vmem:[#allocation8 + $0x78] sm:$0xff] }
 0x297   :  { %4702 = vmatpush2.bf16.msra.mxu0 %v6152_v9  ;;  %v1310_v9 = vld [vmem:[#allocation8 + $0x578] sm:$0xff] }
 0x298   :  { %4745 = vmatpush2.bf16.msra.mxu1 %v6280_v10  ;;  %4703 = vmatprep.subr.bf16.mxu0 %v6145_v11  ;;  %v5850_v10 = vcombine.low %v1186_v42, %v1190_v46  ;;  %v5978_v11 = vcombine.low %v1314_v49, %v1318_v53  ;;  %v5971_v13 = vcombine.high %v1306_v6, %v1310_v9  ;;  %v1274_v36 = vld [vmem:[#allocation8 + $0x458] sm:$0xff] }
 0x299   :  { %4746 = vmatprep.subr.bf16.mxu1 %v6273_v12  ;;  %v5843_v12 = vcombine.high %v1178_v61, %v1182_v62  ;;  %v1278_v37 = vld [vmem:[#allocation8 + $0x478] sm:$0xff] }
 0x29a   :  { %v1142_v42 = vld [vmem:[#allocation8 + $0x38] sm:$0xff]  ;;  %v5938_v53 = vcombine.low %v1274_v36, %v1278_v37 }
 0x29b   :  { %4704 = vmatpush2.bf16.msra.mxu0 %v6144_v17  ;;  %v1302_v17 = vld [vmem:[#allocation8 + $0x538] sm:$0xff] }
 0x29c   :  { %4747 = vmatpush2.bf16.msra.mxu1 %v6272_v18  ;;  %4705 = vmatprep.subr.bf16.mxu0 %v6137_v43  ;;  %v5842_v18 = vcombine.low %v1178_v61, %v1182_v62  ;;  %v5970_v43 = vcombine.low %v1306_v6, %v1310_v9  ;;  %v1266_v46 = vld [vmem:[#allocation8 + $0x418] sm:$0xff] }
 0x29d   :  { %4748 = vmatprep.subr.bf16.mxu1 %v6265_v44  ;;  %v5835_v44 = vcombine.high %v1170_v14, %v1174_v15  ;;  %v1258_v61 = vld [vmem:[#allocation8 + $0x3d8] sm:$0xff] }
 0x29e   :  { %v1262_v62 = vld [vmem:[#allocation8 + $0x3f8] sm:$0xff] }
 0x29f   :  { %4706 = vmatpush2.bf16.msra.mxu0 %v6136_v51  ;;  %v5962_v51 = vcombine.low %v1298_v16, %v1302_v17  ;;  %v1390_v6 = vld [vmem:[#allocation8 + $0x7f8] sm:$0xff] }
 0x2a0   :  { %4749 = vmatpush2.bf16.msra.mxu1 %v6264_v26  ;;  %4707 = vmatprep.subr.bf16.mxu0 %v6129_v27  ;;  %v5827_v26 = vcombine.high %v1162_v50, %v1166_v19  ;;  %v5955_v27 = vcombine.high %v1290_v45, %v1294_v48  ;;  %v1246_v50 = vld [vmem:[#allocation8 + $0x378] sm:$0xff] }
 0x2a1   :  { %4750 = vmatprep.subr.bf16.mxu1 %v6257_v28  ;;  %v1154_v28 = vld [vmem:[#allocation8 + $0x98] sm:$0xff] }
 0x2a2   :  { %v5818_v38 = vcombine.low %v1154_v28, %v1158_v29  ;;  %v1370_v19 = vld [vmem:[#allocation8 + $0x758] sm:$0xff] }
 0x2a3   :  { %4708 = vmatpush2.bf16.msra.mxu0 %v6128_v32  ;;  %v5954_v32 = vcombine.low %v1290_v45, %v1294_v48  ;;  %v1374_v45 = vld [vmem:[#allocation8 + $0x778] sm:$0xff] }
 0x2a4   :  { %4751 = vmatpush2.bf16.msra.mxu1 %v6256_v33  ;;  %4709 = vmatprep.subr.bf16.mxu0 %v6121_v8  ;;  %v5819_v33 = vcombine.high %v1154_v28, %v1158_v29  ;;  %v5947_v8 = vcombine.high %v1282_v30, %v1286_v31  ;;  %v1238_v28 = vld [vmem:[#allocation8 + $0x338] sm:$0xff] }
 0x2a5   :  { %4752 = vmatprep.subr.bf16.mxu1 %v6249_v34  ;;  %v1146_v34 = vld [vmem:[#allocation8 + $0x58] sm:$0xff] }
 0x2a6   :  { %v5810_v49 = vcombine.low %v1146_v34, %v1150_v35  ;;  %v1362_v29 = vld [vmem:[#allocation8 + $0x718] sm:$0xff] }
 0x2a7   :  { %4710 = vmatpush2.bf16.msra.mxu0 %v6120_v39  ;;  %v5946_v39 = vcombine.low %v1282_v30, %v1286_v31  ;;  %v1366_v30 = vld [vmem:[#allocation8 + $0x738] sm:$0xff] }
 0x2a8   :  { %4753 = vmatpush2.bf16.msra.mxu1 %v6248_v40  ;;  %4765 = vmatprep.subr.bf16.mxu0 %v5859_v56  ;;  %v5811_v40 = vcombine.high %v1146_v34, %v1150_v35  ;;  %v5939_v56 = vcombine.high %v1274_v36, %v1278_v37  ;;  %v1230_v34 = vld [vmem:[#allocation8 + $0x2f8] sm:$0xff] }
 0x2a9   :  { %4808 = vmatprep.subr.bf16.mxu1 %v5987_v41  ;;  %v1138_v41 = vld [vmem:[#allocation8 + $0x18] sm:$0xff] }
 0x2aa   :  { %4712 = vmatmul.mubr.bf16.vlgmr.msra.gmra.mxu0 %v6874_v4  ;;  %v5802_v9 = vcombine.low %v1138_v41, %v1142_v42  ;;  %v1354_v35 = vld [vmem:[#allocation8 + $0x6d8] sm:$0xff] }
 0x2ab   :  { %4755 = vmatmul.mubr.bf16.vlgmr.msra.gmra.mxu1 %v6878_v7  ;;  %4766 = vmatpush1.bf16.msra.mxu0 %v5858_v47  ;;  %v1270_v47 = vld [vmem:[#allocation8 + $0x438] sm:$0xff] }
 0x2ac   :  { %4797 = vmatprep.mubr.bf16.mxu0 %v6838_v63  ;;  %4809 = vmatpush1.bf16.msra.mxu1 %v5986_v54  ;;  %v5963_v63 = vcombine.high %v1298_v16, %v1302_v17  ;;  %v5803_v54 = vcombine.high %v1138_v41, %v1142_v42  ;;  %v1382_v16 = vld [vmem:[#allocation8 + $0x7b8] sm:$0xff]  ;;  %v5922_v17 = vcombine.low %v1258_v61, %v1262_v62 }
 0x2ad   :  { %4840 = vmatprep.mubr.bf16.mxu1 %v6842_v1  ;;  %4767 = vmatprep.subr.bf16.mxu0 %v5851_v58  ;;  %v5834_v1 = vcombine.low %v1170_v14, %v1174_v15  ;;  %v5931_v58 = vcombine.high %v1266_v46, %v1270_v47  ;;  %v1254_v14 = vld [vmem:[#allocation8 + $0x3b8] sm:$0xff] }
 0x2ae   :  { %4810 = vmatprep.subr.bf16.mxu1 %v5979_v2  ;;  %v1386_v2 = vld [vmem:[#allocation8 + $0x7d8] sm:$0xff] }
 0x2af   :  { %4768 = vmatpush1.bf16.msra.mxu0 %v5850_v10  ;;  %v5930_v10 = vcombine.low %v1266_v46, %v1270_v47  ;;  %v1378_v15 = vld [vmem:[#allocation8 + $0x798] sm:$0xff] }
 0x2b0   :  { %4811 = vmatpush1.bf16.msra.mxu1 %v5978_v11  ;;  %4769 = vmatprep.subr.bf16.mxu0 %v5843_v12  ;;  %v5923_v11 = vcombine.high %v1258_v61, %v1262_v62  ;;  %v6051_v12 = vcombine.high %v1386_v2, %v1390_v6  ;;  %v1358_v36 = vld [vmem:[#allocation8 + $0x6f8] sm:$0xff] }
 0x2b1   :  { %4812 = vmatprep.subr.bf16.mxu1 %v5971_v13  ;;  %v1250_v13 = vld [vmem:[#allocation8 + $0x398] sm:$0xff] }
 0x2b2   :  { %v5914_v48 = vcombine.low %v1250_v13, %v1254_v14  ;;  %v1222_v41 = vld [vmem:[#allocation8 + $0x2b8] sm:$0xff] }
 0x2b3   :  { %4770 = vmatpush1.bf16.msra.mxu0 %v5842_v18  ;;  %v6050_v18 = vcombine.low %v1386_v2, %v1390_v6  ;;  %v1346_v42 = vld [vmem:[#allocation8 + $0x698] sm:$0xff] }
 0x2b4   :  { %4813 = vmatpush1.bf16.msra.mxu1 %v5970_v43  ;;  %4771 = vmatprep.subr.bf16.mxu0 %v5835_v44  ;;  %v5915_v43 = vcombine.high %v1250_v13, %v1254_v14  ;;  %v6043_v44 = vcombine.high %v1378_v15, %v1382_v16  ;;  %v1350_v46 = vld [vmem:[#allocation8 + $0x6b8] sm:$0xff] }
 0x2b5   :  { %4814 = vmatprep.subr.bf16.mxu1 %v5963_v63  ;;  %v1242_v63 = vld [vmem:[#allocation8 + $0x358] sm:$0xff] }
 0x2b6   :  { %v5906_v31 = vcombine.low %v1242_v63, %v1246_v50  ;;  %v1214_v61 = vld [vmem:[#allocation8 + $0x278] sm:$0xff] }
 0x2b7   :  { %4772 = vmatpush1.bf16.msra.mxu0 %v5834_v1  ;;  %v6042_v1 = vcombine.low %v1378_v15, %v1382_v16  ;;  %v1338_v62 = vld [vmem:[#allocation8 + $0x658] sm:$0xff] }
 0x2b8   :  { %4815 = vmatpush1.bf16.msra.mxu1 %v5962_v51  ;;  %4773 = vmatprep.subr.bf16.mxu0 %v5827_v26  ;;  %v5907_v51 = vcombine.high %v1242_v63, %v1246_v50  ;;  %v6035_v26 = vcombine.high %v1370_v19, %v1374_v45  ;;  %v1342_v2 = vld [vmem:[#allocation8 + $0x678] sm:$0xff] }
 0x2b9   :  { %4816 = vmatprep.subr.bf16.mxu1 %v5955_v27  ;;  %v1234_v27 = vld [vmem:[#allocation8 + $0x318] sm:$0xff] }
 0x2ba   :  { %v5898_v37 = vcombine.low %v1234_v27, %v1238_v28  ;;  %v1206_v13 = vld [vmem:[#allocation8 + $0x238] sm:$0xff] }
 0x2bb   :  { %4774 = vmatpush1.bf16.msra.mxu0 %v5826_v24  ;;  %v6034_v24 = vcombine.low %v1370_v19, %v1374_v45  ;;  %v1330_v14 = vld [vmem:[#allocation8 + $0x618] sm:$0xff] }
 0x2bc   :  { %4817 = vmatpush1.bf16.msra.mxu1 %v5954_v32  ;;  %4775 = vmatprep.subr.bf16.mxu0 %v5819_v33  ;;  %v5899_v32 = vcombine.high %v1234_v27, %v1238_v28  ;;  %v6027_v33 = vcombine.high %v1362_v29, %v1366_v30  ;;  %v1334_v15 = vld [vmem:[#allocation8 + $0x638] sm:$0xff] }
 0x2bd   :  { %4818 = vmatprep.subr.bf16.mxu1 %v5947_v8  ;;  %v1226_v8 = vld [vmem:[#allocation8 + $0x2d8] sm:$0xff] }
 0x2be   :  { %v5890_v47 = vcombine.low %v1226_v8, %v1230_v34  ;;  %v1454_v63 = vld [vmem:[#allocation8 + $0x9f8] sm:$0xff] }
 0x2bf   :  { %4776 = vmatpush1.bf16.msra.mxu0 %v5818_v38  ;;  %v6026_v38 = vcombine.low %v1362_v29, %v1366_v30  ;;  %v1578_v50 = vld [vmem:[#allocation8 + $0xdd8] sm:$0xff] }
 0x2c0   :  { %4819 = vmatpush1.bf16.msra.mxu1 %v5946_v39  ;;  %4777 = vmatprep.subr.bf16.mxu0 %v5811_v40  ;;  %v5891_v39 = vcombine.high %v1226_v8, %v1230_v34  ;;  %v6019_v40 = vcombine.high %v1354_v35, %v1358_v36  ;;  %v1582_v19 = vld [vmem:[#allocation8 + $0xdf8] sm:$0xff] }
 0x2c1   :  { %4820 = vmatprep.subr.bf16.mxu1 %v5939_v56  ;;  %v1218_v56 = vld [vmem:[#allocation8 + $0x298] sm:$0xff] }
 0x2c2   :  { %v5882_v6 = vcombine.low %v1218_v56, %v1222_v41  ;;  %v1442_v27 = vld [vmem:[#allocation8 + $0x998] sm:$0xff] }
 0x2c3   :  { %4778 = vmatpush1.bf16.msra.mxu0 %v5810_v49  ;;  %v6018_v49 = vcombine.low %v1354_v35, %v1358_v36  ;;  %v1446_v28 = vld [vmem:[#allocation8 + $0x9b8] sm:$0xff] }
 0x2c4   :  { %4821 = vmatpush1.bf16.msra.mxu1 %v5938_v53  ;;  %4779 = vmatprep.subr.bf16.mxu0 %v5803_v54  ;;  %v5883_v53 = vcombine.high %v1218_v56, %v1222_v41  ;;  %v6011_v54 = vcombine.high %v1346_v42, %v1350_v46  ;;  %v1570_v30 = vld [vmem:[#allocation8 + $0xd98] sm:$0xff] }
 0x2c5   :  { %4822 = vmatprep.subr.bf16.mxu1 %v5931_v58  ;;  %v1210_v58 = vld [vmem:[#allocation8 + $0x258] sm:$0xff] }
 0x2c6   :  { %v5874_v16 = vcombine.low %v1210_v58, %v1214_v61  ;;  %v1438_v8 = vld [vmem:[#allocation8 + $0x978] sm:$0xff] }
 0x2c7   :  { %4780 = vmatpush1.bf16.msra.mxu0 %v5802_v9  ;;  %v6010_v9 = vcombine.low %v1346_v42, %v1350_v46  ;;  %v1562_v36 = vld [vmem:[#allocation8 + $0xd58] sm:$0xff] }
 0x2c8   :  { %4823 = vmatpush1.bf16.msra.mxu1 %v5930_v10  ;;  %4781 = vmatprep.subr.bf16.mxu0 %v5923_v11  ;;  %v5875_v10 = vcombine.high %v1210_v58, %v1214_v61  ;;  %v6003_v11 = vcombine.high %v1338_v62, %v1342_v2  ;;  %v1426_v42 = vld [vmem:[#allocation8 + $0x918] sm:$0xff] }
 0x2c9   :  { %4824 = vmatprep.subr.bf16.mxu1 %v6051_v12  ;;  %v1202_v12 = vld [vmem:[#allocation8 + $0x218] sm:$0xff] }
 0x2ca   :  { %v5866_v45 = vcombine.low %v1202_v12, %v1206_v13  ;;  %v1422_v61 = vld [vmem:[#allocation8 + $0x8f8] sm:$0xff] }
 0x2cb   :  { %4782 = vmatpush2.bf16.msra.mxu0 %v5922_v17  ;;  %v6002_v17 = vcombine.low %v1338_v62, %v1342_v2  ;;  %v1546_v2 = vld [vmem:[#allocation8 + $0xcd8] sm:$0xff] }
 0x2cc   :  { %4825 = vmatpush2.bf16.msra.mxu1 %v6050_v18  ;;  %4783 = vmatprep.subr.bf16.mxu0 %v5915_v43  ;;  %v5867_v18 = vcombine.high %v1202_v12, %v1206_v13  ;;  %v5995_v43 = vcombine.high %v1330_v14, %v1334_v15 }
 0x2cd   :  { %4826 = vmatprep.subr.bf16.mxu1 %v6043_v44  ;;  %v1450_v44 = vld [vmem:[#allocation8 + $0x9d8] sm:$0xff] }
 0x2ce   :  { %v6114_v29 = vcombine.low %v1450_v44, %v1454_v63 }
 0x2cf   :  { %4784 = vmatpush2.bf16.msra.mxu0 %v5914_v48  ;;  %v5994_v48 = vcombine.low %v1330_v14, %v1334_v15  ;;  %v1410_v15 = vld [vmem:[#allocation8 + $0x898] sm:$0xff] }
 0x2d0   :  { %4827 = vmatpush2.bf16.msra.mxu1 %v6042_v1  ;;  %4785 = vmatprep.subr.bf16.mxu0 %v5907_v51  ;;  %v6115_v1 = vcombine.high %v1450_v44, %v1454_v63  ;;  %v6243_v51 = vcombine.high %v1578_v50, %v1582_v19 }
 0x2d1   :  { %4828 = vmatprep.subr.bf16.mxu1 %v6035_v26  ;;  %v6902_v26 = vpop.f32.mrf.mxu0 }
 0x2d3   :  { %4786 = vmatpush2.bf16.msra.mxu0 %v5906_v31  ;;  %v1574_v31 = vld [vmem:[#allocation8 + $0xdb8] sm:$0xff]  ;;  %v6904_v34 = vpop.f32.mrf.mxu0 }
 0x2d4   :  { %4829 = vmatpush2.bf16.msra.mxu1 %v6034_v24  ;;  %4787 = vmatprep.subr.bf16.mxu0 %v5899_v32  ;;  %v6242_v24 = vcombine.low %v1578_v50, %v1582_v19  ;;  %v6107_v32 = vcombine.high %v1442_v27, %v1446_v28  ;;  %v6235_v35 = vcombine.high %v1570_v30, %v1574_v31 }
 0x2d5   :  { %4830 = vmatprep.subr.bf16.mxu1 %v6027_v33  ;;  %v1434_v33 = vld [vmem:[#allocation8 + $0x958] sm:$0xff]  ;;  %v6912_v46 = vpop.f32.mrf.mxu0 }
 0x2d6   :  { %v6099_v56 = vcombine.high %v1434_v33, %v1438_v8 }
 0x2d7   :  { %4788 = vmatpush2.bf16.msra.mxu0 %v5898_v37  ;;  %v1566_v37 = vld [vmem:[#allocation8 + $0xd78] sm:$0xff]  ;;  %v6916_v62 = vpop.f32.mrf.mxu0 }
 0x2d8   :  { %4831 = vmatpush2.bf16.msra.mxu1 %v6026_v38  ;;  %4789 = vmatprep.subr.bf16.mxu0 %v5891_v39  ;;  %v6106_v38 = vcombine.low %v1442_v27, %v1446_v28  ;;  %v6908_v39 = vpop.f32.mrf.mxu1  ;;  %v6227_v41 = vcombine.high %v1562_v36, %v1566_v37  ;;  %v1530_v27 = vld [vmem:[#allocation8 + $0xc58] sm:$0xff] }
 0x2d9   :  { %4832 = vmatprep.subr.bf16.mxu1 %v6019_v40  ;;  %v6234_v40 = vcombine.low %v1570_v30, %v1574_v31  ;;  %v1534_v28 = vld [vmem:[#allocation8 + $0xc78] sm:$0xff] }
 0x2db   :  { %4790 = vmatpush2.bf16.msra.mxu0 %v5890_v47  ;;  %v1554_v47 = vld [vmem:[#allocation8 + $0xd18] sm:$0xff] }
 0x2dc   :  { %4833 = vmatpush2.bf16.msra.mxu1 %v6018_v49  ;;  %4791 = vmatprep.subr.bf16.mxu0 %v5883_v53  ;;  %v6098_v49 = vcombine.low %v1434_v33, %v1438_v8  ;;  %v6914_v53 = vpop.f32.mrf.mxu1  ;;  %v1394_v33 = vld [vmem:[#allocation8 + $0x818] sm:$0xff] }
 0x2dd   :  { %4834 = vmatprep.subr.bf16.mxu1 %v6011_v54  ;;  %v1398_v8 = vld [vmem:[#allocation8 + $0x838] sm:$0xff] }
 0x2df   :  { %4792 = vmatpush2.bf16.msra.mxu0 %v5882_v6  ;;  %v1550_v6 = vld [vmem:[#allocation8 + $0xcf8] sm:$0xff] }
 0x2e0   :  { %4835 = vmatpush2.bf16.msra.mxu1 %v6010_v9  ;;  %4793 = vmatprep.subr.bf16.mxu0 %v5875_v10  ;;  %v6918_v10 = vpop.f32.mrf.mxu1  ;;  %v6211_v14 = vcombine.high %v1546_v2, %v1550_v6  ;;  %v6210_v50 = vcombine.low %v1546_v2, %v1550_v6  ;;  %v1506_v6 = vld [vmem:[#allocation8 + $0xb98] sm:$0xff] }
 0x2e1   :  { %4836 = vmatprep.subr.bf16.mxu1 %v6003_v11  ;;  %v6920_v11 = vpop.f32.mrf.mxu0 }
 0x2e2   :  { %v6922_v44 = vpop.f32.mrf.mxu1 }
 0x2e3   :  { %4794 = vmatpush2.bf16.msra.mxu0 %v5874_v16  ;;  %v1414_v16 = vld [vmem:[#allocation8 + $0x8b8] sm:$0xff]  ;;  %v6924_v63 = vpop.f32.mrf.mxu0 }
 0x2e4   :  { %4837 = vmatpush2.bf16.msra.mxu1 %v6002_v17  ;;  %4795 = vmatprep.subr.bf16.mxu0 %v5867_v18  ;;  %v1538_v17 = vld [vmem:[#allocation8 + $0xc98] sm:$0xff]  ;;  %v6075_v19 = vcombine.high %v1410_v15, %v1414_v16 }
 0x2e5   :  { %4838 = vmatprep.subr.bf16.mxu1 %v5995_v43  ;;  %v1542_v18 = vld [vmem:[#allocation8 + $0xcb8] sm:$0xff]  ;;  %v6928_v30 = vpop.f32.mrf.mxu0 }
 0x2e6   :  { %v6202_v31 = vcombine.low %v1538_v17, %v1542_v18 }
 0x2e7   :  { %4796 = vmatpush2.bf16.msra.mxu0 %v5866_v45  ;;  %v6203_v45 = vcombine.high %v1538_v17, %v1542_v18 }
 0x2e8   :  { %4839 = vmatpush2.bf16.msra.mxu1 %v5994_v48  ;;  %4851 = vmatprep.subr.bf16.mxu0 %v6115_v1  ;;  %v1402_v48 = vld [vmem:[#allocation8 + $0x858] sm:$0xff] }
 0x2e9   :  { %4894 = vmatprep.subr.bf16.mxu1 %v6243_v51  ;;  %v1406_v1 = vld [vmem:[#allocation8 + $0x878] sm:$0xff]  ;;  %v6926_v51 = vpop.f32.mrf.mxu1 }
 0x2ea   :  { %4798 = vmatmul.mubr.bf16.vlgmr.msra.gmra.mxu0 %v6840_v0  ;;  %v1430_v0 = vld [vmem:[#allocation8 + $0x938] sm:$0xff] }
 0x2eb   :  { %4841 = vmatmul.mubr.bf16.vlgmr.msra.gmra.mxu1 %v6844_v3  ;;  %4852 = vmatpush1.bf16.msra.mxu0 %v6114_v29  ;;  %v1558_v3 = vld [vmem:[#allocation8 + $0xd38] sm:$0xff]  ;;  %v6091_v54 = vcombine.high %v1426_v42, %v1430_v0  ;;  %v6090_v9 = vcombine.low %v1426_v42, %v1430_v0  ;;  %v6074_v29 = vcombine.low %v1410_v15, %v1414_v16 }
 0x2ec   :  { %4883 = vmatprep.mubr.bf16.mxu0 %v6872_v59  ;;  %4895 = vmatpush1.bf16.msra.mxu1 %v6242_v24  ;;  %v6226_v59 = vcombine.low %v1562_v36, %v1566_v37  ;;  %v6219_v58 = vcombine.high %v1554_v47, %v1558_v3  ;;  %v6218_v12 = vcombine.low %v1554_v47, %v1558_v3  ;;  %v1522_v36 = vld [vmem:[#allocation8 + $0xc18] sm:$0xff] }
 0x2ed   :  { %4926 = vmatprep.mubr.bf16.mxu1 %v6876_v5  ;;  %4853 = vmatprep.subr.bf16.mxu0 %v6107_v32  ;;  %v1418_v5 = vld [vmem:[#allocation8 + $0x8d8] sm:$0xff]  ;;  %v6067_v24 = vcombine.high %v1402_v48, %v1406_v1  ;;  %v6195_v32 = vcombine.high %v1530_v27, %v1534_v28 }
 0x2ee   :  { %4896 = vmatprep.subr.bf16.mxu1 %v6235_v35  ;;  %v6083_v13 = vcombine.high %v1418_v5, %v1422_v61  ;;  %v6082_v43 = vcombine.low %v1418_v5, %v1422_v61  ;;  %v6930_v35 = vpop.f32.mrf.mxu1  ;;  %v1526_v37 = vld [vmem:[#allocation8 + $0xc38] sm:$0xff] }
 0x2ef   :  { %4854 = vmatpush1.bf16.msra.mxu0 %v6106_v38  ;;  %v6066_v38 = vcombine.low %v1402_v48, %v1406_v1  ;;  %v6187_v42 = vcombine.high %v1522_v36, %v1526_v37  ;;  %v1514_v0 = vld [vmem:[#allocation8 + $0xbd8] sm:$0xff]  ;;  %v6186_v5 = vcombine.low %v1522_v36, %v1526_v37 }
 0x2f0   :  { %4897 = vmatpush1.bf16.msra.mxu1 %v6234_v40  ;;  %4855 = vmatprep.subr.bf16.mxu0 %v6099_v56  ;;  %v6932_v40 = vpop.f32.mrf.mxu0  ;;  %v6194_v56 = vcombine.low %v1530_v27, %v1534_v28  ;;  %v1518_v47 = vld [vmem:[#allocation8 + $0xbf8] sm:$0xff]  ;;  %v6934_v3 = vpop.f32.mrf.mxu1 }
 0x2f1   :  { %4898 = vmatprep.subr.bf16.mxu1 %v6227_v41  ;;  %v6059_v41 = vcombine.high %v1394_v33, %v1398_v8  ;;  %v6179_v61 = vcombine.high %v1514_v0, %v1518_v47  ;;  %v1638_v15 = vld [vmem:[#allocation8 + $0xfb8] sm:$0xff]  ;;  %v6178_v16 = vcombine.low %v1514_v0, %v1518_v47 }
 0x2f2   :  { %v1626_v1 = vld [vmem:[#allocation8 + $0xf58] sm:$0xff] }
 0x2f3   :  { %4856 = vmatpush1.bf16.msra.mxu0 %v6098_v49  ;;  %v6936_v49 = vpop.f32.mrf.mxu0  ;;  %v1630_v27 = vld [vmem:[#allocation8 + $0xf78] sm:$0xff] }
 0x2f4   :  { %4899 = vmatpush1.bf16.msra.mxu1 %v6226_v59  ;;  %4857 = vmatprep.subr.bf16.mxu0 %v6091_v54  ;;  %v1642_v59 = vld [vmem:[#allocation8 + $0xfd8] sm:$0xff]  ;;  %v6290_v0 = vcombine.low %v1626_v1, %v1630_v27 }
 0x2f5   :  { %4900 = vmatprep.subr.bf16.mxu1 %v6219_v58  ;;  %v1646_v54 = vld [vmem:[#allocation8 + $0xff8] sm:$0xff]  ;;  %v6058_v58 = vcombine.low %v1394_v33, %v1398_v8 }
 0x2f6   :  { %v6307_v2 = vcombine.high %v1642_v59, %v1646_v54  ;;  %v6306_v18 = vcombine.low %v1642_v59, %v1646_v54  ;;  %v1490_v33 = vld [vmem:[#allocation8 + $0xb18] sm:$0xff] }
 0x2f7   :  { %4858 = vmatpush1.bf16.msra.mxu0 %v6090_v9  ;;  %v1510_v9 = vld [vmem:[#allocation8 + $0xbb8] sm:$0xff] }
 0x2f8   :  { %4901 = vmatpush1.bf16.msra.mxu1 %v6218_v12  ;;  %4859 = vmatprep.subr.bf16.mxu0 %v6083_v13  ;;  %v6938_v12 = vpop.f32.mrf.mxu1  ;;  %v6940_v13 = vpop.f32.mrf.mxu0  ;;  %v6170_v28 = vcombine.low %v1506_v6, %v1510_v9  ;;  %v1494_v8 = vld [vmem:[#allocation8 + $0xb38] sm:$0xff] }
 0x2f9   :  { %4902 = vmatprep.subr.bf16.mxu1 %v6211_v14  ;;  %v1634_v14 = vld [vmem:[#allocation8 + $0xf98] sm:$0xff]  ;;  %v6155_v47 = vcombine.high %v1490_v33, %v1494_v8 }
 0x2fa   :  { %v6942_v17 = vpop.f32.mrf.mxu1  ;;  %v6944_v48 = vpop.f32.mrf.mxu0  ;;  %v1618_v37 = vld [vmem:[#allocation8 + $0xf18] sm:$0xff] }
 0x2fb   :  { %4860 = vmatpush1.bf16.msra.mxu0 %v6082_v43  ;;  %v6171_v43 = vcombine.high %v1506_v6, %v1510_v9  ;;  %v1482_v54 = vld [vmem:[#allocation8 + $0xad8] sm:$0xff] }
 0x2fc   :  { %4903 = vmatpush1.bf16.msra.mxu1 %v6210_v50  ;;  %4861 = vmatprep.subr.bf16.mxu0 %v6075_v19  ;;  %v6299_v50 = vcombine.high %v1634_v14, %v1638_v15  ;;  %v1498_v19 = vld [vmem:[#allocation8 + $0xb58] sm:$0xff]  ;;  %v4461_v36 = vpop.f32.mrf.mxu0 }
 0x2fd   :  { %4904 = vmatprep.subr.bf16.mxu1 %v6203_v45  ;;  %v1502_v45 = vld [vmem:[#allocation8 + $0xb78] sm:$0xff] }
 0x2ff   :  { %4862 = vmatpush1.bf16.msra.mxu0 %v6074_v29  ;;  %v6946_v29 = vpop.f32.mrf.mxu1 }
 0x300   :  { %4905 = vmatpush1.bf16.msra.mxu1 %v6202_v31  ;;  %4863 = vmatprep.subr.bf16.mxu0 %v6067_v24  ;;  %v6298_v31 = vcombine.low %v1634_v14, %v1638_v15  ;;  %v6163_v24 = vcombine.high %v1498_v19, %v1502_v45 }
 0x301   :  { %4906 = vmatprep.subr.bf16.mxu1 %v6195_v32  ;;  %v6291_v32 = vcombine.high %v1626_v1, %v1630_v27  ;;  %v1602_v1 = vld [vmem:[#allocation8 + $0xe98] sm:$0xff] }
 0x302   :  { %v1606_v27 = vld [vmem:[#allocation8 + $0xeb8] sm:$0xff] }
 0x303   :  { %4864 = vmatpush1.bf16.msra.mxu0 %v6066_v38  ;;  %v1622_v38 = vld [vmem:[#allocation8 + $0xf38] sm:$0xff] }
 0x304   :  { %4907 = vmatpush1.bf16.msra.mxu1 %v6194_v56  ;;  %4865 = vmatprep.subr.bf16.mxu0 %v6059_v41  ;;  %v6162_v56 = vcombine.low %v1498_v19, %v1502_v45  ;;  %v6948_v41 = vpop.f32.mrf.mxu1  ;;  %v6283_v59 = vcombine.high %v1618_v37, %v1622_v38  ;;  %v6282_v14 = vcombine.low %v1618_v37, %v1622_v38  ;;  %v1466_v38 = vld [vmem:[#allocation8 + $0xa58] sm:$0xff] }
 0x305   :  { %4908 = vmatprep.subr.bf16.mxu1 %v6187_v42  ;;  %v6950_v42 = vpop.f32.mrf.mxu0 }
 0x306   :  { %v4504_v6 = vpop.f32.mrf.mxu1 }
 0x307   :  { %4866 = vmatpush1.bf16.msra.mxu0 %v6058_v58  ;;  %v1486_v58 = vld [vmem:[#allocation8 + $0xaf8] sm:$0xff]  ;;  %v4543_v9 = vpop.f32.mrf.mxu0 }
 0x308   :  { %4909 = vmatpush1.bf16.msra.mxu1 %v6186_v5  ;;  %4867 = vmatprep.subr.bf16.mxu0 %v6179_v61  ;;  %v1610_v5 = vld [vmem:[#allocation8 + $0xed8] sm:$0xff]  ;;  %v6147_v15 = vcombine.high %v1482_v54, %v1486_v58  ;;  %v6957_v45 = vpop.f32.mrf.mxu1 }
 0x309   :  { %4910 = vmatprep.subr.bf16.mxu1 %v6307_v2  ;;  %v1614_v61 = vld [vmem:[#allocation8 + $0xef8] sm:$0xff]  ;;  %v6154_v2 = vcombine.low %v1490_v33, %v1494_v8 }
 0x30a   :  { %v6274_v33 = vcombine.low %v1610_v5, %v1614_v61 }
 0x30b   :  { %4868 = vmatpush2.bf16.msra.mxu0 %v6178_v16  ;;  %v6952_v16 = vld [vmem:[#allocation10] sm:$0xff] }
 0x30c   :  { %4911 = vmatpush2.bf16.msra.mxu1 %v6306_v18  ;;  %4869 = vmatprep.subr.bf16.mxu0 %v6171_v43  ;;  %v6275_v18 = vcombine.high %v1610_v5, %v1614_v61  ;;  %v1474_v43 = vld [vmem:[#allocation8 + $0xa98] sm:$0xff]  ;;  %v1656_v19 = vrot.slane %v6952_v16, %v255_v21  ;;  %v6267_v21 = vcombine.high %v1602_v1, %v1606_v27 }
 0x30d   :  { %4912 = vmatprep.subr.bf16.mxu1 %v6299_v50  ;;  %v1478_v50 = vld [vmem:[#allocation8 + $0xab8] sm:$0xff]  ;;  %v6266_v5 = vcombine.low %v1602_v1, %v1606_v27 }
 0x30e   :  { %v6139_v8 = vcombine.high %v1474_v43, %v1478_v50 }
 0x30f   :  { %4870 = vmatpush2.bf16.msra.mxu0 %v6170_v28  ;;  %v1664_v28 = vrot.slane %v6952_v16, %v263_v23  ;;  %v1598_v23 = vld [vmem:[#allocation8 + $0xe78] sm:$0xff] }
 0x310   :  { %4913 = vmatpush2.bf16.msra.mxu1 %v6298_v31  ;;  %4871 = vmatprep.subr.bf16.mxu0 %v6163_v24  ;;  %v6146_v31 = vcombine.low %v1482_v54, %v1486_v58  ;;  %v4290_v24 = vadd.f32 %v6916_v62, %v1656_v19  ;;  %v6138_v62 = vcombine.low %v1474_v43, %v1478_v50  ;;  %v1590_v43 = vld [vmem:[#allocation8 + $0xe38] sm:$0xff] }
 0x311   :  { %4914 = vmatprep.subr.bf16.mxu1 %v6291_v32  ;;  %v6963_v32 = vpop.f32.mrf.mxu0  ;;  %v4462_v37 = vadd.f32 %v4461_v36, %v1664_v28  ;;  %v4458_v54 = vadd.f32 %v6940_v13, %v1664_v28  ;;  %v1586_v13 = vld [vmem:[#allocation8 + $0xe18] sm:$0xff] }
 0x312   :  { %v4333_v58 = vadd.f32 %v6922_v44, %v4290_v24 }
 0x313   :  { %4872 = vmatpush2.bf16.msra.mxu0 %v6162_v56  ;;  %v1470_v56 = vld [vmem:[#allocation8 + $0xa78] sm:$0xff]  ;;  %v4505_v61 = vadd.f32 %v4504_v6, %v4462_v37  ;;  %v4501_v44 = vadd.f32 %v6946_v29, %v4458_v54  ;;  %v6250_v37 = vcombine.low %v1586_v13, %v1590_v43 }
 0x314   :  { %4915 = vmatpush2.bf16.msra.mxu1 %v6290_v0  ;;  %4873 = vmatprep.subr.bf16.mxu0 %v6155_v47  ;;  %v4286_v0 = vadd.f32 %v6904_v34, %v1656_v19  ;;  %v4586_v47 = vpop.f32.mrf.mxu1  ;;  %v6131_v36 = vcombine.high %v1466_v38, %v1470_v56  ;;  %v4376_v19 = vadd.f32 %v6932_v40, %v4333_v58  ;;  %v6482_v54 = vld [vmem:[#allocation11 + $0x70] sm:$0xff]  }
 0x315   :  { %4916 = vmatprep.subr.bf16.mxu1 %v6283_v59  ;;  %v1594_v59 = vld [vmem:[#allocation8 + $0xe58] sm:$0xff]  ;;  %v6130_v28 = vcombine.low %v1466_v38, %v1470_v56  ;;  %v6479_v38 = vld [vmem:[#allocation11 + $0xf8] sm:$0xff]  }
 0x316   :  { %v4329_v34 = vadd.f32 %v6914_v53, %v4286_v0  ;;  %v6970_v60 = vpop.f32.mrf.mxu1  ;;  %v6258_v6 = vcombine.low %v1594_v59, %v1598_v23  ;;  %v6251_v53 = vcombine.high %v1586_v13, %v1590_v43  ;;  %v4419_v40 = vadd.f32 %v6938_v12, %v4376_v19  ;;  %v6481_v12 = vld [vmem:[#allocation11 + $0xb8] sm:$0xff]  }
 0x317   :  { %4874 = vmatpush2.bf16.msra.mxu0 %v6154_v2  ;;  %v4547_v2 = vpop.f32.mrf.mxu0  ;;  %v6494_v19 = vld [vmem:[#allocation11 + $0x58] sm:$0xff]   ;;  %v1660_v13 = vrot.slane %v6952_v16, %v259_v25 }
 0x318   :  { %4917 = vmatpush2.bf16.msra.mxu1 %v6282_v14  ;;  %4875 = vmatprep.subr.bf16.mxu0 %v6147_v15  ;;  %v6259_v14 = vcombine.high %v1594_v59, %v1598_v23  ;;  %v1458_v15 = vld [vmem:[#allocation8 + $0xa18] sm:$0xff]  ;;  %v4548_v50 = vadd.f32 %v4547_v2, %v4505_v61  ;;  %v4372_v1 = vadd.f32 %v6924_v63, %v4329_v34  ;;  %v4590_v24 = vpop.f32.mrf.mxu1  ;;  %v4946_v56 = vmax.f32 %v4419_v40, 0.0  ;;  %v6488_v61 = vld [vmem:[#allocation11 + $0x28] sm:$0xff]   ;;  %v6493_v34 = vld [vmem:[#allocation11 + $0xa0] sm:$0xff]  }
 0x319   :  { %4918 = vmatprep.subr.bf16.mxu1 %v6275_v18  ;;  %v1462_v18 = vld [vmem:[#allocation8 + $0xa38] sm:$0xff]  ;;  %v6495_v43 = vld [vmem:[#allocation11 + $0xd8] sm:$0xff]  }
 0x31a   :  { %v6123_v27 = vcombine.high %v1458_v15, %v1462_v18  ;;  %v4415_v29 = vadd.f32 %v6930_v35, %v4372_v1  ;;  %v6483_v35 = vld [vmem:[#allocation11 + $0xf0] sm:$0xff]  }
 0x31b   :  { %4876 = vmatpush2.bf16.msra.mxu0 %v6146_v31  ;;  %v4544_v31 = vadd.f32 %v4543_v9, %v4501_v44  ;;  %v6480_v9 = vld [vmem:[#allocation11 + $0x38] sm:$0xff]   ;;  %v6485_v2 = vld [vmem:[#allocation11 + $0xb0] sm:$0xff]  }
 0x31c   :  { %4919 = vmatpush2.bf16.msra.mxu1 %v6274_v33  ;;  %4877 = vmatprep.subr.bf16.mxu0 %v6139_v8  ;;  %v4591_v33 = vadd.f32 %v4590_v24, %v4548_v50  ;;  %v6122_v8 = vcombine.low %v1458_v15, %v1462_v18  ;;  %v4938_v59 = vmax.f32 %v4415_v29, 0.0  ;;  %v6491_v15 = vld [vmem:[#allocation11 + $0xe0] sm:$0xff]   ;;  %v1652_v18 = vrot.slane %v6952_v16, %v251_v22  ;;  %v6497_v22 = vld [vmem:[#allocation11 + $0x98] sm:$0xff]   ;;  %v6502_v24 = vld [vmem:[#allocation11 + $0x48] sm:$0xff]  }
 0x31d   :  { %4920 = vmatprep.subr.bf16.mxu1 %v6267_v21  ;;  %v6478_v21 = vld [vmem:[#allocation11 + $0x78] sm:$0xff]   ;;  %v4587_v63 = vadd.f32 %v4586_v47, %v4544_v31  ;;  %v6484_v47 = vld [vmem:[#allocation11 + $0x30] sm:$0xff]   ;;  %v4460_v50 = vadd.f32 %v6944_v48, %v1660_v13  ;;  %v6504_v29 = vld [vmem:[#allocation11 + $0x8] sm:$0xff]  }
 0x31e   :  { %v4948_v0 = vmax.f32 %v4591_v33, 0.0  ;;  %v4288_v44 = vadd.f32 %v6912_v46, %v1652_v18  ;;  %v4284_v1 = vadd.f32 %v6902_v26, %v1652_v18  ;;  %v6499_v31 = vld [vmem:[#allocation11 + $0xd0] sm:$0xff]  }
 0x31f   :  { %4878 = vmatpush2.bf16.msra.mxu0 %v6138_v62  ;;  %v4940_v23 = vmax.f32 %v4587_v63, 0.0  ;;  %v4954_v62 = vpack.c.bf16 %v4946_v56, %v4938_v59  ;;  %v6500_v46 = vld [vmem:[#allocation11 + $0x10] sm:$0xff]   ;;  %v6510_v56 = vld [vmem:[#allocation11 + $0x178] sm:$0xff]  }
 0x320   :  { %4921 = vmatpush2.bf16.msra.mxu1 %v6266_v5  ;;  %4879 = vmatprep.subr.bf16.mxu0 %v6131_v36  ;;  %v6486_v5 = vld [vmem:[#allocation11 + $0x68] sm:$0xff]   ;;  %v4331_v25 = vadd.f32 %v6918_v10, %v4288_v44  ;;  %v4327_v48 = vadd.f32 %v6908_v39, %v4284_v1  ;;  %v6501_v26 = vld [vmem:[#allocation11 + $0x90] sm:$0xff]  }
 0x321   :  { %4922 = vmatprep.subr.bf16.mxu1 %v6259_v14  ;;  %v4956_v58 = vpack.c.bf16 %v4948_v0, %v4940_v23  ;;  %v6487_v36 = vld [vmem:[#allocation11 + $0xe8] sm:$0xff]   ;;  %v6526_v0 = vld [vmem:[#allocation11 + $0x1f8] sm:$0xff]   ;;  %v6520_v18 = vld [vmem:[#allocation11 + $0x150] sm:$0xff]  }
 0x322   :  { %v6489_v14 = vld [vmem:[#allocation11 + $0xa8] sm:$0xff]   ;;  %v4374_v40 = vadd.f32 %v6928_v30, %v4331_v25  ;;  %v4370_v10 = vadd.f32 %v6920_v11, %v4327_v48  ;;  %v6508_v11 = vld [vmem:[#allocation11] sm:$0xff]   ;;  %v6527_v23 = vld [vmem:[#allocation11 + $0x1b8] sm:$0xff]  }
 0x323   :  { %4880 = vmatpush2.bf16.msra.mxu0 %v6130_v28  ;;  %v6496_v28 = vld [vmem:[#allocation11 + $0x18] sm:$0xff]   ;;  %v6505_v30 = vld [vmem:[#allocation11 + $0x88] sm:$0xff]  }
 0x324   :  { %4923 = vmatpush2.bf16.msra.mxu1 %v6258_v6  ;;  %4881 = vmatprep.subr.bf16.mxu0 %v6123_v27  ;;  %v6498_v6 = vld [vmem:[#allocation11 + $0x50] sm:$0xff]   ;;  %v4456_v27 = vadd.f32 %v6936_v49, %v1660_v13  ;;  %v4417_v39 = vadd.f32 %v6934_v3, %v4374_v40  ;;  %v6522_v13 = vld [vmem:[#allocation11 + $0x148] sm:$0xff]  }
 0x325   :  { %4924 = vmatprep.subr.bf16.mxu1 %v6251_v53  ;;  %v4503_v53 = vadd.f32 %v6948_v41, %v4460_v50  ;;  %v6523_v44 = vld [vmem:[#allocation11 + $0x108] sm:$0xff]  }
 0x326   :  { %v4499_v33 = vadd.f32 %v6942_v17, %v4456_v27  ;;  %v6507_v17 = vld [vmem:[#allocation11 + $0xc0] sm:$0xff]   ;;  %v1668_v27 = vrot.slane %v6952_v16, %v267_v55 }
 0x327   :  { %4882 = vmatpush2.bf16.msra.mxu0 %v6122_v8  ;;  %v4546_v49 = vadd.f32 %v6963_v32, %v4503_v53  ;;  %v6503_v8 = vld [vmem:[#allocation11 + $0xc8] sm:$0xff]   ;;  %v4413_v32 = vadd.f32 %v6926_v51, %v4370_v10  ;;  %v6512_v51 = vld [vmem:[#allocation11 + $0x170] sm:$0xff]   ;;  %v6535_v10 = vld [vmem:[#allocation11 + $0x198] sm:$0xff]  }
 0x328   :  { %4925 = vmatpush2.bf16.msra.mxu1 %v6250_v37  ;;  %6373 = vmatprep.subr.bf16.mxu0 %v6478_v21  ;;  %v4542_v41 = vadd.f32 %v6950_v42, %v4499_v33  ;;  %v6506_v37 = vld [vmem:[#allocation11 + $0x40] sm:$0xff]   ;;  %v6534_v33 = vld [vmem:[#allocation11 + $0x1d8] sm:$0xff]  }
 0x329   :  { %6395 = vmatprep.subr.bf16.mxu1 %v6479_v38  ;;  %v4589_v21 = vadd.f32 %v6970_v60, %v4546_v49  ;;  %v4945_v38 = vmax.f32 %v4417_v39, 0.0  ;;  %v6509_v42 = vld [vmem:[#allocation11 + $0x80] sm:$0xff]   ;;  %v6511_v60 = vld [vmem:[#allocation11 + $0x138] sm:$0xff]  }
 0x32a   :  { %4884 = vmatmul.mubr.bf16.vlgmr.msra.gmra.mxu0 %v6874_v4  ;;  %v6490_v4 = vld [vmem:[#allocation11 + $0x60] sm:$0xff]   ;;  %v4585_v63 = vadd.f32 %v6957_v45, %v4542_v41 }
 0x32b   :  { %4927 = vmatmul.mubr.bf16.vlgmr.msra.gmra.mxu1 %v6878_v7  ;;  %6374 = vmatpush3.bf16.msra.mxu0 %v6480_v9  ;;  %v6492_v7 = vld [vmem:[#allocation11 + $0x20] sm:$0xff]   ;;  %v4947_v3 = vmax.f32 %v4589_v21, 0.0  ;;  %v4937_v9 = vmax.f32 %v4413_v32, 0.0 }
 0x32c   :  { %5512 = vmatprep.mubr.bf16.mxu0 %v4954_v62  ;;  %6396 = vmatpush3.bf16.msra.mxu1 %v6481_v12  ;;  %v4939_v59 = vmax.f32 %v4585_v63, 0.0  ;;  %v6513_v62 = vld [vmem:[#allocation11 + $0x130] sm:$0xff]  }
 0x32d   :  { %5553 = vmatprep.mubr.bf16.mxu1 %v4956_v58  ;;  %6375 = vmatprep.subr.bf16.mxu0 %v6482_v54  ;;  %v4953_v12 = vpack.c.bf16 %v4945_v38, %v4937_v9  ;;  %v6528_v54 = vld [vmem:[#allocation11 + $0x1f0] sm:$0xff]  }
 0x32e   :  { %6397 = vmatprep.subr.bf16.mxu1 %v6483_v35  ;;  %v4955_v45 = vpack.c.bf16 %v4947_v3, %v4939_v59  ;;  %v6514_v35 = vld [vmem:[#allocation11 + $0x168] sm:$0xff]   ;;  %v6529_v58 = vld [vmem:[#allocation11 + $0x1b0] sm:$0xff]  }
 0x32f   :  { %6376 = vmatpush3.bf16.msra.mxu0 %v6484_v47  ;;  %v6530_v47 = vld [vmem:[#allocation11 + $0x1e8] sm:$0xff]   ;;  %v6537_v38 = vld [vmem:[#allocation11 + $0x190] sm:$0xff]  }
 0x330   :  { %6398 = vmatpush3.bf16.msra.mxu1 %v6485_v2  ;;  %6377 = vmatprep.subr.bf16.mxu0 %v6486_v5  ;;  %v6515_v2 = vld [vmem:[#allocation11 + $0x128] sm:$0xff]   ;;  %v6516_v5 = vld [vmem:[#allocation11 + $0x160] sm:$0xff]  }
 0x331   :  { %6399 = vmatprep.subr.bf16.mxu1 %v6487_v36  ;;  %v6531_v36 = vld [vmem:[#allocation11 + $0x1a8] sm:$0xff]  }
 0x333   :  { %6378 = vmatpush3.bf16.msra.mxu0 %v6488_v61  ;;  %v6532_v61 = vld [vmem:[#allocation11 + $0x1e0] sm:$0xff]  }
 0x334   :  { %6400 = vmatpush3.bf16.msra.mxu1 %v6489_v14  ;;  %6379 = vmatprep.subr.bf16.mxu0 %v6490_v4  ;;  %v6517_v14 = vld [vmem:[#allocation11 + $0x120] sm:$0xff]   ;;  %v6518_v4 = vld [vmem:[#allocation11 + $0x158] sm:$0xff]  }
 0x335   :  { %6401 = vmatprep.subr.bf16.mxu1 %v6491_v15  ;;  %v6533_v15 = vld [vmem:[#allocation11 + $0x1a0] sm:$0xff]  }
 0x337   :  { %6380 = vmatpush3.bf16.msra.mxu0 %v6492_v7  ;;  %v6519_v7 = vld [vmem:[#allocation11 + $0x118] sm:$0xff]  }
 0x338   :  { %6402 = vmatpush3.bf16.msra.mxu1 %v6493_v34  ;;  %6381 = vmatprep.subr.bf16.mxu0 %v6494_v19  ;;  %v6521_v34 = vld [vmem:[#allocation11 + $0x110] sm:$0xff]   ;;  %v4627_v19 = vpop.f32.mrf.mxu0 }
 0x339   :  { %6403 = vmatprep.subr.bf16.mxu1 %v6495_v43  ;;  %v4670_v43 = vpop.f32.mrf.mxu1 }
 0x33a   :  { %v4629_v50 = vpop.f32.mrf.mxu0 }
 0x33b   :  { %6382 = vmatpush3.bf16.msra.mxu0 %v6496_v28  ;;  %v6524_v28 = vld [vmem:[#allocation11 + $0x140] sm:$0xff]   ;;  %v4672_v1 = vpop.f32.mrf.mxu1 }
 0x33c   :  { %6404 = vmatpush3.bf16.msra.mxu1 %v6497_v22  ;;  %6383 = vmatprep.subr.bf16.mxu0 %v6498_v6  ;;  %v1672_v22 = vrot.slane %v6952_v16, %v271_v52  ;;  %v6525_v6 = vld [vmem:[#allocation11 + $0x100] sm:$0xff]  }
 0x33d   :  { %6405 = vmatprep.subr.bf16.mxu1 %v6499_v31  ;;  %v4631_v31 = vpop.f32.mrf.mxu0  ;;  %v4674_v25 = vpop.f32.mrf.mxu1 }
 0x33e   :  { %v4630_v53 = vadd.f32 %v4629_v50, %v1672_v22  ;;  %v4632_v40 = vadd.f32 %v4631_v31, %v1668_v27 }
 0x33f   :  { %6384 = vmatpush3.bf16.msra.mxu0 %v6500_v46  ;;  %v4628_v46 = vadd.f32 %v4627_v19, %v1668_v27  ;;  %v4633_v48 = vpop.f32.mrf.mxu0 }
 0x340   :  { %6406 = vmatpush3.bf16.msra.mxu1 %v6501_v26  ;;  %6385 = vmatprep.subr.bf16.mxu0 %v6502_v24  ;;  %v4676_v26 = vpop.f32.mrf.mxu1  ;;  %v4673_v49 = vadd.f32 %v4672_v1, %v4630_v53  ;;  %v4675_v39 = vadd.f32 %v4674_v25, %v4632_v40 }
 0x341   :  { %6407 = vmatprep.subr.bf16.mxu1 %v6503_v8  ;;  %v4634_v8 = vadd.f32 %v4633_v48, %v1672_v22  ;;  %v4671_v41 = vadd.f32 %v4670_v43, %v4628_v46 }
 0x343   :  { %6386 = vmatpush3.bf16.msra.mxu0 %v6504_v29  ;;  %v4677_v32 = vadd.f32 %v4676_v26, %v4634_v8 }
 0x344   :  { %6408 = vmatpush3.bf16.msra.mxu1 %v6505_v30  ;;  %6387 = vmatprep.subr.bf16.mxu0 %v6506_v37 }
 0x345   :  { %6409 = vmatprep.subr.bf16.mxu1 %v6507_v17  ;;  %v6536_v17 = vld [vmem:[#allocation11 + $0x1d0] sm:$0xff]  }
 0x347   :  { %6388 = vmatpush3.bf16.msra.mxu0 %v6508_v11 }
 0x348   :  { %6410 = vmatpush3.bf16.msra.mxu1 %v6509_v42  ;;  %6417 = vmatprep.subr.bf16.mxu0 %v6510_v56 }
 0x349   :  { %6439 = vmatprep.subr.bf16.mxu1 %v6526_v0 }
 0x34a   :  { %5513 = vmatmul.mubr.bf16.vlgmr.msra.gmra.mxu0 %v4953_v12 }
 0x34b   :  { %5554 = vmatmul.mubr.bf16.vlgmr.msra.gmra.mxu1 %v4955_v45  ;;  %6418 = vmatpush3.bf16.msra.mxu0 %v6511_v60  ;;  %v6538_v60 = vld [vmem:[#allocation11 + $0x1c8] sm:$0xff]  }
 0x34c   :  { %6419 = vmatprep.subr.bf16.mxu0 %v6512_v51  ;;  %6440 = vmatpush3.bf16.msra.mxu1 %v6527_v23  ;;  %v6539_v51 = vld [vmem:[#allocation11 + $0x188] sm:$0xff]  }
 0x34d   :  { %6441 = vmatprep.subr.bf16.mxu1 %v6528_v54 }
 0x34f   :  { %6420 = vmatpush3.bf16.msra.mxu0 %v6513_v62 }
 0x350   :  { %6421 = vmatprep.subr.bf16.mxu0 %v6514_v35  ;;  %6442 = vmatpush3.bf16.msra.mxu1 %v6529_v58  ;;  %v6540_v35 = vld [vmem:[#allocation11 + $0x1c0] sm:$0xff]  }
 0x351   :  { %6443 = vmatprep.subr.bf16.mxu1 %v6530_v47  ;;  %v6541_v47 = vld [vmem:[#allocation11 + $0x180] sm:$0xff]  }
 0x353   :  { %6422 = vmatpush3.bf16.msra.mxu0 %v6515_v2 }
 0x354   :  { %6423 = vmatprep.subr.bf16.mxu0 %v6516_v5  ;;  %6444 = vmatpush3.bf16.msra.mxu1 %v6531_v36 }
 0x355   :  { %6445 = vmatprep.subr.bf16.mxu1 %v6532_v61 }
 0x357   :  { %6424 = vmatpush3.bf16.msra.mxu0 %v6517_v14 }
 0x358   :  { %6425 = vmatprep.subr.bf16.mxu0 %v6518_v4  ;;  %6446 = vmatpush3.bf16.msra.mxu1 %v6533_v15  ;;  %v1680_v4 = vrot.slane %v6952_v16, %v279_v57  ;;  %v7027_v15 = vsub.s32 6, %v6818_v20 }
 0x359   :  { %6447 = vmatprep.subr.bf16.mxu1 %v6534_v33 }
 0x35b   :  { %6426 = vmatpush3.bf16.msra.mxu0 %v6519_v7  ;;  %v1676_v7 = vrot.slane %v6952_v16, %v7027_v15 }
 0x35c   :  { %6427 = vmatprep.subr.bf16.mxu0 %v6520_v18  ;;  %6448 = vmatpush3.bf16.msra.mxu1 %v6535_v10 }
 0x35d   :  { %6449 = vmatprep.subr.bf16.mxu1 %v6536_v17 }
 0x35f   :  { %6428 = vmatpush3.bf16.msra.mxu0 %v6521_v34 }
 0x360   :  { %6429 = vmatprep.subr.bf16.mxu0 %v6522_v13  ;;  %6450 = vmatpush3.bf16.msra.mxu1 %v6537_v38 }
 0x361   :  { %6451 = vmatprep.subr.bf16.mxu1 %v6538_v60 }
 0x363   :  { %6430 = vmatpush3.bf16.msra.mxu0 %v6523_v44 }
 0x364   :  { %6431 = vmatprep.subr.bf16.mxu0 %v6524_v28  ;;  %6452 = vmatpush3.bf16.msra.mxu1 %v6539_v51 }
 0x365   :  { %6453 = vmatprep.subr.bf16.mxu1 %v6540_v35 }
 0x367   :  { %6432 = vmatpush3.bf16.msra.mxu0 %v6525_v6 }
 0x368   :  { %6454 = vmatpush3.bf16.msra.mxu1 %v6541_v47 }
 0x36a   :  { %v4713_v24 = vpop.f32.mrf.mxu0 }
 0x36b   :  { %v4756_v52 = vpop.f32.mrf.mxu1  ;;  %v4714_v37 = vadd.f32 %v4713_v24, %v4671_v41 }
 0x36c   :  { %v4715_v29 = vpop.f32.mrf.mxu0 }
 0x36d   :  { %v4716_v55 = vadd.f32 %v4715_v29, %v4673_v49  ;;  %v4758_v30 = vpop.f32.mrf.mxu1  ;;  %v4757_v9 = vadd.f32 %v4756_v52, %v4714_v37 }
 0x36e   :  { %v4717_v21 = vpop.f32.mrf.mxu0 }
 0x36f   :  { %v4718_v63 = vadd.f32 %v4717_v21, %v4675_v39  ;;  %v4760_v11 = vpop.f32.mrf.mxu1  ;;  %v4759_v56 = vadd.f32 %v4758_v30, %v4716_v55  ;;  %v4941_v62 = vmax.f32 %v4757_v9, 0.0 }
 0x370   :  { %v4719_v42 = vpop.f32.mrf.mxu0 }
 0x371   :  { %v4761_v3 = vadd.f32 %v4760_v11, %v4718_v63  ;;  %v4720_v0 = vadd.f32 %v4719_v42, %v4677_v32  ;;  %v4762_v59 = vpop.f32.mrf.mxu1  ;;  %v4942_v45 = vmax.f32 %v4759_v56, 0.0 }
 0x373   :  { %v4763_v12 = vadd.f32 %v4762_v59, %v4720_v0  ;;  %v4949_v23 = vmax.f32 %v4761_v3, 0.0  ;;  %v6308_v0 = vld [vmem:[#allocation13] ss:$0 sm:$0xff] }
 0x375   :  { %v4950_v54 = vmax.f32 %v4763_v12, 0.0  ;;  %v4957_v2 = vpack.c.bf16 %v4949_v23, %v4941_v62 }
 0x377   :  { %v4958_v58 = vpack.c.bf16 %v4950_v54, %v4942_v45 }
 0x379   :  { %5594 = vmatprep.mubr.bf16.mxu0 %v4958_v58 }
 0x37a   :  { %5595 = vmatmul.mubr.bf16.vlgmr.msra.gmra.mxu0 %v4957_v2 }
 0x3aa   :  { %v4799_v5 = vpop.f32.mrf.mxu0 }
 0x3ab   :  { %v4842_v36 = vpop.f32.mrf.mxu1  ;;  %v4800_v13 = vadd.f32 %v4799_v5, %v1676_v7 }
 0x3ac   :  { %v4801_v61 = vpop.f32.mrf.mxu0 }
 0x3ad   :  { %v4844_v14 = vpop.f32.mrf.mxu1  ;;  %v4802_v19 = vadd.f32 %v4801_v61, %v1680_v4  ;;  %v4843_v27 = vadd.f32 %v4842_v36, %v4800_v13 }
 0x3ae   :  { %v4803_v18 = vpop.f32.mrf.mxu0 }
 0x3af   :  { %v4846_v34 = vpop.f32.mrf.mxu1  ;;  %v4804_v44 = vadd.f32 %v4803_v18, %v1676_v7  ;;  %v4845_v1 = vadd.f32 %v4844_v14, %v4802_v19 }
 0x3b0   :  { %v4805_v43 = vpop.f32.mrf.mxu0 }
 0x3b1   :  { %v4848_v50 = vpop.f32.mrf.mxu1  ;;  %v4806_v22 = vadd.f32 %v4805_v43, %v1680_v4  ;;  %v4847_v25 = vadd.f32 %v4846_v34, %v4804_v44 }
 0x3b3   :  { %v4849_v48 = vadd.f32 %v4848_v50, %v4806_v22 }
 0x3ea   :  { %v4885_v28 = vpop.f32.mrf.mxu0 }
 0x3eb   :  { %v4928_v6 = vpop.f32.mrf.mxu1  ;;  %v4886_v46 = vadd.f32 %v4885_v28, %v4843_v27 }
 0x3ec   :  { %v4887_v31 = vpop.f32.mrf.mxu0 }
 0x3ed   :  { %v4888_v53 = vadd.f32 %v4887_v31, %v4845_v1  ;;  %v4930_v57 = vpop.f32.mrf.mxu1  ;;  %v4929_v8 = vadd.f32 %v4928_v6, %v4886_v46 }
 0x3ee   :  { %v4889_v20 = vpop.f32.mrf.mxu0 }
 0x3ef   :  { %v4890_v16 = vadd.f32 %v4889_v20, %v4847_v25  ;;  %v4932_v40 = vpop.f32.mrf.mxu1  ;;  %v4931_v24 = vadd.f32 %v4930_v57, %v4888_v53  ;;  %v4943_v55 = vmax.f32 %v4929_v8, 0.0 }
 0x3f0   :  { %v4891_v26 = vpop.f32.mrf.mxu0 }
 0x3f1   :  { %v4933_v33 = vadd.f32 %v4932_v40, %v4890_v16  ;;  %v4892_v49 = vadd.f32 %v4891_v26, %v4849_v48  ;;  %v4934_v52 = vpop.f32.mrf.mxu1  ;;  %v4944_v29 = vmax.f32 %v4931_v24, 0.0 }
 0x3f3   :  { %v4935_v10 = vadd.f32 %v4934_v52, %v4892_v49  ;;  %v4951_v41 = vmax.f32 %v4933_v33, 0.0 }
 0x3f5   :  { %v4952_v39 = vmax.f32 %v4935_v10, 0.0  ;;  %v4959_v37 = vpack.c.bf16 %v4951_v41, %v4943_v55 }
 0x3f7   :  { %v4960_v30 = vpack.c.bf16 %v4952_v39, %v4944_v29 }
 0x3f9   :  { %5635 = vmatprep.mubr.bf16.mxu1 %v4960_v30 }
 0x3fa   :  { %5636 = vmatmul.mubr.bf16.vlgmr.msra.gmra.mxu1 %v4959_v37 }
 0x40a   :  { %v6389_v21 = vpop.f32.mrf.mxu0 }
 0x40b   :  { %v6411_v63 = vpop.f32.mrf.mxu1 }
 0x40c   :  { %v6390_v17 = vpop.f32.mrf.mxu0 }
 0x40d   :  { %v6412_v42 = vpop.f32.mrf.mxu1  ;;  %v6391_v3 = vadd.f32 %v6390_v17, %v6389_v21 }
 0x40e   :  { %v6392_v32 = vpop.f32.mrf.mxu0  ;;  %v6413_v23 = vadd.f32 %v6412_v42, %v6411_v63 }
 0x40f   :  { %v6414_v9 = vpop.f32.mrf.mxu1  ;;  %v5515_v60 = vadd.f32 %v6391_v3, %v6308_v0 }
 0x410   :  { %v6393_v11 = vpop.f32.mrf.mxu0 }
 0x411   :  { %v6394_v12 = vadd.f32 %v6393_v11, %v6392_v32  ;;  %v6415_v51 = vpop.f32.mrf.mxu1  ;;  %v5556_v35 = vadd.f32 %v6413_v23, %v5515_v60 }
 0x412   :  { %v6416_v2 = vadd.f32 %v6415_v51, %v6414_v9 }
 0x413   :  { %v5518_v58 = vadd.f32 %v6394_v12, %v6308_v0 }
 0x415   :  { %v5559_v4 = vadd.f32 %v6416_v2, %v5518_v58 }
 0x43a   :  { %v6433_v38 = vpop.f32.mrf.mxu0 }
 0x43c   :  { %v6434_v56 = vpop.f32.mrf.mxu0 }
 0x43d   :  { %v6435_v45 = vadd.f32 %v6434_v56, %v6433_v38 }
 0x43e   :  { %v6436_v59 = vpop.f32.mrf.mxu0 }
 0x43f   :  { %v5597_v5 = vadd.f32 %v6435_v45, %v5556_v35 }
 0x440   :  { %v6437_v54 = vpop.f32.mrf.mxu0 }
 0x441   :  { %v6438_v36 = vadd.f32 %v6437_v54, %v6436_v59 }
 0x443   :  { %v5600_v18 = vadd.f32 %v6438_v36, %v5559_v4 }
 0x4ba   :  { %v6455_v62 = vpop.f32.mrf.mxu1 }
 0x4bc   :  { %v6456_v47 = vpop.f32.mrf.mxu1 }
 0x4bd   :  { %v6457_v61 = vadd.f32 %v6456_v47, %v6455_v62 }
 0x4be   :  { %v6458_v14 = vpop.f32.mrf.mxu1 }
 0x4bf   :  { %v5638_v15 = vadd.f32 %v6457_v61, %v5597_v5 }
 0x4c0   :  { %v6459_v7 = vpop.f32.mrf.mxu1 }
 0x4c1   :  { %5644 = vst [vmem:[#allocation14] sm:$0xff] %v5638_v15  ;;  %v6460_v34 = vadd.f32 %v6459_v7, %v6458_v14 }
 0x4c3   :  { %v5641_v19 = vadd.f32 %v6460_v34, %v5600_v18 }
 0x4c5   :  { %5645 = vst [vmem:[#allocation14 + $0x8] sm:$0xff] %v5641_v19 }
 0x4c6   :  { %6693 = shalt.err (!%p6690_p11)
}
 0x4c7   :  { %5657 = dma.vmem_to_hbm [thread:$0]  %s5652_s6, 256, %s7025_s7, [#allocation4], %s6720_s3, %s6720_s3, %s6721_s22  }
 0x4c8   :  { %6710 = dma.done.wait [#allocation4], 256  }
 0x4c9   :  { %6711 = vsyncadd [#allocation4], 4294967040 }
 0x4ca   :  { %5661 = vsyncpa [#allocation3], 1 }
 0x4cb   :  { %5662 = vsyncpa [#allocation6], 1 }
 0x4cc   :  { %5663 = vsyncpa [#allocation9], 1 }
 0x4cd   :  { %5664 = vsyncpa [#allocation12], 1 }
 0x4ce   :  { %5665 = vsyncpa [#allocation4], 1 }

</bundles_post_ra>
